<compile_context>
chip_gen: v7x
topology: tpu7x:2x2x1
jax: 0.10.0
libtpu: 0.0.40
codegen_flags: <defaults>
</compile_context>

<pallas_src>
import functools
import math

import jax
import jax.numpy as jnp
from jax.experimental import pallas as pl
from jax.experimental.pallas import tpu as pltpu


def _modal_classifier_kernel(*refs, num_blocks, eps):
    """Fused forward: 8 x (matmul + train-mode BN + ReLU) + final Linear.

    refs layout:
      refs[0]                      : x            (B, embed_dim)
      refs[1 : 1+4*num_blocks]     : per block    w (Cin,Cout), b (1,Cout),
                                                  gamma (1,Cout), beta (1,Cout)
      refs[1+4*num_blocks]         : lin_w        (hidden, modal_class)
      refs[2+4*num_blocks]         : lin_b        (1, modal_class)
      refs[3+4*num_blocks]         : output       (B, modal_class)
    """
    x_ref = refs[0]
    block_refs = refs[1:1 + 4 * num_blocks]
    lin_w_ref = refs[1 + 4 * num_blocks]
    lin_b_ref = refs[2 + 4 * num_blocks]
    o_ref = refs[3 + 4 * num_blocks]

    h = x_ref[...].astype(jnp.float32)  # (B, C_in), channels on lanes

    for i in range(num_blocks):
        w = block_refs[4 * i][...]          # (C_in, C_out)
        b = block_refs[4 * i + 1][...]      # (1, C_out)
        gamma = block_refs[4 * i + 2][...]  # (1, C_out)
        beta = block_refs[4 * i + 3][...]   # (1, C_out)

        # Conv1d(k=3, s=2, p=1) on a length-1 sequence == middle-tap matmul.
        y = jnp.dot(h, w, preferred_element_type=jnp.float32) + b

        # BatchNorm1d, training mode: biased stats over the batch axis.
        mean = jnp.mean(y, axis=0, keepdims=True)
        centered = y - mean
        var = jnp.mean(centered * centered, axis=0, keepdims=True)
        y = centered * jax.lax.rsqrt(var + eps) * gamma + beta

        # ReLU
        h = jnp.maximum(y, 0.0)

    out = jnp.dot(h, lin_w_ref[...], preferred_element_type=jnp.float32)
    out = out + lin_b_ref[...]
    o_ref[...] = out.astype(o_ref.dtype)


def modal_classifier_forward(latent, layer_params, lin_w, lin_b, eps=1e-5):
    """Pallas forward.

    latent:        (B, embed_dim) float32
    layer_params:  list of 8 tuples (conv_w (Cout,Cin,3), conv_b (Cout,),
                                     bn_gamma (Cout,), bn_beta (Cout,))
    lin_w:         (modal_class, 8)   (PyTorch Linear layout)
    lin_b:         (modal_class,)
    """
    B = latent.shape[0]
    modal_class = lin_w.shape[0]

    # Layout plumbing on the host side: collapse each Conv1d to its effective
    # (Cin, Cout) matmul weight (middle kernel tap) and make all per-channel
    # vectors lane-dense (1, C) rows.
    flat = []
    for conv_w, conv_b, gamma, beta in layer_params:
        cout = conv_w.shape[0]
        flat.append(jnp.asarray(conv_w)[:, :, 1].T)       # (Cin, Cout)
        flat.append(jnp.asarray(conv_b).reshape(1, cout))
        flat.append(jnp.asarray(gamma).reshape(1, cout))
        flat.append(jnp.asarray(beta).reshape(1, cout))
    flat.append(jnp.asarray(lin_w).T)                      # (hidden, modal_class)
    flat.append(jnp.asarray(lin_b).reshape(1, modal_class))

    num_inputs = 1 + len(flat)
    kernel = functools.partial(
        _modal_classifier_kernel, num_blocks=len(layer_params), eps=eps)

    return pl.pallas_call(
        kernel,
        out_shape=jax.ShapeDtypeStruct((B, modal_class), jnp.float32),
        in_specs=[pl.BlockSpec(memory_space=pltpu.MemorySpace.VMEM)] * num_inputs,
        out_specs=pl.BlockSpec(memory_space=pltpu.MemorySpace.VMEM),
    )(latent, *flat)


def reference_forward(latent, layer_params, lin_w, lin_b, eps=1e-5):
    """Pure-JAX mirror of the torch forward (explicit pad + full conv kernel)."""
    h = latent[:, :, None]                                   # unsqueeze(2)
    for conv_w, conv_b, gamma, beta in layer_params:
        hp = jnp.pad(h, ((0, 0), (0, 0), (1, 1)))            # padding=1
        # stride=2, kernel=3 on padded length 3 -> one output position that
        # covers the entire padded window.
        y = jnp.einsum('oik,bik->bo', conv_w, hp,
                       precision=jax.lax.Precision.HIGHEST) + conv_b
        mean = jnp.mean(y, axis=0)                           # BN train stats
        var = jnp.mean((y - mean) ** 2, axis=0)              # biased variance
        y = (y - mean) / jnp.sqrt(var + eps) * gamma + beta
        h = jnp.maximum(y, 0.0)[:, :, None]                  # ReLU
    feat = h[:, :, 0]                                        # squeeze(2)
    return jnp.dot(feat, jnp.asarray(lin_w).T,
                   precision=jax.lax.Precision.HIGHEST) + lin_b


if __name__ == "__main__":
    B, embed_dim, modal_class = 4, 32, 4

    # Channel plan fixed by the module: embed_dim -> 1024 -> 512 -> ... -> 8
    chans = [embed_dim] + [1024 // (2 ** i) for i in range(8)]

    key = jax.random.PRNGKey(0)
    keys = jax.random.split(key, 4 * 8 + 3)

    layer_params = []
    ki = 0
    for i in range(8):
        cin, cout = chans[i], chans[i + 1]
        conv_w = jax.random.normal(keys[ki], (cout, cin, 3),
                                   jnp.float32) / math.sqrt(3 * cin)
        ki += 1
        conv_b = 0.1 * jax.random.normal(keys[ki], (cout,), jnp.float32)
        ki += 1
        gamma = 1.0 + 0.1 * jax.random.normal(keys[ki], (cout,), jnp.float32)
        ki += 1
        beta = 0.1 * jax.random.normal(keys[ki], (cout,), jnp.float32)
        ki += 1
        layer_params.append((conv_w, conv_b, gamma, beta))

    lin_w = jax.random.normal(keys[ki], (modal_class, chans[-1]),
                              jnp.float32) / math.sqrt(chans[-1])
    ki += 1
    lin_b = 0.1 * jax.random.normal(keys[ki], (modal_class,), jnp.float32)
    ki += 1
    latent = jax.random.normal(keys[ki], (B, embed_dim), jnp.float32)

    out = modal_classifier_forward(latent, layer_params, lin_w, lin_b)
    out = jax.block_until_ready(out)

    ref = reference_forward(latent, layer_params, lin_w, lin_b)
    max_err = float(jnp.max(jnp.abs(out - ref)))

    assert out.shape == (B, modal_class)
    assert jnp.allclose(out, ref, atol=1e-2, rtol=1e-2), f"max abs err = {max_err}"

    print("KERNEL_OK")
</pallas_src>

<mosaic_0001>
module attributes {stable_mosaic.version = 11 : i64} {
  func.func @_modal_classifier_kernel(%arg0: memref<4x32xf32, #tpu.memory_space<vmem>>, %arg1: memref<32x1024xf32, #tpu.memory_space<vmem>>, %arg2: memref<1x1024xf32, #tpu.memory_space<vmem>>, %arg3: memref<1x1024xf32, #tpu.memory_space<vmem>>, %arg4: memref<1x1024xf32, #tpu.memory_space<vmem>>, %arg5: memref<1024x512xf32, #tpu.memory_space<vmem>>, %arg6: memref<1x512xf32, #tpu.memory_space<vmem>>, %arg7: memref<1x512xf32, #tpu.memory_space<vmem>>, %arg8: memref<1x512xf32, #tpu.memory_space<vmem>>, %arg9: memref<512x256xf32, #tpu.memory_space<vmem>>, %arg10: memref<1x256xf32, #tpu.memory_space<vmem>>, %arg11: memref<1x256xf32, #tpu.memory_space<vmem>>, %arg12: memref<1x256xf32, #tpu.memory_space<vmem>>, %arg13: memref<256x128xf32, #tpu.memory_space<vmem>>, %arg14: memref<1x128xf32, #tpu.memory_space<vmem>>, %arg15: memref<1x128xf32, #tpu.memory_space<vmem>>, %arg16: memref<1x128xf32, #tpu.memory_space<vmem>>, %arg17: memref<128x64xf32, #tpu.memory_space<vmem>>, %arg18: memref<1x64xf32, #tpu.memory_space<vmem>>, %arg19: memref<1x64xf32, #tpu.memory_space<vmem>>, %arg20: memref<1x64xf32, #tpu.memory_space<vmem>>, %arg21: memref<64x32xf32, #tpu.memory_space<vmem>>, %arg22: memref<1x32xf32, #tpu.memory_space<vmem>>, %arg23: memref<1x32xf32, #tpu.memory_space<vmem>>, %arg24: memref<1x32xf32, #tpu.memory_space<vmem>>, %arg25: memref<32x16xf32, #tpu.memory_space<vmem>>, %arg26: memref<1x16xf32, #tpu.memory_space<vmem>>, %arg27: memref<1x16xf32, #tpu.memory_space<vmem>>, %arg28: memref<1x16xf32, #tpu.memory_space<vmem>>, %arg29: memref<16x8xf32, #tpu.memory_space<vmem>>, %arg30: memref<1x8xf32, #tpu.memory_space<vmem>>, %arg31: memref<1x8xf32, #tpu.memory_space<vmem>>, %arg32: memref<1x8xf32, #tpu.memory_space<vmem>>, %arg33: memref<8x4xf32, #tpu.memory_space<vmem>>, %arg34: memref<1x4xf32, #tpu.memory_space<vmem>>, %arg35: memref<4x4xf32, #tpu.memory_space<vmem>>) attributes {dimension_semantics = [], scalar_prefetch = 0 : i64, scratch_operands = 0 : i64, tpu.core_type = #tpu.core_type<tc>} {
    %c0 = arith.constant 0 : index
    %c0_0 = arith.constant 0 : index
    %0 = vector.load %arg0[%c0, %c0_0] : memref<4x32xf32, #tpu.memory_space<vmem>>, vector<4x32xf32>
    %c0_1 = arith.constant 0 : index
    %c0_2 = arith.constant 0 : index
    %1 = vector.load %arg1[%c0_1, %c0_2] : memref<32x1024xf32, #tpu.memory_space<vmem>>, vector<32x1024xf32>
    %c0_3 = arith.constant 0 : index
    %c0_4 = arith.constant 0 : index
    %2 = vector.load %arg2[%c0_3, %c0_4] : memref<1x1024xf32, #tpu.memory_space<vmem>>, vector<1x1024xf32>
    %c0_5 = arith.constant 0 : index
    %c0_6 = arith.constant 0 : index
    %3 = vector.load %arg3[%c0_5, %c0_6] : memref<1x1024xf32, #tpu.memory_space<vmem>>, vector<1x1024xf32>
    %c0_7 = arith.constant 0 : index
    %c0_8 = arith.constant 0 : index
    %4 = vector.load %arg4[%c0_7, %c0_8] : memref<1x1024xf32, #tpu.memory_space<vmem>>, vector<1x1024xf32>
    %cst = arith.constant dense<0.000000e+00> : vector<4x1024xf32>
    %5 = tpu.matmul %0, %1, %cst {dimension_numbers = #tpu.dot_dimension_numbers<[1], [0], [0], [1], [0, 0, 1, 1], [], []>} : vector<4x32xf32>, vector<32x1024xf32>, vector<4x1024xf32> -> vector<4x1024xf32>
    %6 = vector.broadcast %2 : vector<1x1024xf32> to vector<4x1024xf32>
    %7 = arith.addf %5, %6 : vector<4x1024xf32>
    %cst_9 = arith.constant dense<0.000000e+00> : vector<1024xf32>
    %8 = vector.multi_reduction <add>, %7, %cst_9 [0] : vector<4x1024xf32> to vector<1024xf32>
    %9 = vector.shape_cast %8 : vector<1024xf32> to vector<1x1024xf32>
    %cst_10 = arith.constant 4.000000e+00 : f32
    %10 = vector.broadcast %cst_10 : f32 to vector<1x1024xf32>
    %11 = arith.divf %9, %10 : vector<1x1024xf32>
    %12 = vector.broadcast %11 : vector<1x1024xf32> to vector<4x1024xf32>
    %13 = arith.subf %7, %12 : vector<4x1024xf32>
    %14 = arith.mulf %13, %13 : vector<4x1024xf32>
    %cst_11 = arith.constant dense<0.000000e+00> : vector<1024xf32>
    %15 = vector.multi_reduction <add>, %14, %cst_11 [0] : vector<4x1024xf32> to vector<1024xf32>
    %16 = vector.shape_cast %15 : vector<1024xf32> to vector<1x1024xf32>
    %cst_12 = arith.constant 4.000000e+00 : f32
    %17 = vector.broadcast %cst_12 : f32 to vector<1x1024xf32>
    %18 = arith.divf %16, %17 : vector<1x1024xf32>
    %cst_13 = arith.constant 9.99999974E-6 : f32
    %19 = vector.broadcast %cst_13 : f32 to vector<1x1024xf32>
    %20 = arith.addf %18, %19 : vector<1x1024xf32>
    %21 = math.rsqrt %20 : vector<1x1024xf32>
    %22 = vector.broadcast %21 : vector<1x1024xf32> to vector<4x1024xf32>
    %23 = arith.mulf %13, %22 : vector<4x1024xf32>
    %24 = vector.broadcast %3 : vector<1x1024xf32> to vector<4x1024xf32>
    %25 = arith.mulf %23, %24 : vector<4x1024xf32>
    %26 = vector.broadcast %4 : vector<1x1024xf32> to vector<4x1024xf32>
    %27 = arith.addf %25, %26 : vector<4x1024xf32>
    %cst_14 = arith.constant 0.000000e+00 : f32
    %28 = vector.broadcast %cst_14 : f32 to vector<4x1024xf32>
    %29 = arith.maximumf %27, %28 : vector<4x1024xf32>
    %c0_15 = arith.constant 0 : index
    %c0_16 = arith.constant 0 : index
    %30 = vector.load %arg5[%c0_15, %c0_16] : memref<1024x512xf32, #tpu.memory_space<vmem>>, vector<1024x512xf32>
    %c0_17 = arith.constant 0 : index
    %c0_18 = arith.constant 0 : index
    %31 = vector.load %arg6[%c0_17, %c0_18] : memref<1x512xf32, #tpu.memory_space<vmem>>, vector<1x512xf32>
    %c0_19 = arith.constant 0 : index
    %c0_20 = arith.constant 0 : index
    %32 = vector.load %arg7[%c0_19, %c0_20] : memref<1x512xf32, #tpu.memory_space<vmem>>, vector<1x512xf32>
    %c0_21 = arith.constant 0 : index
    %c0_22 = arith.constant 0 : index
    %33 = vector.load %arg8[%c0_21, %c0_22] : memref<1x512xf32, #tpu.memory_space<vmem>>, vector<1x512xf32>
    %cst_23 = arith.constant dense<0.000000e+00> : vector<4x512xf32>
    %34 = tpu.matmul %29, %30, %cst_23 {dimension_numbers = #tpu.dot_dimension_numbers<[1], [0], [0], [1], [0, 0, 1, 1], [], []>} : vector<4x1024xf32>, vector<1024x512xf32>, vector<4x512xf32> -> vector<4x512xf32>
    %35 = vector.broadcast %31 : vector<1x512xf32> to vector<4x512xf32>
    %36 = arith.addf %34, %35 : vector<4x512xf32>
    %cst_24 = arith.constant dense<0.000000e+00> : vector<512xf32>
    %37 = vector.multi_reduction <add>, %36, %cst_24 [0] : vector<4x512xf32> to vector<512xf32>
    %38 = vector.shape_cast %37 : vector<512xf32> to vector<1x512xf32>
    %cst_25 = arith.constant 4.000000e+00 : f32
    %39 = vector.broadcast %cst_25 : f32 to vector<1x512xf32>
    %40 = arith.divf %38, %39 : vector<1x512xf32>
    %41 = vector.broadcast %40 : vector<1x512xf32> to vector<4x512xf32>
    %42 = arith.subf %36, %41 : vector<4x512xf32>
    %43 = arith.mulf %42, %42 : vector<4x512xf32>
    %cst_26 = arith.constant dense<0.000000e+00> : vector<512xf32>
    %44 = vector.multi_reduction <add>, %43, %cst_26 [0] : vector<4x512xf32> to vector<512xf32>
    %45 = vector.shape_cast %44 : vector<512xf32> to vector<1x512xf32>
    %cst_27 = arith.constant 4.000000e+00 : f32
    %46 = vector.broadcast %cst_27 : f32 to vector<1x512xf32>
    %47 = arith.divf %45, %46 : vector<1x512xf32>
    %cst_28 = arith.constant 9.99999974E-6 : f32
    %48 = vector.broadcast %cst_28 : f32 to vector<1x512xf32>
    %49 = arith.addf %47, %48 : vector<1x512xf32>
    %50 = math.rsqrt %49 : vector<1x512xf32>
    %51 = vector.broadcast %50 : vector<1x512xf32> to vector<4x512xf32>
    %52 = arith.mulf %42, %51 : vector<4x512xf32>
    %53 = vector.broadcast %32 : vector<1x512xf32> to vector<4x512xf32>
    %54 = arith.mulf %52, %53 : vector<4x512xf32>
    %55 = vector.broadcast %33 : vector<1x512xf32> to vector<4x512xf32>
    %56 = arith.addf %54, %55 : vector<4x512xf32>
    %cst_29 = arith.constant 0.000000e+00 : f32
    %57 = vector.broadcast %cst_29 : f32 to vector<4x512xf32>
    %58 = arith.maximumf %56, %57 : vector<4x512xf32>
    %c0_30 = arith.constant 0 : index
    %c0_31 = arith.constant 0 : index
    %59 = vector.load %arg9[%c0_30, %c0_31] : memref<512x256xf32, #tpu.memory_space<vmem>>, vector<512x256xf32>
    %c0_32 = arith.constant 0 : index
    %c0_33 = arith.constant 0 : index
    %60 = vector.load %arg10[%c0_32, %c0_33] : memref<1x256xf32, #tpu.memory_space<vmem>>, vector<1x256xf32>
    %c0_34 = arith.constant 0 : index
    %c0_35 = arith.constant 0 : index
    %61 = vector.load %arg11[%c0_34, %c0_35] : memref<1x256xf32, #tpu.memory_space<vmem>>, vector<1x256xf32>
    %c0_36 = arith.constant 0 : index
    %c0_37 = arith.constant 0 : index
    %62 = vector.load %arg12[%c0_36, %c0_37] : memref<1x256xf32, #tpu.memory_space<vmem>>, vector<1x256xf32>
    %cst_38 = arith.constant dense<0.000000e+00> : vector<4x256xf32>
    %63 = tpu.matmul %58, %59, %cst_38 {dimension_numbers = #tpu.dot_dimension_numbers<[1], [0], [0], [1], [0, 0, 1, 1], [], []>} : vector<4x512xf32>, vector<512x256xf32>, vector<4x256xf32> -> vector<4x256xf32>
    %64 = vector.broadcast %60 : vector<1x256xf32> to vector<4x256xf32>
    %65 = arith.addf %63, %64 : vector<4x256xf32>
    %cst_39 = arith.constant dense<0.000000e+00> : vector<256xf32>
    %66 = vector.multi_reduction <add>, %65, %cst_39 [0] : vector<4x256xf32> to vector<256xf32>
    %67 = vector.shape_cast %66 : vector<256xf32> to vector<1x256xf32>
    %cst_40 = arith.constant 4.000000e+00 : f32
    %68 = vector.broadcast %cst_40 : f32 to vector<1x256xf32>
    %69 = arith.divf %67, %68 : vector<1x256xf32>
    %70 = vector.broadcast %69 : vector<1x256xf32> to vector<4x256xf32>
    %71 = arith.subf %65, %70 : vector<4x256xf32>
    %72 = arith.mulf %71, %71 : vector<4x256xf32>
    %cst_41 = arith.constant dense<0.000000e+00> : vector<256xf32>
    %73 = vector.multi_reduction <add>, %72, %cst_41 [0] : vector<4x256xf32> to vector<256xf32>
    %74 = vector.shape_cast %73 : vector<256xf32> to vector<1x256xf32>
    %cst_42 = arith.constant 4.000000e+00 : f32
    %75 = vector.broadcast %cst_42 : f32 to vector<1x256xf32>
    %76 = arith.divf %74, %75 : vector<1x256xf32>
    %cst_43 = arith.constant 9.99999974E-6 : f32
    %77 = vector.broadcast %cst_43 : f32 to vector<1x256xf32>
    %78 = arith.addf %76, %77 : vector<1x256xf32>
    %79 = math.rsqrt %78 : vector<1x256xf32>
    %80 = vector.broadcast %79 : vector<1x256xf32> to vector<4x256xf32>
    %81 = arith.mulf %71, %80 : vector<4x256xf32>
    %82 = vector.broadcast %61 : vector<1x256xf32> to vector<4x256xf32>
    %83 = arith.mulf %81, %82 : vector<4x256xf32>
    %84 = vector.broadcast %62 : vector<1x256xf32> to vector<4x256xf32>
    %85 = arith.addf %83, %84 : vector<4x256xf32>
    %cst_44 = arith.constant 0.000000e+00 : f32
    %86 = vector.broadcast %cst_44 : f32 to vector<4x256xf32>
    %87 = arith.maximumf %85, %86 : vector<4x256xf32>
    %c0_45 = arith.constant 0 : index
    %c0_46 = arith.constant 0 : index
    %88 = vector.load %arg13[%c0_45, %c0_46] : memref<256x128xf32, #tpu.memory_space<vmem>>, vector<256x128xf32>
    %c0_47 = arith.constant 0 : index
    %c0_48 = arith.constant 0 : index
    %89 = vector.load %arg14[%c0_47, %c0_48] : memref<1x128xf32, #tpu.memory_space<vmem>>, vector<1x128xf32>
    %c0_49 = arith.constant 0 : index
    %c0_50 = arith.constant 0 : index
    %90 = vector.load %arg15[%c0_49, %c0_50] : memref<1x128xf32, #tpu.memory_space<vmem>>, vector<1x128xf32>
    %c0_51 = arith.constant 0 : index
    %c0_52 = arith.constant 0 : index
    %91 = vector.load %arg16[%c0_51, %c0_52] : memref<1x128xf32, #tpu.memory_space<vmem>>, vector<1x128xf32>
    %cst_53 = arith.constant dense<0.000000e+00> : vector<4x128xf32>
    %92 = tpu.matmul %87, %88, %cst_53 {dimension_numbers = #tpu.dot_dimension_numbers<[1], [0], [0], [1], [0, 0, 1, 1], [], []>} : vector<4x256xf32>, vector<256x128xf32>, vector<4x128xf32> -> vector<4x128xf32>
    %93 = vector.broadcast %89 : vector<1x128xf32> to vector<4x128xf32>
    %94 = arith.addf %92, %93 : vector<4x128xf32>
    %cst_54 = arith.constant dense<0.000000e+00> : vector<128xf32>
    %95 = vector.multi_reduction <add>, %94, %cst_54 [0] : vector<4x128xf32> to vector<128xf32>
    %96 = vector.shape_cast %95 : vector<128xf32> to vector<1x128xf32>
    %cst_55 = arith.constant 4.000000e+00 : f32
    %97 = vector.broadcast %cst_55 : f32 to vector<1x128xf32>
    %98 = arith.divf %96, %97 : vector<1x128xf32>
    %99 = vector.broadcast %98 : vector<1x128xf32> to vector<4x128xf32>
    %100 = arith.subf %94, %99 : vector<4x128xf32>
    %101 = arith.mulf %100, %100 : vector<4x128xf32>
    %cst_56 = arith.constant dense<0.000000e+00> : vector<128xf32>
    %102 = vector.multi_reduction <add>, %101, %cst_56 [0] : vector<4x128xf32> to vector<128xf32>
    %103 = vector.shape_cast %102 : vector<128xf32> to vector<1x128xf32>
    %cst_57 = arith.constant 4.000000e+00 : f32
    %104 = vector.broadcast %cst_57 : f32 to vector<1x128xf32>
    %105 = arith.divf %103, %104 : vector<1x128xf32>
    %cst_58 = arith.constant 9.99999974E-6 : f32
    %106 = vector.broadcast %cst_58 : f32 to vector<1x128xf32>
    %107 = arith.addf %105, %106 : vector<1x128xf32>
    %108 = math.rsqrt %107 : vector<1x128xf32>
    %109 = vector.broadcast %108 : vector<1x128xf32> to vector<4x128xf32>
    %110 = arith.mulf %100, %109 : vector<4x128xf32>
    %111 = vector.broadcast %90 : vector<1x128xf32> to vector<4x128xf32>
    %112 = arith.mulf %110, %111 : vector<4x128xf32>
    %113 = vector.broadcast %91 : vector<1x128xf32> to vector<4x128xf32>
    %114 = arith.addf %112, %113 : vector<4x128xf32>
    %cst_59 = arith.constant 0.000000e+00 : f32
    %115 = vector.broadcast %cst_59 : f32 to vector<4x128xf32>
    %116 = arith.maximumf %114, %115 : vector<4x128xf32>
    %c0_60 = arith.constant 0 : index
    %c0_61 = arith.constant 0 : index
    %117 = vector.load %arg17[%c0_60, %c0_61] : memref<128x64xf32, #tpu.memory_space<vmem>>, vector<128x64xf32>
    %c0_62 = arith.constant 0 : index
    %c0_63 = arith.constant 0 : index
    %118 = vector.load %arg18[%c0_62, %c0_63] : memref<1x64xf32, #tpu.memory_space<vmem>>, vector<1x64xf32>
    %c0_64 = arith.constant 0 : index
    %c0_65 = arith.constant 0 : index
    %119 = vector.load %arg19[%c0_64, %c0_65] : memref<1x64xf32, #tpu.memory_space<vmem>>, vector<1x64xf32>
    %c0_66 = arith.constant 0 : index
    %c0_67 = arith.constant 0 : index
    %120 = vector.load %arg20[%c0_66, %c0_67] : memref<1x64xf32, #tpu.memory_space<vmem>>, vector<1x64xf32>
    %cst_68 = arith.constant dense<0.000000e+00> : vector<4x64xf32>
    %121 = tpu.matmul %116, %117, %cst_68 {dimension_numbers = #tpu.dot_dimension_numbers<[1], [0], [0], [1], [0, 0, 1, 1], [], []>} : vector<4x128xf32>, vector<128x64xf32>, vector<4x64xf32> -> vector<4x64xf32>
    %122 = vector.broadcast %118 : vector<1x64xf32> to vector<4x64xf32>
    %123 = arith.addf %121, %122 : vector<4x64xf32>
    %cst_69 = arith.constant dense<0.000000e+00> : vector<64xf32>
    %124 = vector.multi_reduction <add>, %123, %cst_69 [0] : vector<4x64xf32> to vector<64xf32>
    %125 = vector.shape_cast %124 : vector<64xf32> to vector<1x64xf32>
    %cst_70 = arith.constant 4.000000e+00 : f32
    %126 = vector.broadcast %cst_70 : f32 to vector<1x64xf32>
    %127 = arith.divf %125, %126 : vector<1x64xf32>
    %128 = vector.broadcast %127 : vector<1x64xf32> to vector<4x64xf32>
    %129 = arith.subf %123, %128 : vector<4x64xf32>
    %130 = arith.mulf %129, %129 : vector<4x64xf32>
    %cst_71 = arith.constant dense<0.000000e+00> : vector<64xf32>
    %131 = vector.multi_reduction <add>, %130, %cst_71 [0] : vector<4x64xf32> to vector<64xf32>
    %132 = vector.shape_cast %131 : vector<64xf32> to vector<1x64xf32>
    %cst_72 = arith.constant 4.000000e+00 : f32
    %133 = vector.broadcast %cst_72 : f32 to vector<1x64xf32>
    %134 = arith.divf %132, %133 : vector<1x64xf32>
    %cst_73 = arith.constant 9.99999974E-6 : f32
    %135 = vector.broadcast %cst_73 : f32 to vector<1x64xf32>
    %136 = arith.addf %134, %135 : vector<1x64xf32>
    %137 = math.rsqrt %136 : vector<1x64xf32>
    %138 = vector.broadcast %137 : vector<1x64xf32> to vector<4x64xf32>
    %139 = arith.mulf %129, %138 : vector<4x64xf32>
    %140 = vector.broadcast %119 : vector<1x64xf32> to vector<4x64xf32>
    %141 = arith.mulf %139, %140 : vector<4x64xf32>
    %142 = vector.broadcast %120 : vector<1x64xf32> to vector<4x64xf32>
    %143 = arith.addf %141, %142 : vector<4x64xf32>
    %cst_74 = arith.constant 0.000000e+00 : f32
    %144 = vector.broadcast %cst_74 : f32 to vector<4x64xf32>
    %145 = arith.maximumf %143, %144 : vector<4x64xf32>
    %c0_75 = arith.constant 0 : index
    %c0_76 = arith.constant 0 : index
    %146 = vector.load %arg21[%c0_75, %c0_76] : memref<64x32xf32, #tpu.memory_space<vmem>>, vector<64x32xf32>
    %c0_77 = arith.constant 0 : index
    %c0_78 = arith.constant 0 : index
    %147 = vector.load %arg22[%c0_77, %c0_78] : memref<1x32xf32, #tpu.memory_space<vmem>>, vector<1x32xf32>
    %c0_79 = arith.constant 0 : index
    %c0_80 = arith.constant 0 : index
    %148 = vector.load %arg23[%c0_79, %c0_80] : memref<1x32xf32, #tpu.memory_space<vmem>>, vector<1x32xf32>
    %c0_81 = arith.constant 0 : index
    %c0_82 = arith.constant 0 : index
    %149 = vector.load %arg24[%c0_81, %c0_82] : memref<1x32xf32, #tpu.memory_space<vmem>>, vector<1x32xf32>
    %cst_83 = arith.constant dense<0.000000e+00> : vector<4x32xf32>
    %150 = tpu.matmul %145, %146, %cst_83 {dimension_numbers = #tpu.dot_dimension_numbers<[1], [0], [0], [1], [0, 0, 1, 1], [], []>} : vector<4x64xf32>, vector<64x32xf32>, vector<4x32xf32> -> vector<4x32xf32>
    %151 = vector.broadcast %147 : vector<1x32xf32> to vector<4x32xf32>
    %152 = arith.addf %150, %151 : vector<4x32xf32>
    %cst_84 = arith.constant dense<0.000000e+00> : vector<32xf32>
    %153 = vector.multi_reduction <add>, %152, %cst_84 [0] : vector<4x32xf32> to vector<32xf32>
    %154 = vector.shape_cast %153 : vector<32xf32> to vector<1x32xf32>
    %cst_85 = arith.constant 4.000000e+00 : f32
    %155 = vector.broadcast %cst_85 : f32 to vector<1x32xf32>
    %156 = arith.divf %154, %155 : vector<1x32xf32>
    %157 = vector.broadcast %156 : vector<1x32xf32> to vector<4x32xf32>
    %158 = arith.subf %152, %157 : vector<4x32xf32>
    %159 = arith.mulf %158, %158 : vector<4x32xf32>
    %cst_86 = arith.constant dense<0.000000e+00> : vector<32xf32>
    %160 = vector.multi_reduction <add>, %159, %cst_86 [0] : vector<4x32xf32> to vector<32xf32>
    %161 = vector.shape_cast %160 : vector<32xf32> to vector<1x32xf32>
    %cst_87 = arith.constant 4.000000e+00 : f32
    %162 = vector.broadcast %cst_87 : f32 to vector<1x32xf32>
    %163 = arith.divf %161, %162 : vector<1x32xf32>
    %cst_88 = arith.constant 9.99999974E-6 : f32
    %164 = vector.broadcast %cst_88 : f32 to vector<1x32xf32>
    %165 = arith.addf %163, %164 : vector<1x32xf32>
    %166 = math.rsqrt %165 : vector<1x32xf32>
    %167 = vector.broadcast %166 : vector<1x32xf32> to vector<4x32xf32>
    %168 = arith.mulf %158, %167 : vector<4x32xf32>
    %169 = vector.broadcast %148 : vector<1x32xf32> to vector<4x32xf32>
    %170 = arith.mulf %168, %169 : vector<4x32xf32>
    %171 = vector.broadcast %149 : vector<1x32xf32> to vector<4x32xf32>
    %172 = arith.addf %170, %171 : vector<4x32xf32>
    %cst_89 = arith.constant 0.000000e+00 : f32
    %173 = vector.broadcast %cst_89 : f32 to vector<4x32xf32>
    %174 = arith.maximumf %172, %173 : vector<4x32xf32>
    %c0_90 = arith.constant 0 : index
    %c0_91 = arith.constant 0 : index
    %175 = vector.load %arg25[%c0_90, %c0_91] : memref<32x16xf32, #tpu.memory_space<vmem>>, vector<32x16xf32>
    %c0_92 = arith.constant 0 : index
    %c0_93 = arith.constant 0 : index
    %176 = vector.load %arg26[%c0_92, %c0_93] : memref<1x16xf32, #tpu.memory_space<vmem>>, vector<1x16xf32>
    %c0_94 = arith.constant 0 : index
    %c0_95 = arith.constant 0 : index
    %177 = vector.load %arg27[%c0_94, %c0_95] : memref<1x16xf32, #tpu.memory_space<vmem>>, vector<1x16xf32>
    %c0_96 = arith.constant 0 : index
    %c0_97 = arith.constant 0 : index
    %178 = vector.load %arg28[%c0_96, %c0_97] : memref<1x16xf32, #tpu.memory_space<vmem>>, vector<1x16xf32>
    %cst_98 = arith.constant dense<0.000000e+00> : vector<4x16xf32>
    %179 = tpu.matmul %174, %175, %cst_98 {dimension_numbers = #tpu.dot_dimension_numbers<[1], [0], [0], [1], [0, 0, 1, 1], [], []>} : vector<4x32xf32>, vector<32x16xf32>, vector<4x16xf32> -> vector<4x16xf32>
    %180 = vector.broadcast %176 : vector<1x16xf32> to vector<4x16xf32>
    %181 = arith.addf %179, %180 : vector<4x16xf32>
    %cst_99 = arith.constant dense<0.000000e+00> : vector<16xf32>
    %182 = vector.multi_reduction <add>, %181, %cst_99 [0] : vector<4x16xf32> to vector<16xf32>
    %183 = vector.shape_cast %182 : vector<16xf32> to vector<1x16xf32>
    %cst_100 = arith.constant 4.000000e+00 : f32
    %184 = vector.broadcast %cst_100 : f32 to vector<1x16xf32>
    %185 = arith.divf %183, %184 : vector<1x16xf32>
    %186 = vector.broadcast %185 : vector<1x16xf32> to vector<4x16xf32>
    %187 = arith.subf %181, %186 : vector<4x16xf32>
    %188 = arith.mulf %187, %187 : vector<4x16xf32>
    %cst_101 = arith.constant dense<0.000000e+00> : vector<16xf32>
    %189 = vector.multi_reduction <add>, %188, %cst_101 [0] : vector<4x16xf32> to vector<16xf32>
    %190 = vector.shape_cast %189 : vector<16xf32> to vector<1x16xf32>
    %cst_102 = arith.constant 4.000000e+00 : f32
    %191 = vector.broadcast %cst_102 : f32 to vector<1x16xf32>
    %192 = arith.divf %190, %191 : vector<1x16xf32>
    %cst_103 = arith.constant 9.99999974E-6 : f32
    %193 = vector.broadcast %cst_103 : f32 to vector<1x16xf32>
    %194 = arith.addf %192, %193 : vector<1x16xf32>
    %195 = math.rsqrt %194 : vector<1x16xf32>
    %196 = vector.broadcast %195 : vector<1x16xf32> to vector<4x16xf32>
    %197 = arith.mulf %187, %196 : vector<4x16xf32>
    %198 = vector.broadcast %177 : vector<1x16xf32> to vector<4x16xf32>
    %199 = arith.mulf %197, %198 : vector<4x16xf32>
    %200 = vector.broadcast %178 : vector<1x16xf32> to vector<4x16xf32>
    %201 = arith.addf %199, %200 : vector<4x16xf32>
    %cst_104 = arith.constant 0.000000e+00 : f32
    %202 = vector.broadcast %cst_104 : f32 to vector<4x16xf32>
    %203 = arith.maximumf %201, %202 : vector<4x16xf32>
    %c0_105 = arith.constant 0 : index
    %c0_106 = arith.constant 0 : index
    %204 = vector.load %arg29[%c0_105, %c0_106] : memref<16x8xf32, #tpu.memory_space<vmem>>, vector<16x8xf32>
    %c0_107 = arith.constant 0 : index
    %c0_108 = arith.constant 0 : index
    %205 = vector.load %arg30[%c0_107, %c0_108] : memref<1x8xf32, #tpu.memory_space<vmem>>, vector<1x8xf32>
    %c0_109 = arith.constant 0 : index
    %c0_110 = arith.constant 0 : index
    %206 = vector.load %arg31[%c0_109, %c0_110] : memref<1x8xf32, #tpu.memory_space<vmem>>, vector<1x8xf32>
    %c0_111 = arith.constant 0 : index
    %c0_112 = arith.constant 0 : index
    %207 = vector.load %arg32[%c0_111, %c0_112] : memref<1x8xf32, #tpu.memory_space<vmem>>, vector<1x8xf32>
    %cst_113 = arith.constant dense<0.000000e+00> : vector<4x8xf32>
    %208 = tpu.matmul %203, %204, %cst_113 {dimension_numbers = #tpu.dot_dimension_numbers<[1], [0], [0], [1], [0, 0, 1, 1], [], []>} : vector<4x16xf32>, vector<16x8xf32>, vector<4x8xf32> -> vector<4x8xf32>
    %209 = vector.broadcast %205 : vector<1x8xf32> to vector<4x8xf32>
    %210 = arith.addf %208, %209 : vector<4x8xf32>
    %cst_114 = arith.constant dense<0.000000e+00> : vector<8xf32>
    %211 = vector.multi_reduction <add>, %210, %cst_114 [0] : vector<4x8xf32> to vector<8xf32>
    %212 = vector.shape_cast %211 : vector<8xf32> to vector<1x8xf32>
    %cst_115 = arith.constant 4.000000e+00 : f32
    %213 = vector.broadcast %cst_115 : f32 to vector<1x8xf32>
    %214 = arith.divf %212, %213 : vector<1x8xf32>
    %215 = vector.broadcast %214 : vector<1x8xf32> to vector<4x8xf32>
    %216 = arith.subf %210, %215 : vector<4x8xf32>
    %217 = arith.mulf %216, %216 : vector<4x8xf32>
    %cst_116 = arith.constant dense<0.000000e+00> : vector<8xf32>
    %218 = vector.multi_reduction <add>, %217, %cst_116 [0] : vector<4x8xf32> to vector<8xf32>
    %219 = vector.shape_cast %218 : vector<8xf32> to vector<1x8xf32>
    %cst_117 = arith.constant 4.000000e+00 : f32
    %220 = vector.broadcast %cst_117 : f32 to vector<1x8xf32>
    %221 = arith.divf %219, %220 : vector<1x8xf32>
    %cst_118 = arith.constant 9.99999974E-6 : f32
    %222 = vector.broadcast %cst_118 : f32 to vector<1x8xf32>
    %223 = arith.addf %221, %222 : vector<1x8xf32>
    %224 = math.rsqrt %223 : vector<1x8xf32>
    %225 = vector.broadcast %224 : vector<1x8xf32> to vector<4x8xf32>
    %226 = arith.mulf %216, %225 : vector<4x8xf32>
    %227 = vector.broadcast %206 : vector<1x8xf32> to vector<4x8xf32>
    %228 = arith.mulf %226, %227 : vector<4x8xf32>
    %229 = vector.broadcast %207 : vector<1x8xf32> to vector<4x8xf32>
    %230 = arith.addf %228, %229 : vector<4x8xf32>
    %cst_119 = arith.constant 0.000000e+00 : f32
    %231 = vector.broadcast %cst_119 : f32 to vector<4x8xf32>
    %232 = arith.maximumf %230, %231 : vector<4x8xf32>
    %c0_120 = arith.constant 0 : index
    %c0_121 = arith.constant 0 : index
    %233 = vector.load %arg33[%c0_120, %c0_121] : memref<8x4xf32, #tpu.memory_space<vmem>>, vector<8x4xf32>
    %cst_122 = arith.constant dense<0.000000e+00> : vector<4x4xf32>
    %234 = tpu.matmul %232, %233, %cst_122 {dimension_numbers = #tpu.dot_dimension_numbers<[1], [0], [0], [1], [0, 0, 1, 1], [], []>} : vector<4x8xf32>, vector<8x4xf32>, vector<4x4xf32> -> vector<4x4xf32>
    %c0_123 = arith.constant 0 : index
    %c0_124 = arith.constant 0 : index
    %235 = vector.load %arg34[%c0_123, %c0_124] : memref<1x4xf32, #tpu.memory_space<vmem>>, vector<1x4xf32>
    %236 = vector.broadcast %235 : vector<1x4xf32> to vector<4x4xf32>
    %237 = arith.addf %234, %236 : vector<4x4xf32>
    %c0_125 = arith.constant 0 : index
    %c0_126 = arith.constant 0 : index
    %238 = vector.load %arg35[%c0_125, %c0_126] : memref<4x4xf32, #tpu.memory_space<vmem>>, vector<4x4xf32>
    tpu.vector_store %arg35[%c0_125, %c0_126], %237 {strides = array<i32>} : memref<4x4xf32, #tpu.memory_space<vmem>>, vector<4x4xf32>,
    return
  }
}

</mosaic_0001>

<bundles_post_ra>
// kernel: tpu_custom_call.1
= control target key start
LH: loop header
LB: loop body
LE: loop exit
PB: predicated region body
PF: predicated region fallthrough
CT: control target
= control target key end

     0   :  { %s5314_s6 = smov 1   ;;  %s5315_s10 = smov 2   ;;  %s5980_s0 = inlined_call_operand.smem [shape: u32[36], index: -1, kind: input, shape index: {}] }
   0x1   :  { %s5399_s5 = sld [smem:[%s5980_s0]]   ;;  %s5316_s14 = smov 3  }
   0x2   :  { %s5404_s9 = sld [smem:[%s5980_s0 + %s5314_s6]]   ;;  %s5317_s18 = smov 4  }
   0x3   :  { %s5409_s13 = sld [smem:[%s5980_s0 + %s5315_s10]]   ;;  %s5318_s22 = smov 5  }
   0x4   :  { %s5414_s17 = sld [smem:[%s5980_s0 + %s5316_s14]]   ;;  %s5319_s26 = smov 6  }
   0x5   :  { %s5419_s21 = sld [smem:[%s5980_s0 + %s5317_s18]]   ;;  %s5320_s30 = smov 7  }
   0x6   :  { %s5424_s25 = sld [smem:[%s5980_s0 + %s5318_s22]]   ;;  %s5321_s4 = smov 8  }
   0x7   :  { %5999 = sst [smem:[#allocation67_spill]] %s5399_s5  ;;  %s5322_s10 = smov 9  }
   0x8   :  { %s5429_s29 = sld [smem:[%s5980_s0 + %s5319_s26]]   ;;  %s5323_s15 = smov 10  }
   0x9   :  { %6000 = sst [smem:[#allocation68_spill]] %s5409_s13  ;;  %s5324_s20 = smov 11  }
   0xa   :  { %s5434_s3 = sld [smem:[%s5980_s0 + %s5320_s30]]   ;;  %s5325_s26 = smov 12  }
   0xb   :  { %6001 = sst [smem:[#allocation69_spill]] %s5419_s21  ;;  %s5326_s1 = smov 13  }
   0xc   :  { %s5439_s8 = sld [smem:[%s5980_s0 + %s5321_s4]]   ;;  %s5327_s7 = smov 14  }
   0xd   :  { %s5444_s14 = sld [smem:[%s5980_s0 + %s5322_s10]]   ;;  %s5329_s22 = smov 16  }
   0xe   :  { %6002 = sst [smem:[#allocation70_spill]] %s5429_s29  ;;  %s5330_s28 = smov 17  }
   0xf   :  { %s5449_s19 = sld [smem:[%s5980_s0 + %s5323_s15]]   ;;  %s5328_s15 = smov 15  }
  0x10   :  { %s5454_s24 = sld [smem:[%s5980_s0 + %s5324_s20]]  }
  0x11   :  { %s5459_s30 = sld [smem:[%s5980_s0 + %s5325_s26]]  }
  0x12   :  { %6003 = sst [smem:[#allocation71_spill]] %s5439_s8 }
  0x13   :  { %s5464_s6 = sld [smem:[%s5980_s0 + %s5326_s1]]  }
  0x14   :  { %s5469_s12 = sld [smem:[%s5980_s0 + %s5327_s7]]   ;;  %s5331_s7 = smov 18  }
  0x15   :  { %6004 = sst [smem:[#allocation72_spill]] %s5449_s19 }
  0x16   :  { %s5474_s20 = sld [smem:[%s5980_s0 + %s5328_s15]]   ;;  %s5332_s15 = smov 19  }
  0x17   :  { %6005 = sst [smem:[#allocation73_spill]] %s5459_s30 }
  0x18   :  { %s5479_s27 = sld [smem:[%s5980_s0 + %s5329_s22]]   ;;  %s5333_s22 = smov 20  }
  0x19   :  { %s5484_s4 = sld [smem:[%s5980_s0 + %s5330_s28]]   ;;  %s5334_s28 = smov 21  }
  0x1a   :  { %6006 = sst [smem:[#allocation74_spill]] %s5469_s12 }
  0x1b   :  { %s5489_s12 = sld [smem:[%s5980_s0 + %s5331_s7]]   ;;  %s5335_s7 = smov 22  }
  0x1c   :  { %s5494_s30 = sld [smem:[%s5980_s0 + %s5332_s15]]   ;;  %s5336_s15 = smov 23  }
  0x1d   :  { %s5509_s19 = sld [smem:[%s5980_s0 + %s5335_s7]]   ;;  %s5339_s7 = smov 26  }
  0x1e   :  { %6007 = sst [smem:[#allocation75_spill]] %s5479_s27 }
  0x1f   :  { %6008 = sst [smem:[#allocation76_spill]] %s5484_s4 }
  0x20   :  { %s5499_s27 = sld [smem:[%s5980_s0 + %s5333_s22]]   ;;  %s5337_s22 = smov 24  }
  0x21   :  { %s5504_s4 = sld [smem:[%s5980_s0 + %s5334_s28]]   ;;  %s5338_s28 = smov 25  }
  0x22   :  { %6009 = sst [smem:[#allocation77_spill]] %s5494_s30 }
  0x23   :  { %6011 = sst [smem:[#allocation79_spill]] %s5509_s19 }
  0x24   :  { %s5514_s30 = sld [smem:[%s5980_s0 + %s5336_s15]]   ;;  %s5340_s15 = smov 27  }
  0x25   :  { %s5519_s8 = sld [smem:[%s5980_s0 + %s5337_s22]]   ;;  %s5341_s22 = smov 28  }
  0x26   :  { %s5529_s19 = sld [smem:[%s5980_s0 + %s5339_s7]]   ;;  %s5343_s7 = smov 30  }
  0x27   :  { %6010 = sst [smem:[#allocation78_spill]] %s5504_s4 }
  0x28   :  { %s5524_s4 = sld [smem:[%s5980_s0 + %s5338_s28]]   ;;  %s5342_s28 = smov 29  }
  0x29   :  { %s5534_s29 = sld [smem:[%s5980_s0 + %s5340_s15]]   ;;  %s5344_s15 = smov 31  }
  0x2a   :  { %s5549_s21 = sld [smem:[%s5980_s0 + %s5343_s7]]   ;;  %s5347_s7 = smov 34  }
  0x2b   :  { %6012 = sst [smem:[#allocation80_spill]] %s5519_s8 }
  0x2c   :  { %s5539_s8 = sld [smem:[%s5980_s0 + %s5341_s22]]   ;;  %s5345_s22 = smov 32  }
  0x2d   :  { %s5559_s13 = sld [smem:[%s5980_s0 + %s5345_s22]]  }
  0x2e   :  { %6013 = sst [smem:[#allocation81_spill]] %s5524_s4 }
  0x2f   :  { %6014 = sst [smem:[#allocation82_spill]] %s5534_s29 }
  0x30   :  { %s5544_s4 = sld [smem:[%s5980_s0 + %s5342_s28]]   ;;  %s5346_s28 = smov 33  }
  0x31   :  { %6016 = sst [smem:[#allocation84_spill]] %s5549_s21 }
  0x32   :  { %s5554_s29 = sld [smem:[%s5980_s0 + %s5344_s15]]   ;;  %s5348_s15 = smov 35  }
  0x33   :  { %s5569_s21 = sld [smem:[%s5980_s0 + %s5347_s7]]  }
  0x34   :  { %s5574_s5 = sld [smem:[%s5980_s0 + %s5348_s15]]  }
  0x36   :  { %6015 = sst [smem:[#allocation83_spill]] %s5544_s4 }
  0x37   :  { %s5564_s4 = sld [smem:[%s5980_s0 + %s5346_s28]]  }
  0x38   :  { %76 = vsyncpa [#allocation3], 0 }
  0x39   :  { %77 = vsyncpa [#allocation6], 0 }
  0x3a   :  { %78 = vsyncpa [#allocation9], 0 }
  0x3b   :  { %79 = vsyncpa [#allocation12], 0 }
  0x3c   :  { %80 = vsyncpa [#allocation15], 0 }
  0x3d   :  { %81 = vsyncpa [#allocation18], 0 }
  0x3e   :  { %82 = vsyncpa [#allocation21], 0 }
  0x3f   :  { %83 = vsyncpa [#allocation24], 0 }
  0x40   :  { %84 = vsyncpa [#allocation27], 0 }
  0x41   :  { %85 = vsyncpa [#allocation30], 0 }
  0x42   :  { %86 = vsyncpa [#allocation33], 0 }
  0x43   :  { %87 = vsyncpa [#allocation36], 0 }
  0x44   :  { %88 = vsyncpa [#allocation39], 0 }
  0x45   :  { %89 = vsyncpa [#allocation42], 0 }
  0x46   :  { %90 = vsyncpa [#allocation45], 0 }
  0x47   :  { %91 = vsyncpa [#allocation48], 0 }
  0x48   :  { %92 = vsyncpa [#allocation4], 0  ;;  %s5349_s0 = smov [#allocation5]   ;;  %s4598_s23 = scalar_lea.hbm %s5404_s9, 4096 }
  0x49   :  { %s108_s22 = sshll.u32 %s5349_s0, 4  ;;  %p4599_p0 = scmp.ne.s32.totalorder %s5404_s9, %s4598_s23  ;;  %s109_s22 = int_to_ptr.vmem [resolvable:$true] %s108_s22 }
  0x4a   :  { %p4602_p1 = scmp.lt.u32.totalorder %s4598_s23, %s5404_s9 }
  0x4c   :  { %p4604_p2 = pnand %p4602_p1, %p4599_p0 }
  0x4e   :  { %4607 = shalt.err (!%p4604_p2)
}
  0x4f   :  { %s4608_s26 = scalar_lea.vmem %s109_s22, 4096  ;;  %p4613_p4 = scmp.lt.s32.totalorder %s109_s22, %s109_s22 }
  0x50   :  { %p4609_p3 = scmp.ne.s32.totalorder %s109_s22, %s4608_s26  ;;  %p4614_p5 = scmp.lt.s32.totalorder %s4608_s26, %s4608_s26 }
  0x52   :  { %p4615_p6 = por %p4614_p5, %p4613_p4 }
  0x54   :  { %p4616_p7 = pnand %p4615_p6, %p4609_p3 }
  0x56   :  { %4619 = shalt.err (!%p4616_p7)
}
  0x57   :  { %s5350_s28 = smov 1024   ;;  %s5351_s1 = smov 64  }
  0x58   :  { %114 = dma.hbm_to_vmem [thread:$0]  %s5404_s9, 4096, %s109_s22, [#allocation6], %s5350_s28, %s5350_s28, %s5351_s1  }
  0x59   :  { %s5352_s2 = smov [#allocation8]   ;;  %s5353_s10 = smov [#allocation11]  }
  0x5a   :  { %s131_s7 = sshll.u32 %s5352_s2, 4  ;;  %s150_s11 = sshll.u32 %s5353_s10, 4  ;;  %s132_s7 = int_to_ptr.vmem [resolvable:$true] %s131_s7  ;;  %s151_s11 = int_to_ptr.vmem [resolvable:$true] %s150_s11 }
  0x5b   :  { %s4620_s15 = scalar_lea.hbm %s5414_s17, 128 }
  0x5c   :  { %p4621_p8 = scmp.ne.s32.totalorder %s5414_s17, %s4620_s15  ;;  %p4624_p9 = scmp.lt.u32.totalorder %s4620_s15, %s5414_s17 }
  0x5e   :  { %p4626_p10 = pnand %p4624_p9, %p4621_p8 }
  0x60   :  { %4629 = shalt.err (!%p4626_p10)
}
  0x61   :  { %s4630_s16 = scalar_lea.vmem %s132_s7, 128  ;;  %p4635_p12 = scmp.lt.s32.totalorder %s132_s7, %s132_s7 }
  0x62   :  { %p4631_p11 = scmp.ne.s32.totalorder %s132_s7, %s4630_s16  ;;  %p4636_p13 = scmp.lt.s32.totalorder %s4630_s16, %s4630_s16 }
  0x64   :  { %p4637_p0 = por %p4636_p13, %p4635_p12 }
  0x66   :  { %p4638_p1 = pnand %p4637_p0, %p4631_p11 }
  0x68   :  { %4641 = shalt.err (!%p4638_p1)
}
  0x69   :  { %134 = dma.hbm_to_vmem [thread:$0]  %s5414_s17, 128, %s132_s7, [#allocation9]  }
  0x6a   :  { %s4642_s9 = scalar_lea.hbm %s5424_s25, 65536 }
  0x6b   :  { %p4643_p2 = scmp.ne.s32.totalorder %s5424_s25, %s4642_s9  ;;  %p4646_p3 = scmp.lt.u32.totalorder %s4642_s9, %s5424_s25 }
  0x6d   :  { %p4648_p4 = pnand %p4646_p3, %p4643_p2 }
  0x6f   :  { %4651 = shalt.err (!%p4648_p4)
}
  0x70   :  { %s4652_s18 = scalar_lea.vmem %s151_s11, 65536  ;;  %p4657_p6 = scmp.lt.s32.totalorder %s151_s11, %s151_s11 }
  0x71   :  { %p4653_p5 = scmp.ne.s32.totalorder %s151_s11, %s4652_s18  ;;  %p4658_p7 = scmp.lt.s32.totalorder %s4652_s18, %s4652_s18 }
  0x73   :  { %p4659_p8 = por %p4658_p7, %p4657_p6 }
  0x75   :  { %p4660_p9 = pnand %p4659_p8, %p4653_p5 }
  0x77   :  { %4663 = shalt.err (!%p4660_p9)
}
  0x78   :  { %s5354_s0 = smov 512   ;;  %s5355_s22 = smov 32  }
  0x79   :  { %156 = dma.hbm_to_vmem [thread:$0]  %s5424_s25, 65536, %s151_s11, [#allocation12], %s5354_s0, %s5354_s0, %s5355_s22  }
  0x7a   :  { %s5356_s17 = smov [#allocation14]   ;;  %s5357_s26 = smov [#allocation17]  }
  0x7b   :  { %s173_s23 = sshll.u32 %s5356_s17, 4  ;;  %s192_s28 = sshll.u32 %s5357_s26, 4  ;;  %s174_s23 = int_to_ptr.vmem [resolvable:$true] %s173_s23  ;;  %s193_s28 = int_to_ptr.vmem [resolvable:$true] %s192_s28 }
  0x7c   :  { %s4664_s1 = scalar_lea.hbm %s5434_s3, 64 }
  0x7d   :  { %p4665_p10 = scmp.ne.s32.totalorder %s5434_s3, %s4664_s1  ;;  %p4668_p11 = scmp.lt.u32.totalorder %s4664_s1, %s5434_s3 }
  0x7f   :  { %p4670_p12 = pnand %p4668_p11, %p4665_p10 }
  0x81   :  { %4673 = shalt.err (!%p4670_p12)
}
  0x82   :  { %s4674_s2 = scalar_lea.vmem %s174_s23, 64  ;;  %p4679_p0 = scmp.lt.s32.totalorder %s174_s23, %s174_s23 }
  0x83   :  { %p4675_p13 = scmp.ne.s32.totalorder %s174_s23, %s4674_s2  ;;  %p4680_p1 = scmp.lt.s32.totalorder %s4674_s2, %s4674_s2 }
  0x85   :  { %p4681_p2 = por %p4680_p1, %p4679_p0 }
  0x87   :  { %p4682_p3 = pnand %p4681_p2, %p4675_p13 }
  0x89   :  { %4685 = shalt.err (!%p4682_p3)
}
  0x8a   :  { %176 = dma.hbm_to_vmem [thread:$0]  %s5434_s3, 64, %s174_s23, [#allocation15]  }
  0x8b   :  { %s4686_s25 = scalar_lea.hbm %s5444_s14, 16384 }
  0x8c   :  { %p4687_p4 = scmp.ne.s32.totalorder %s5444_s14, %s4686_s25  ;;  %p4690_p5 = scmp.lt.u32.totalorder %s4686_s25, %s5444_s14 }
  0x8e   :  { %p4692_p6 = pnand %p4690_p5, %p4687_p4 }
  0x90   :  { %4695 = shalt.err (!%p4692_p6)
}
  0x91   :  { %s4696_s7 = scalar_lea.vmem %s193_s28, 16384  ;;  %p4701_p8 = scmp.lt.s32.totalorder %s193_s28, %s193_s28 }
  0x92   :  { %p4697_p7 = scmp.ne.s32.totalorder %s193_s28, %s4696_s7  ;;  %p4702_p9 = scmp.lt.s32.totalorder %s4696_s7, %s4696_s7 }
  0x94   :  { %p4703_p10 = por %p4702_p9, %p4701_p8 }
  0x96   :  { %p4704_p11 = pnand %p4703_p10, %p4697_p7 }
  0x98   :  { %4707 = shalt.err (!%p4704_p11)
}
  0x99   :  { %s5358_s10 = smov 256   ;;  %s5359_s11 = smov 16  }
  0x9a   :  { %198 = dma.hbm_to_vmem [thread:$0]  %s5444_s14, 16384, %s193_s28, [#allocation18], %s5358_s10, %s5358_s10, %s5359_s11  }
  0x9b   :  { %s5360_s3 = smov [#allocation20]   ;;  %s5361_s16 = smov [#allocation23]  }
  0x9c   :  { %s215_s15 = sshll.u32 %s5360_s3, 4  ;;  %s234_s9 = sshll.u32 %s5361_s16, 4  ;;  %s216_s15 = int_to_ptr.vmem [resolvable:$true] %s215_s15  ;;  %s235_s9 = int_to_ptr.vmem [resolvable:$true] %s234_s9 }
  0x9d   :  { %s4708_s18 = scalar_lea.hbm %s5454_s24, 32 }
  0x9e   :  { %p4709_p12 = scmp.ne.s32.totalorder %s5454_s24, %s4708_s18  ;;  %p4712_p13 = scmp.lt.u32.totalorder %s4708_s18, %s5454_s24 }
  0xa0   :  { %p4714_p0 = pnand %p4712_p13, %p4709_p12 }
  0xa2   :  { %4717 = shalt.err (!%p4714_p0)
}
  0xa3   :  { %s4718_s0 = scalar_lea.vmem %s216_s15, 32  ;;  %p4723_p2 = scmp.lt.s32.totalorder %s216_s15, %s216_s15 }
  0xa4   :  { %p4719_p1 = scmp.ne.s32.totalorder %s216_s15, %s4718_s0  ;;  %p4724_p3 = scmp.lt.s32.totalorder %s4718_s0, %s4718_s0 }
  0xa6   :  { %p4725_p4 = por %p4724_p3, %p4723_p2 }
  0xa8   :  { %p4726_p5 = pnand %p4725_p4, %p4719_p1 }
  0xaa   :  { %4729 = shalt.err (!%p4726_p5)
}
  0xab   :  { %218 = dma.hbm_to_vmem [thread:$0]  %s5454_s24, 32, %s216_s15, [#allocation21]  }
  0xac   :  { %s4730_s14 = scalar_lea.hbm %s5464_s6, 4096 }
  0xad   :  { %p4731_p6 = scmp.ne.s32.totalorder %s5464_s6, %s4730_s14  ;;  %p4734_p7 = scmp.lt.u32.totalorder %s4730_s14, %s5464_s6 }
  0xaf   :  { %p4736_p8 = pnand %p4734_p7, %p4731_p6 }
  0xb1   :  { %4739 = shalt.err (!%p4736_p8)
}
  0xb2   :  { %s4740_s22 = scalar_lea.vmem %s235_s9, 4096  ;;  %p4745_p10 = scmp.lt.s32.totalorder %s235_s9, %s235_s9 }
  0xb3   :  { %p4741_p9 = scmp.ne.s32.totalorder %s235_s9, %s4740_s22  ;;  %p4746_p11 = scmp.lt.s32.totalorder %s4740_s22, %s4740_s22 }
  0xb5   :  { %p4747_p12 = por %p4746_p11, %p4745_p10 }
  0xb7   :  { %p4748_p13 = pnand %p4747_p12, %p4741_p9 }
  0xb9   :  { %4751 = shalt.err (!%p4748_p13)
}
  0xba   :  { %s5362_s17 = smov 128   ;;  %s5363_s23 = smov 8  }
  0xbb   :  { %240 = dma.hbm_to_vmem [thread:$0]  %s5464_s6, 4096, %s235_s9, [#allocation24], %s5362_s17, %s5362_s17, %s5363_s23  }
  0xbc   :  { %s5364_s24 = smov [#allocation26]   ;;  %s5365_s28 = smov [#allocation29]  }
  0xbd   :  { %s257_s26 = sshll.u32 %s5364_s24, 4  ;;  %s279_s1 = sshll.u32 %s5365_s28, 4  ;;  %s258_s26 = int_to_ptr.vmem [resolvable:$true] %s257_s26  ;;  %s280_s1 = int_to_ptr.vmem [resolvable:$true] %s279_s1 }
  0xbe   :  { %s4752_s2 = scalar_lea.hbm %s5474_s20, 16 }
  0xbf   :  { %p4753_p0 = scmp.ne.s32.totalorder %s5474_s20, %s4752_s2  ;;  %p4756_p1 = scmp.lt.u32.totalorder %s4752_s2, %s5474_s20 }
  0xc1   :  { %p4758_p2 = pnand %p4756_p1, %p4753_p0 }
  0xc3   :  { %4761 = shalt.err (!%p4758_p2)
}
  0xc4   :  { %s4762_s25 = scalar_lea.vmem %s258_s26, 16  ;;  %s4766_s7 = scalar_lea.vmem %s258_s26, 32 }
  0xc5   :  { %p4763_p3 = scmp.ne.s32.totalorder %s258_s26, %s4762_s25  ;;  %p4767_p4 = scmp.lt.s32.totalorder %s258_s26, %s258_s26 }
  0xc6   :  { %p4768_p5 = scmp.lt.s32.totalorder %s4766_s7, %s4762_s25 }
  0xc8   :  { %p4769_p6 = por %p4768_p5, %p4767_p4 }
  0xca   :  { %p4770_p7 = pnand %p4769_p6, %p4763_p3 }
  0xcc   :  { %4773 = shalt.err (!%p4770_p7)
}
  0xcd   :  { %260 = dma.hbm_to_vmem [thread:$0]  %s5474_s20, 16, %s258_s26, [#allocation27]  }
  0xce   :  { %s4774_s6 = scalar_lea.hbm %s5489_s12, 16 }
  0xcf   :  { %p4775_p8 = scmp.ne.s32.totalorder %s5489_s12, %s4774_s6  ;;  %p4778_p9 = scmp.lt.u32.totalorder %s4774_s6, %s5489_s12 }
  0xd1   :  { %p4780_p10 = pnand %p4778_p9, %p4775_p8 }
  0xd3   :  { %4783 = shalt.err (!%p4780_p10)
}
  0xd4   :  { %s4784_s10 = scalar_lea.vmem %s280_s1, 16  ;;  %s4788_s11 = scalar_lea.vmem %s280_s1, 32 }
  0xd5   :  { %p4785_p11 = scmp.ne.s32.totalorder %s280_s1, %s4784_s10  ;;  %p4789_p12 = scmp.lt.s32.totalorder %s280_s1, %s280_s1 }
  0xd6   :  { %p4790_p13 = scmp.lt.s32.totalorder %s4788_s11, %s4784_s10 }
  0xd8   :  { %p4791_p0 = por %p4790_p13, %p4789_p12 }
  0xda   :  { %p4792_p1 = pnand %p4791_p0, %p4785_p11 }
  0xdc   :  { %4795 = shalt.err (!%p4792_p1)
}
  0xdd   :  { %282 = dma.hbm_to_vmem [thread:$0]  %s5489_s12, 16, %s280_s1, [#allocation30]  }
  0xde   :  { %s5366_s20 = smov [#allocation32]   ;;  %s5367_s15 = smov [#allocation35]  }
  0xdf   :  { %s299_s3 = sshll.u32 %s5366_s20, 4  ;;  %s321_s16 = sshll.u32 %s5367_s15, 4  ;;  %s300_s3 = int_to_ptr.vmem [resolvable:$true] %s299_s3  ;;  %s322_s16 = int_to_ptr.vmem [resolvable:$true] %s321_s16 }
  0xe0   :  { %s4796_s9 = scalar_lea.hbm %s5499_s27, 16 }
  0xe1   :  { %p4797_p2 = scmp.ne.s32.totalorder %s5499_s27, %s4796_s9  ;;  %p4800_p3 = scmp.lt.u32.totalorder %s4796_s9, %s5499_s27 }
  0xe3   :  { %p4802_p4 = pnand %p4800_p3, %p4797_p2 }
  0xe5   :  { %4805 = shalt.err (!%p4802_p4)
}
  0xe6   :  { %s4806_s18 = scalar_lea.vmem %s300_s3, 16  ;;  %s4810_s0 = scalar_lea.vmem %s300_s3, 32 }
  0xe7   :  { %p4807_p5 = scmp.ne.s32.totalorder %s300_s3, %s4806_s18  ;;  %p4811_p6 = scmp.lt.s32.totalorder %s300_s3, %s300_s3 }
  0xe8   :  { %p4812_p7 = scmp.lt.s32.totalorder %s4810_s0, %s4806_s18 }
  0xea   :  { %p4813_p8 = por %p4812_p7, %p4811_p6 }
  0xec   :  { %p4814_p9 = pnand %p4813_p8, %p4807_p5 }
  0xee   :  { %4817 = shalt.err (!%p4814_p9)
}
  0xef   :  { %302 = dma.hbm_to_vmem [thread:$0]  %s5499_s27, 16, %s300_s3, [#allocation33]  }
  0xf0   :  { %s4818_s12 = scalar_lea.hbm %s5514_s30, 16 }
  0xf1   :  { %p4819_p10 = scmp.ne.s32.totalorder %s5514_s30, %s4818_s12  ;;  %p4822_p11 = scmp.lt.u32.totalorder %s4818_s12, %s5514_s30 }
  0xf3   :  { %p4824_p12 = pnand %p4822_p11, %p4819_p10 }
  0xf5   :  { %4827 = shalt.err (!%p4824_p12)
}
  0xf6   :  { %s4828_s14 = scalar_lea.vmem %s322_s16, 16  ;;  %s4832_s22 = scalar_lea.vmem %s322_s16, 32 }
  0xf7   :  { %p4829_p13 = scmp.ne.s32.totalorder %s322_s16, %s4828_s14  ;;  %p4833_p0 = scmp.lt.s32.totalorder %s322_s16, %s322_s16 }
  0xf8   :  { %p4834_p1 = scmp.lt.s32.totalorder %s4832_s22, %s4828_s14 }
  0xfa   :  { %p4835_p2 = por %p4834_p1, %p4833_p0 }
  0xfc   :  { %p4836_p3 = pnand %p4835_p2, %p4829_p13 }
  0xfe   :  { %4839 = shalt.err (!%p4836_p3)
}
  0xff   :  { %324 = dma.hbm_to_vmem [thread:$0]  %s5514_s30, 16, %s322_s16, [#allocation36]  }
 0x100   :  { %s5368_s27 = smov [#allocation38]   ;;  %s5369_s23 = smov [#allocation41]  }
 0x101   :  { %s343_s17 = sshll.u32 %s5368_s27, 4  ;;  %s363_s24 = sshll.u32 %s5369_s23, 4  ;;  %s344_s17 = int_to_ptr.vmem [resolvable:$true] %s343_s17  ;;  %s364_s24 = int_to_ptr.vmem [resolvable:$true] %s363_s24 }
 0x102   :  { %s4840_s26 = scalar_lea.hbm %s5529_s19, 16 }
 0x103   :  { %p4841_p4 = scmp.ne.s32.totalorder %s5529_s19, %s4840_s26  ;;  %p4844_p5 = scmp.lt.u32.totalorder %s4840_s26, %s5529_s19 }
 0x105   :  { %p4846_p6 = pnand %p4844_p5, %p4841_p4 }
 0x107   :  { %4849 = shalt.err (!%p4846_p6)
}
 0x108   :  { %s4850_s28 = scalar_lea.vmem %s344_s17, 16  ;;  %s4854_s1 = scalar_lea.vmem %s344_s17, 32 }
 0x109   :  { %p4851_p7 = scmp.ne.s32.totalorder %s344_s17, %s4850_s28  ;;  %p4855_p8 = scmp.lt.s32.totalorder %s344_s17, %s344_s17 }
 0x10a   :  { %p4856_p9 = scmp.lt.s32.totalorder %s4854_s1, %s4850_s28 }
 0x10c   :  { %p4857_p10 = por %p4856_p9, %p4855_p8 }
 0x10e   :  { %p4858_p11 = pnand %p4857_p10, %p4851_p7 }
 0x110   :  { %4861 = shalt.err (!%p4858_p11)
}
 0x111   :  { %346 = dma.hbm_to_vmem [thread:$0]  %s5529_s19, 16, %s344_s17, [#allocation39]  }
 0x112   :  { %s4862_s30 = scalar_lea.hbm %s5539_s8, 16 }
 0x113   :  { %p4863_p12 = scmp.ne.s32.totalorder %s5539_s8, %s4862_s30  ;;  %p4866_p13 = scmp.lt.u32.totalorder %s4862_s30, %s5539_s8 }
 0x115   :  { %p4868_p0 = pnand %p4866_p13, %p4863_p12 }
 0x117   :  { %4871 = shalt.err (!%p4868_p0)
}
 0x118   :  { %s4872_s2 = scalar_lea.vmem %s364_s24, 16  ;;  %s4876_s25 = scalar_lea.vmem %s364_s24, 32 }
 0x119   :  { %p4873_p1 = scmp.ne.s32.totalorder %s364_s24, %s4872_s2  ;;  %p4877_p2 = scmp.lt.s32.totalorder %s364_s24, %s364_s24 }
 0x11a   :  { %p4878_p3 = scmp.lt.s32.totalorder %s4876_s25, %s4872_s2 }
 0x11c   :  { %p4879_p4 = por %p4878_p3, %p4877_p2 }
 0x11e   :  { %p4880_p5 = pnand %p4879_p4, %p4873_p1 }
 0x120   :  { %4883 = shalt.err (!%p4880_p5)
}
 0x121   :  { %366 = dma.hbm_to_vmem [thread:$0]  %s5539_s8, 16, %s364_s24, [#allocation42]  }
 0x122   :  { %s5370_s19 = smov [#allocation44]   ;;  %s5371_s6 = smov [#allocation2]  }
 0x123   :  { %s385_s7 = sshll.u32 %s5370_s19, 4  ;;  %s99_s10 = sshll.u32 %s5371_s6, 4  ;;  %s386_s7 = int_to_ptr.vmem [resolvable:$true] %s385_s7  ;;  %s100_s10 = int_to_ptr.vmem [resolvable:$true] %s99_s10 }
 0x124   :  { %s4884_s11 = scalar_lea.hbm %s5554_s29, 16 }
 0x125   :  { %p4885_p6 = scmp.ne.s32.totalorder %s5554_s29, %s4884_s11  ;;  %p4888_p7 = scmp.lt.u32.totalorder %s4884_s11, %s5554_s29 }
 0x127   :  { %p4890_p8 = pnand %p4888_p7, %p4885_p6 }
 0x129   :  { %4893 = shalt.err (!%p4890_p8)
}
 0x12a   :  { %s4894_s20 = scalar_lea.vmem %s386_s7, 16  ;;  %s4898_s3 = scalar_lea.vmem %s386_s7, 32 }
 0x12b   :  { %p4895_p9 = scmp.ne.s32.totalorder %s386_s7, %s4894_s20  ;;  %p4899_p10 = scmp.lt.s32.totalorder %s386_s7, %s386_s7 }
 0x12c   :  { %p4900_p11 = scmp.lt.s32.totalorder %s4898_s3, %s4894_s20 }
 0x12e   :  { %p4901_p12 = por %p4900_p11, %p4899_p10 }
 0x130   :  { %p4902_p13 = pnand %p4901_p12, %p4895_p9 }
 0x132   :  { %4905 = shalt.err (!%p4902_p13)
}
 0x133   :  { %s6017_s8 = sld [smem:[#allocation67_spill]] }
 0x134   :  { %388 = dma.hbm_to_vmem [thread:$0]  %s5554_s29, 16, %s386_s7, [#allocation45]  }
 0x139   :  { %s4906_s15 = scalar_lea.hbm %s6017_s8, 64 }
 0x13a   :  { %p4907_p0 = scmp.ne.s32.totalorder %s6017_s8, %s4906_s15  ;;  %p4910_p1 = scmp.lt.u32.totalorder %s4906_s15, %s6017_s8 }
 0x13c   :  { %p4912_p2 = pnand %p4910_p1, %p4907_p0 }
 0x13e   :  { %4915 = shalt.err (!%p4912_p2)
}
 0x13f   :  { %s4916_s16 = scalar_lea.vmem %s100_s10, 64  ;;  %p4921_p4 = scmp.lt.s32.totalorder %s100_s10, %s100_s10 }
 0x140   :  { %p4917_p3 = scmp.ne.s32.totalorder %s100_s10, %s4916_s16  ;;  %p4922_p5 = scmp.lt.s32.totalorder %s4916_s16, %s4916_s16 }
 0x142   :  { %p4923_p6 = por %p4922_p5, %p4921_p4 }
 0x144   :  { %p4924_p7 = pnand %p4923_p6, %p4917_p3 }
 0x146   :  { %4927 = shalt.err (!%p4924_p7)
}
 0x147   :  { %s6018_s9 = sld [smem:[#allocation68_spill]]  ;;  %s5372_s18 = smov [#allocation7]  }
 0x148   :  { %102 = dma.hbm_to_vmem [thread:$0]  %s6017_s8, 64, %s100_s10, [#allocation3]  }
 0x149   :  { %s121_s29 = sshll.u32 %s5372_s18, 4  ;;  %s5373_s0 = smov [#allocation10]   ;;  %s122_s29 = int_to_ptr.vmem [resolvable:$true] %s121_s29 }
 0x14a   :  { %s141_s12 = sshll.u32 %s5373_s0, 4  ;;  %s142_s12 = int_to_ptr.vmem [resolvable:$true] %s141_s12 }
 0x14d   :  { %s4928_s14 = scalar_lea.hbm %s6018_s9, 128 }
 0x14e   :  { %p4929_p8 = scmp.ne.s32.totalorder %s6018_s9, %s4928_s14  ;;  %p4932_p9 = scmp.lt.u32.totalorder %s4928_s14, %s6018_s9 }
 0x150   :  { %p4934_p10 = pnand %p4932_p9, %p4929_p8 }
 0x152   :  { %4937 = shalt.err (!%p4934_p10)
}
 0x153   :  { %s4938_s22 = scalar_lea.vmem %s122_s29, 128  ;;  %p4943_p12 = scmp.lt.s32.totalorder %s122_s29, %s122_s29 }
 0x154   :  { %p4939_p11 = scmp.ne.s32.totalorder %s122_s29, %s4938_s22  ;;  %p4944_p13 = scmp.lt.s32.totalorder %s4938_s22, %s4938_s22 }
 0x156   :  { %p4945_p0 = por %p4944_p13, %p4943_p12 }
 0x158   :  { %p4946_p1 = pnand %p4945_p0, %p4939_p11 }
 0x15a   :  { %4949 = shalt.err (!%p4946_p1)
}
 0x15b   :  { %s6019_s27 = sld [smem:[#allocation69_spill]] }
 0x15c   :  { %124 = dma.hbm_to_vmem [thread:$0]  %s6018_s9, 128, %s122_s29, [#allocation6]  }
 0x161   :  { %s4950_s17 = scalar_lea.hbm %s6019_s27, 128 }
 0x162   :  { %p4951_p2 = scmp.ne.s32.totalorder %s6019_s27, %s4950_s17  ;;  %p4954_p3 = scmp.lt.u32.totalorder %s4950_s17, %s6019_s27 }
 0x164   :  { %p4956_p4 = pnand %p4954_p3, %p4951_p2 }
 0x166   :  { %4959 = shalt.err (!%p4956_p4)
}
 0x167   :  { %s4960_s23 = scalar_lea.vmem %s142_s12, 128  ;;  %p4965_p6 = scmp.lt.s32.totalorder %s142_s12, %s142_s12 }
 0x168   :  { %p4961_p5 = scmp.ne.s32.totalorder %s142_s12, %s4960_s23  ;;  %p4966_p7 = scmp.lt.s32.totalorder %s4960_s23, %s4960_s23 }
 0x16a   :  { %p4967_p8 = por %p4966_p7, %p4965_p6 }
 0x16c   :  { %p4968_p9 = pnand %p4967_p8, %p4961_p5 }
 0x16e   :  { %4971 = shalt.err (!%p4968_p9)
}
 0x16f   :  { %s6020_s24 = sld [smem:[#allocation70_spill]]  ;;  %s5374_s26 = smov [#allocation13]  }
 0x170   :  { %144 = dma.hbm_to_vmem [thread:$0]  %s6019_s27, 128, %s142_s12, [#allocation9]  }
 0x171   :  { %s163_s28 = sshll.u32 %s5374_s26, 4  ;;  %s5375_s1 = smov [#allocation16]   ;;  %s164_s28 = int_to_ptr.vmem [resolvable:$true] %s163_s28 }
 0x172   :  { %s183_s30 = sshll.u32 %s5375_s1, 4  ;;  %s184_s30 = int_to_ptr.vmem [resolvable:$true] %s183_s30 }
 0x175   :  { %s4972_s2 = scalar_lea.hbm %s6020_s24, 64 }
 0x176   :  { %p4973_p10 = scmp.ne.s32.totalorder %s6020_s24, %s4972_s2  ;;  %p4976_p11 = scmp.lt.u32.totalorder %s4972_s2, %s6020_s24 }
 0x178   :  { %p4978_p12 = pnand %p4976_p11, %p4973_p10 }
 0x17a   :  { %4981 = shalt.err (!%p4978_p12)
}
 0x17b   :  { %s4982_s25 = scalar_lea.vmem %s164_s28, 64  ;;  %p4987_p0 = scmp.lt.s32.totalorder %s164_s28, %s164_s28 }
 0x17c   :  { %p4983_p13 = scmp.ne.s32.totalorder %s164_s28, %s4982_s25  ;;  %p4988_p1 = scmp.lt.s32.totalorder %s4982_s25, %s4982_s25 }
 0x17e   :  { %p4989_p2 = por %p4988_p1, %p4987_p0 }
 0x180   :  { %p4990_p3 = pnand %p4989_p2, %p4983_p13 }
 0x182   :  { %4993 = shalt.err (!%p4990_p3)
}
 0x183   :  { %s6021_s19 = sld [smem:[#allocation71_spill]] }
 0x184   :  { %166 = dma.hbm_to_vmem [thread:$0]  %s6020_s24, 64, %s164_s28, [#allocation12]  }
 0x189   :  { %s4994_s7 = scalar_lea.hbm %s6021_s19, 64 }
 0x18a   :  { %p4995_p4 = scmp.ne.s32.totalorder %s6021_s19, %s4994_s7  ;;  %p4998_p5 = scmp.lt.u32.totalorder %s4994_s7, %s6021_s19 }
 0x18c   :  { %p5000_p6 = pnand %p4998_p5, %p4995_p4 }
 0x18e   :  { %5003 = shalt.err (!%p5000_p6)
}
 0x18f   :  { %s5004_s6 = scalar_lea.vmem %s184_s30, 64  ;;  %p5009_p8 = scmp.lt.s32.totalorder %s184_s30, %s184_s30 }
 0x190   :  { %p5005_p7 = scmp.ne.s32.totalorder %s184_s30, %s5004_s6  ;;  %p5010_p9 = scmp.lt.s32.totalorder %s5004_s6, %s5004_s6 }
 0x192   :  { %p5011_p10 = por %p5010_p9, %p5009_p8 }
 0x194   :  { %p5012_p11 = pnand %p5011_p10, %p5005_p7 }
 0x196   :  { %5015 = shalt.err (!%p5012_p11)
}
 0x197   :  { %s6022_s10 = sld [smem:[#allocation72_spill]]  ;;  %s5376_s11 = smov [#allocation19]  }
 0x198   :  { %186 = dma.hbm_to_vmem [thread:$0]  %s6021_s19, 64, %s184_s30, [#allocation15]  }
 0x199   :  { %s205_s20 = sshll.u32 %s5376_s11, 4  ;;  %s5377_s3 = smov [#allocation22]   ;;  %s206_s20 = int_to_ptr.vmem [resolvable:$true] %s205_s20 }
 0x19a   :  { %s225_s8 = sshll.u32 %s5377_s3, 4  ;;  %s226_s8 = int_to_ptr.vmem [resolvable:$true] %s225_s8 }
 0x19d   :  { %s5016_s15 = scalar_lea.hbm %s6022_s10, 32 }
 0x19e   :  { %p5017_p12 = scmp.ne.s32.totalorder %s6022_s10, %s5016_s15  ;;  %p5020_p13 = scmp.lt.u32.totalorder %s5016_s15, %s6022_s10 }
 0x1a0   :  { %p5022_p0 = pnand %p5020_p13, %p5017_p12 }
 0x1a2   :  { %5025 = shalt.err (!%p5022_p0)
}
 0x1a3   :  { %s5026_s16 = scalar_lea.vmem %s206_s20, 32  ;;  %p5031_p2 = scmp.lt.s32.totalorder %s206_s20, %s206_s20 }
 0x1a4   :  { %p5027_p1 = scmp.ne.s32.totalorder %s206_s20, %s5026_s16  ;;  %p5032_p3 = scmp.lt.s32.totalorder %s5026_s16, %s5026_s16 }
 0x1a6   :  { %p5033_p4 = por %p5032_p3, %p5031_p2 }
 0x1a8   :  { %p5034_p5 = pnand %p5033_p4, %p5027_p1 }
 0x1aa   :  { %5037 = shalt.err (!%p5034_p5)
}
 0x1ab   :  { %s6023_s9 = sld [smem:[#allocation73_spill]] }
 0x1ac   :  { %208 = dma.hbm_to_vmem [thread:$0]  %s6022_s10, 32, %s206_s20, [#allocation18]  }
 0x1b1   :  { %s5038_s18 = scalar_lea.hbm %s6023_s9, 32 }
 0x1b2   :  { %p5039_p6 = scmp.ne.s32.totalorder %s6023_s9, %s5038_s18  ;;  %p5042_p7 = scmp.lt.u32.totalorder %s5038_s18, %s6023_s9 }
 0x1b4   :  { %p5044_p8 = pnand %p5042_p7, %p5039_p6 }
 0x1b6   :  { %5047 = shalt.err (!%p5044_p8)
}
 0x1b7   :  { %s5048_s29 = scalar_lea.vmem %s226_s8, 32  ;;  %p5053_p10 = scmp.lt.s32.totalorder %s226_s8, %s226_s8 }
 0x1b8   :  { %p5049_p9 = scmp.ne.s32.totalorder %s226_s8, %s5048_s29  ;;  %p5054_p11 = scmp.lt.s32.totalorder %s5048_s29, %s5048_s29 }
 0x1ba   :  { %p5055_p12 = por %p5054_p11, %p5053_p10 }
 0x1bc   :  { %p5056_p13 = pnand %p5055_p12, %p5049_p9 }
 0x1be   :  { %5059 = shalt.err (!%p5056_p13)
}
 0x1bf   :  { %s6024_s0 = sld [smem:[#allocation74_spill]]  ;;  %s5378_s12 = smov [#allocation25]  }
 0x1c0   :  { %228 = dma.hbm_to_vmem [thread:$0]  %s6023_s9, 32, %s226_s8, [#allocation21]  }
 0x1c1   :  { %s247_s14 = sshll.u32 %s5378_s12, 4  ;;  %s5379_s22 = smov [#allocation28]   ;;  %s248_s14 = int_to_ptr.vmem [resolvable:$true] %s247_s14 }
 0x1c2   :  { %s267_s27 = sshll.u32 %s5379_s22, 4  ;;  %s268_s27 = int_to_ptr.vmem [resolvable:$true] %s267_s27 }
 0x1c5   :  { %s5060_s17 = scalar_lea.hbm %s6024_s0, 16 }
 0x1c6   :  { %p5061_p0 = scmp.ne.s32.totalorder %s6024_s0, %s5060_s17  ;;  %p5064_p1 = scmp.lt.u32.totalorder %s5060_s17, %s6024_s0 }
 0x1c8   :  { %p5066_p2 = pnand %p5064_p1, %p5061_p0 }
 0x1ca   :  { %5069 = shalt.err (!%p5066_p2)
}
 0x1cb   :  { %s5070_s23 = scalar_lea.vmem %s248_s14, 16  ;;  %s5074_s24 = scalar_lea.vmem %s248_s14, 32 }
 0x1cc   :  { %p5071_p3 = scmp.ne.s32.totalorder %s248_s14, %s5070_s23  ;;  %p5075_p4 = scmp.lt.s32.totalorder %s248_s14, %s248_s14 }
 0x1cd   :  { %p5076_p5 = scmp.lt.s32.totalorder %s5074_s24, %s5070_s23 }
 0x1cf   :  { %p5077_p6 = por %p5076_p5, %p5075_p4 }
 0x1d1   :  { %p5078_p7 = pnand %p5077_p6, %p5071_p3 }
 0x1d3   :  { %5081 = shalt.err (!%p5078_p7)
}
 0x1d4   :  { %s6025_s26 = sld [smem:[#allocation75_spill]] }
 0x1d5   :  { %250 = dma.hbm_to_vmem [thread:$0]  %s6024_s0, 16, %s248_s14, [#allocation24]  }
 0x1da   :  { %s5082_s28 = scalar_lea.hbm %s6025_s26, 16 }
 0x1db   :  { %p5083_p8 = scmp.ne.s32.totalorder %s6025_s26, %s5082_s28  ;;  %p5086_p9 = scmp.lt.u32.totalorder %s5082_s28, %s6025_s26 }
 0x1dd   :  { %p5088_p10 = pnand %p5086_p9, %p5083_p8 }
 0x1df   :  { %5091 = shalt.err (!%p5088_p10)
}
 0x1e0   :  { %s5092_s1 = scalar_lea.vmem %s268_s27, 16  ;;  %s5096_s30 = scalar_lea.vmem %s268_s27, 32 }
 0x1e1   :  { %p5093_p11 = scmp.ne.s32.totalorder %s268_s27, %s5092_s1  ;;  %p5097_p12 = scmp.lt.s32.totalorder %s268_s27, %s268_s27 }
 0x1e2   :  { %p5098_p13 = scmp.lt.s32.totalorder %s5096_s30, %s5092_s1 }
 0x1e4   :  { %p5099_p0 = por %p5098_p13, %p5097_p12 }
 0x1e6   :  { %p5100_p1 = pnand %p5099_p0, %p5093_p11 }
 0x1e8   :  { %5103 = shalt.err (!%p5100_p1)
}
 0x1e9   :  { %s6026_s2 = sld [smem:[#allocation77_spill]]  ;;  %s5380_s25 = smov [#allocation31]  }
 0x1ea   :  { %270 = dma.hbm_to_vmem [thread:$0]  %s6025_s26, 16, %s268_s27, [#allocation27]  }
 0x1eb   :  { %s289_s19 = sshll.u32 %s5380_s25, 4  ;;  %s5381_s7 = smov [#allocation34]   ;;  %s290_s19 = int_to_ptr.vmem [resolvable:$true] %s289_s19 }
 0x1ec   :  { %s311_s6 = sshll.u32 %s5381_s7, 4  ;;  %s312_s6 = int_to_ptr.vmem [resolvable:$true] %s311_s6 }
 0x1ef   :  { %s5104_s10 = scalar_lea.hbm %s6026_s2, 16 }
 0x1f0   :  { %p5105_p2 = scmp.ne.s32.totalorder %s6026_s2, %s5104_s10  ;;  %p5108_p3 = scmp.lt.u32.totalorder %s5104_s10, %s6026_s2 }
 0x1f2   :  { %p5110_p4 = pnand %p5108_p3, %p5105_p2 }
 0x1f4   :  { %5113 = shalt.err (!%p5110_p4)
}
 0x1f5   :  { %s5114_s11 = scalar_lea.vmem %s290_s19, 16  ;;  %s5118_s20 = scalar_lea.vmem %s290_s19, 32 }
 0x1f6   :  { %p5115_p5 = scmp.ne.s32.totalorder %s290_s19, %s5114_s11  ;;  %p5119_p6 = scmp.lt.s32.totalorder %s290_s19, %s290_s19 }
 0x1f7   :  { %p5120_p7 = scmp.lt.s32.totalorder %s5118_s20, %s5114_s11 }
 0x1f9   :  { %p5121_p8 = por %p5120_p7, %p5119_p6 }
 0x1fb   :  { %p5122_p9 = pnand %p5121_p8, %p5115_p5 }
 0x1fd   :  { %5125 = shalt.err (!%p5122_p9)
}
 0x1fe   :  { %s6027_s3 = sld [smem:[#allocation79_spill]] }
 0x1ff   :  { %292 = dma.hbm_to_vmem [thread:$0]  %s6026_s2, 16, %s290_s19, [#allocation30]  }
 0x204   :  { %s5126_s8 = scalar_lea.hbm %s6027_s3, 16 }
 0x205   :  { %p5127_p10 = scmp.ne.s32.totalorder %s6027_s3, %s5126_s8  ;;  %p5130_p11 = scmp.lt.u32.totalorder %s5126_s8, %s6027_s3 }
 0x207   :  { %p5132_p12 = pnand %p5130_p11, %p5127_p10 }
 0x209   :  { %5135 = shalt.err (!%p5132_p12)
}
 0x20a   :  { %s5136_s15 = scalar_lea.vmem %s312_s6, 16  ;;  %s5140_s16 = scalar_lea.vmem %s312_s6, 32 }
 0x20b   :  { %p5137_p13 = scmp.ne.s32.totalorder %s312_s6, %s5136_s15  ;;  %p5141_p0 = scmp.lt.s32.totalorder %s312_s6, %s312_s6 }
 0x20c   :  { %p5142_p1 = scmp.lt.s32.totalorder %s5140_s16, %s5136_s15 }
 0x20e   :  { %p5143_p2 = por %p5142_p1, %p5141_p0 }
 0x210   :  { %p5144_p3 = pnand %p5143_p2, %p5137_p13 }
 0x212   :  { %5147 = shalt.err (!%p5144_p3)
}
 0x213   :  { %s6028_s9 = sld [smem:[#allocation80_spill]]  ;;  %s5382_s18 = smov [#allocation37]  }
 0x214   :  { %314 = dma.hbm_to_vmem [thread:$0]  %s6027_s3, 16, %s312_s6, [#allocation33]  }
 0x215   :  { %s331_s29 = sshll.u32 %s5382_s18, 4  ;;  %s5383_s0 = smov [#allocation40]   ;;  %s332_s29 = int_to_ptr.vmem [resolvable:$true] %s331_s29 }
 0x216   :  { %s353_s12 = sshll.u32 %s5383_s0, 4  ;;  %s354_s12 = int_to_ptr.vmem [resolvable:$true] %s353_s12 }
 0x219   :  { %s5148_s14 = scalar_lea.hbm %s6028_s9, 16 }
 0x21a   :  { %p5149_p4 = scmp.ne.s32.totalorder %s6028_s9, %s5148_s14  ;;  %p5152_p5 = scmp.lt.u32.totalorder %s5148_s14, %s6028_s9 }
 0x21c   :  { %p5154_p6 = pnand %p5152_p5, %p5149_p4 }
 0x21e   :  { %5157 = shalt.err (!%p5154_p6)
}
 0x21f   :  { %s5158_s22 = scalar_lea.vmem %s332_s29, 16  ;;  %s5162_s27 = scalar_lea.vmem %s332_s29, 32 }
 0x220   :  { %p5159_p7 = scmp.ne.s32.totalorder %s332_s29, %s5158_s22  ;;  %p5163_p8 = scmp.lt.s32.totalorder %s332_s29, %s332_s29 }
 0x221   :  { %p5164_p9 = scmp.lt.s32.totalorder %s5162_s27, %s5158_s22 }
 0x223   :  { %p5165_p10 = por %p5164_p9, %p5163_p8 }
 0x225   :  { %p5166_p11 = pnand %p5165_p10, %p5159_p7 }
 0x227   :  { %5169 = shalt.err (!%p5166_p11)
}
 0x228   :  { %s6029_s17 = sld [smem:[#allocation82_spill]] }
 0x229   :  { %334 = dma.hbm_to_vmem [thread:$0]  %s6028_s9, 16, %s332_s29, [#allocation36]  }
 0x22e   :  { %s5170_s23 = scalar_lea.hbm %s6029_s17, 16 }
 0x22f   :  { %p5171_p12 = scmp.ne.s32.totalorder %s6029_s17, %s5170_s23  ;;  %p5174_p13 = scmp.lt.u32.totalorder %s5170_s23, %s6029_s17 }
 0x231   :  { %p5176_p0 = pnand %p5174_p13, %p5171_p12 }
 0x233   :  { %5179 = shalt.err (!%p5176_p0)
}
 0x234   :  { %s5180_s24 = scalar_lea.vmem %s354_s12, 16  ;;  %s5184_s26 = scalar_lea.vmem %s354_s12, 32 }
 0x235   :  { %p5181_p1 = scmp.ne.s32.totalorder %s354_s12, %s5180_s24  ;;  %p5185_p2 = scmp.lt.s32.totalorder %s354_s12, %s354_s12 }
 0x236   :  { %p5186_p3 = scmp.lt.s32.totalorder %s5184_s26, %s5180_s24 }
 0x238   :  { %p5187_p4 = por %p5186_p3, %p5185_p2 }
 0x23a   :  { %p5188_p5 = pnand %p5187_p4, %p5181_p1 }
 0x23c   :  { %5191 = shalt.err (!%p5188_p5)
}
 0x23d   :  { %s6030_s28 = sld [smem:[#allocation84_spill]]  ;;  %s5384_s1 = smov [#allocation43]  }
 0x23e   :  { %356 = dma.hbm_to_vmem [thread:$0]  %s6029_s17, 16, %s354_s12, [#allocation39]  }
 0x23f   :  { %s375_s30 = sshll.u32 %s5384_s1, 4  ;;  %s5385_s2 = smov [#allocation46]   ;;  %s376_s30 = int_to_ptr.vmem [resolvable:$true] %s375_s30 }
 0x240   :  { %s395_s25 = sshll.u32 %s5385_s2, 4  ;;  %s396_s25 = int_to_ptr.vmem [resolvable:$true] %s395_s25 }
 0x243   :  { %s5192_s19 = scalar_lea.hbm %s6030_s28, 16 }
 0x244   :  { %p5193_p6 = scmp.ne.s32.totalorder %s6030_s28, %s5192_s19  ;;  %p5196_p7 = scmp.lt.u32.totalorder %s5192_s19, %s6030_s28 }
 0x246   :  { %p5198_p8 = pnand %p5196_p7, %p5193_p6 }
 0x248   :  { %5201 = shalt.err (!%p5198_p8)
}
 0x249   :  { %s5202_s7 = scalar_lea.vmem %s376_s30, 16  ;;  %s5206_s6 = scalar_lea.vmem %s376_s30, 32 }
 0x24a   :  { %p5203_p9 = scmp.ne.s32.totalorder %s376_s30, %s5202_s7  ;;  %p5207_p10 = scmp.lt.s32.totalorder %s376_s30, %s376_s30 }
 0x24b   :  { %p5208_p11 = scmp.lt.s32.totalorder %s5206_s6, %s5202_s7 }
 0x24d   :  { %p5209_p12 = por %p5208_p11, %p5207_p10 }
 0x24f   :  { %p5210_p13 = pnand %p5209_p12, %p5203_p9 }
 0x251   :  { %5213 = shalt.err (!%p5210_p13)
}
 0x252   :  { %378 = dma.hbm_to_vmem [thread:$0]  %s6030_s28, 16, %s376_s30, [#allocation42]  }
 0x253   :  { %s5214_s10 = scalar_lea.hbm %s5559_s13, 16 }
 0x254   :  { %p5215_p0 = scmp.ne.s32.totalorder %s5559_s13, %s5214_s10  ;;  %p5218_p1 = scmp.lt.u32.totalorder %s5214_s10, %s5559_s13 }
 0x256   :  { %p5220_p2 = pnand %p5218_p1, %p5215_p0 }
 0x258   :  { %5223 = shalt.err (!%p5220_p2)
}
 0x259   :  { %s5224_s11 = scalar_lea.vmem %s396_s25, 16  ;;  %s5228_s20 = scalar_lea.vmem %s396_s25, 32 }
 0x25a   :  { %p5225_p3 = scmp.ne.s32.totalorder %s396_s25, %s5224_s11  ;;  %p5229_p4 = scmp.lt.s32.totalorder %s396_s25, %s396_s25 }
 0x25b   :  { %p5230_p5 = scmp.lt.s32.totalorder %s5228_s20, %s5224_s11 }
 0x25d   :  { %p5231_p6 = por %p5230_p5, %p5229_p4 }
 0x25f   :  { %p5232_p7 = pnand %p5231_p6, %p5225_p3 }
 0x261   :  { %5235 = shalt.err (!%p5232_p7)
}
 0x262   :  { %398 = dma.hbm_to_vmem [thread:$0]  %s5559_s13, 16, %s396_s25, [#allocation45]  }
 0x263   :  { %s5386_s3 = smov [#allocation47]   ;;  %s5236_s15 = scalar_lea.hbm %s5569_s21, 16 }
 0x264   :  { %s407_s8 = sshll.u32 %s5386_s3, 4  ;;  %p5237_p8 = scmp.ne.s32.totalorder %s5569_s21, %s5236_s15  ;;  %s408_s8 = int_to_ptr.vmem [resolvable:$true] %s407_s8 }
 0x265   :  { %p5240_p9 = scmp.lt.u32.totalorder %s5236_s15, %s5569_s21 }
 0x267   :  { %p5242_p10 = pnand %p5240_p9, %p5237_p8 }
 0x269   :  { %5245 = shalt.err (!%p5242_p10)
}
 0x26a   :  { %s5246_s16 = scalar_lea.vmem %s408_s8, 16  ;;  %s5250_s9 = scalar_lea.vmem %s408_s8, 32 }
 0x26b   :  { %p5247_p11 = scmp.ne.s32.totalorder %s408_s8, %s5246_s16  ;;  %p5251_p12 = scmp.lt.s32.totalorder %s408_s8, %s408_s8 }
 0x26c   :  { %p5252_p13 = scmp.lt.s32.totalorder %s5250_s9, %s5246_s16 }
 0x26e   :  { %p5253_p0 = por %p5252_p13, %p5251_p12 }
 0x270   :  { %p5254_p1 = pnand %p5253_p0, %p5247_p11 }
 0x272   :  { %5257 = shalt.err (!%p5254_p1)
}
 0x273   :  { %410 = dma.hbm_to_vmem [thread:$0]  %s5569_s21, 16, %s408_s8, [#allocation48]  }
 0x274   :  { %5280 = dma.done.wait [#allocation3], 64  }
 0x275   :  { %5281 = vsyncadd [#allocation3], 4294967232 }
 0x276   :  { %5282 = dma.done.wait [#allocation6], 4224  }
 0x277   :  { %5283 = vsyncadd [#allocation6], 4294963072 }
 0x278   :  { %5284 = dma.done.wait [#allocation9], 256  }
 0x279   :  { %5285 = vsyncadd [#allocation9], 4294967040 }
 0x27a   :  { %5286 = dma.done.wait [#allocation12], 65600  }
 0x27b   :  { %5287 = vsyncadd [#allocation12], 4294901696 }
 0x27c   :  { %5288 = dma.done.wait [#allocation15], 128  }
 0x27d   :  { %5289 = vsyncadd [#allocation15], 4294967168 }
 0x27e   :  { %5290 = dma.done.wait [#allocation18], 16416  }
 0x27f   :  { %5291 = vsyncadd [#allocation18], 4294950880 }
 0x280   :  { %5292 = dma.done.wait [#allocation21], 64  }
 0x281   :  { %5293 = vsyncadd [#allocation21], 4294967232 }
 0x282   :  { %5294 = dma.done.wait [#allocation24], 4112  }
 0x283   :  { %5295 = vsyncadd [#allocation24], 4294963184 }
 0x284   :  { %5296 = dma.done.wait [#allocation27], 32  }
 0x285   :  { %5297 = vsyncadd [#allocation27], 4294967264 }
 0x286   :  { %5298 = dma.done.wait [#allocation30], 32  }
 0x287   :  { %5299 = vsyncadd [#allocation30], 4294967264 }
 0x288   :  { %5300 = dma.done.wait [#allocation33], 32  }
 0x289   :  { %5301 = vsyncadd [#allocation33], 4294967264 }
 0x28a   :  { %5302 = dma.done.wait [#allocation36], 32  }
 0x28b   :  { %5303 = vsyncadd [#allocation36], 4294967264 }
 0x28c   :  { %5304 = dma.done.wait [#allocation39], 32  }
 0x28d   :  { %5305 = vsyncadd [#allocation39], 4294967264 }
 0x28e   :  { %5306 = dma.done.wait [#allocation42], 32  }
 0x28f   :  { %5307 = vsyncadd [#allocation42], 4294967264 }
 0x290   :  { %5308 = dma.done.wait [#allocation45], 32  }
 0x291   :  { %5309 = vsyncadd [#allocation45], 4294967264 }
 0x292   :  { %5310 = dma.done.wait [#allocation48], 16  }
 0x293   :  { %5311 = vsyncadd [#allocation48], 4294967280  ;;  %v5387_v0 = vmov 0.0   ;;  %v503_v1 = vld [vmem:[#allocation5 + $0x8] sm:$0xff]  ;;  %v502_v3 = vld [vmem:[#allocation5] sm:$0xff]  ;;  %vm578_vm0 = vcmask 261120  }
 0x294   :  { %646 = vmatprep.mubr.f32.mxu1 %v5387_v0  ;;  %v511_v2 = vld [vmem:[#allocation5 + $0x48] sm:$0xff]  ;;  %v510_v5 = vld [vmem:[#allocation5 + $0x40] sm:$0xff]  ;;  %v505_v12 = vld [vmem:[#allocation5 + $0x18] sm:$0xff]  ;;  %vm866_vm1 = vcmask 1043456   ;;  %s6031_s13 = sld [smem:[#allocation76_spill]]  ;;  %vm5389_vm2 = vmmov 0  }
 0x295   :  { %v3711_v4 = vpack.c.bf16 %v511_v2, %v503_v1  ;;  %v519_v6 = vld [vmem:[#allocation5 + $0x88] sm:$0xff]  ;;  %v3713_v8 = vpack.c.bf16 %v510_v5, %v502_v3  ;;  %v518_v10 = vld [vmem:[#allocation5 + $0x80] sm:$0xff]  ;;  %v513_v13 = vld [vmem:[#allocation5 + $0x58] sm:$0xff]  ;;  %s6032_s21 = sld [smem:[#allocation78_spill]]  ;;  %vm2980_vm3 = vcmask 519168   ;;  %s6033_s18 = sld [smem:[#allocation81_spill]] }
 0x296   :  { %v527_v7 = vld [vmem:[#allocation5 + $0xc8] sm:$0xff]  ;;  %v526_v11 = vld [vmem:[#allocation5 + $0xc0] sm:$0xff]  ;;  %v3719_v15 = vpack.c.bf16 %v513_v13, %v505_v12  ;;  %v504_v16 = vld [vmem:[#allocation5 + $0x10] sm:$0xff]  ;;  %vm3034_vm4 = vcmask 523264   ;;  %vm3108_vm5 = vcmask 257024   ;;  %s6034_s29 = sld [smem:[#allocation83_spill]] }
 0x297   :  { %v3715_v9 = vpack.c.bf16 %v527_v7, %v519_v6  ;;  %3712 = vmatprep.subr.bf16.mxu1 %v3711_v4  ;;  %v3717_v14 = vpack.c.bf16 %v526_v11, %v518_v10  ;;  %v512_v17 = vld [vmem:[#allocation5 + $0x50] sm:$0xff]  ;;  %v521_v18 = vld [vmem:[#allocation5 + $0x98] sm:$0xff]  ;;  %v507_v25 = vld [vmem:[#allocation5 + $0x28] sm:$0xff]  ;;  %vm3231_vm6 = vcmask 125952   ;;  %vm3279_vm7 = vcmask 130048  }
 0x298   :  { %3714 = vmatpush1.bf16.msra.mxu1 %v3713_v8  ;;  %v529_v19 = vld [vmem:[#allocation5 + $0xd8] sm:$0xff]  ;;  %v3721_v21 = vpack.c.bf16 %v512_v17, %v504_v16  ;;  %v520_v23 = vld [vmem:[#allocation5 + $0x90] sm:$0xff]  ;;  %v515_v26 = vld [vmem:[#allocation5 + $0x68] sm:$0xff]  ;;  %vm3353_vm8 = vcmask 60416   ;;  %vm3398_vm9 = vcmask 64512   ;;  %vm3472_vm10 = vcmask 27648  }
 0x299   :  { %3716 = vmatprep.subr.bf16.mxu1 %v3715_v9  ;;  %v5697_v20 = vld [vmem:[#allocation2] sm:$0xf]  ;;  %v3723_v22 = vpack.c.bf16 %v529_v19, %v521_v18  ;;  %v528_v24 = vld [vmem:[#allocation5 + $0xd0] sm:$0xff]  ;;  %v1143_v27 = vld [vmem:[#allocation11 + $0x8] sm:$0xff]  ;;  %v3727_v33 = vpack.c.bf16 %v515_v26, %v507_v25 }
 0x29a   :  { %v1147_v28 = vld [vmem:[#allocation11 + $0x28] sm:$0xff]  ;;  %v3725_v29 = vpack.c.bf16 %v528_v24, %v520_v23  ;;  %v1142_v31 = vld [vmem:[#allocation11] sm:$0xff]  ;;  %v523_v38 = vld [vmem:[#allocation5 + $0xa8] sm:$0xff] }
 0x29b   :  { %v3743_v30 = vpack.c.bf16 %v1147_v28, %v1143_v27  ;;  %v1146_v32 = vld [vmem:[#allocation11 + $0x20] sm:$0xff]  ;;  %v506_v34 = vld [vmem:[#allocation5 + $0x20] sm:$0xff]  ;;  %v531_v39 = vld [vmem:[#allocation5 + $0xe8] sm:$0xff] }
 0x29c   :  { %3718 = vmatpush1.bf16.msra.mxu1 %v3717_v14  ;;  %v514_v35 = vld [vmem:[#allocation5 + $0x60] sm:$0xff]  ;;  %v3745_v36 = vpack.c.bf16 %v1146_v32, %v1142_v31  ;;  %v3731_v43 = vpack.c.bf16 %v531_v39, %v523_v38  ;;  %v509_v46 = vld [vmem:[#allocation5 + $0x38] sm:$0xff]  ;;  %v508_v50 = vld [vmem:[#allocation5 + $0x30] sm:$0xff] }
 0x29d   :  { %3720 = vmatprep.subr.bf16.mxu1 %v3719_v15  ;;  %v1151_v37 = vld [vmem:[#allocation11 + $0x48] sm:$0xff]  ;;  %3744 = vmatprep.subr.bf16.mxu0 %v3743_v30  ;;  %v3729_v42 = vpack.c.bf16 %v514_v35, %v506_v34  ;;  %v517_v47 = vld [vmem:[#allocation5 + $0x78] sm:$0xff]  ;;  %v516_v51 = vld [vmem:[#allocation5 + $0x70] sm:$0xff] }
 0x29e   :  { %v1155_v40 = vld [vmem:[#allocation11 + $0x68] sm:$0xff]  ;;  %3746 = vmatpush1.bf16.msra.mxu0 %v3745_v36  ;;  %v3735_v49 = vpack.c.bf16 %v517_v47, %v509_v46  ;;  %v525_v52 = vld [vmem:[#allocation5 + $0xb8] sm:$0xff]  ;;  %v3737_v54 = vpack.c.bf16 %v516_v51, %v508_v50  ;;  %v524_v56 = vld [vmem:[#allocation5 + $0xb0] sm:$0xff] }
 0x29f   :  { %3539 = vmatmul.mubr.msk.f32.vlgmr.msra.gmra.mrb[0].mxu1 %vm578_vm0, %v5697_v20  ;;  %v3747_v41 = vpack.c.bf16 %v1155_v40, %v1151_v37  ;;  %v522_v44 = vld [vmem:[#allocation5 + $0xa0] sm:$0xff]  ;;  %v533_v53 = vld [vmem:[#allocation5 + $0xf8] sm:$0xff]  ;;  %v532_v57 = vld [vmem:[#allocation5 + $0xf0] sm:$0xff] }
 0x2a0   :  { %3722 = vmatpush1.bf16.msra.mxu1 %v3721_v21  ;;  %717 = vmatprep.mubr.f32.mxu1 %v5387_v0  ;;  %v530_v45 = vld [vmem:[#allocation5 + $0xe0] sm:$0xff]  ;;  %v3739_v55 = vpack.c.bf16 %v533_v53, %v525_v52  ;;  %v1145_v58 = vld [vmem:[#allocation11 + $0x18] sm:$0xff]  ;;  %v3741_v60 = vpack.c.bf16 %v532_v57, %v524_v56  ;;  %v1144_v62 = vld [vmem:[#allocation11 + $0x10] sm:$0xff] }
 0x2a1   :  { %3724 = vmatprep.subr.bf16.mxu1 %v3723_v22  ;;  %3748 = vmatprep.subr.bf16.mxu0 %v3747_v41  ;;  %v3733_v48 = vpack.c.bf16 %v530_v45, %v522_v44  ;;  %v1149_v59 = vld [vmem:[#allocation11 + $0x38] sm:$0xff]  ;;  %v1148_v63 = vld [vmem:[#allocation11 + $0x30] sm:$0xff]  ;;  %v1150_v5 = vld [vmem:[#allocation11 + $0x40] sm:$0xff] }
 0x2a2   :  { %v3999_v61 = vpack.c.bf16 %v1149_v59, %v1145_v58  ;;  %v1153_v1 = vld [vmem:[#allocation11 + $0x58] sm:$0xff]  ;;  %v4001_v3 = vpack.c.bf16 %v1148_v63, %v1144_v62  ;;  %v1154_v6 = vld [vmem:[#allocation11 + $0x60] sm:$0xff]  ;;  %v1152_v7 = vld [vmem:[#allocation11 + $0x50] sm:$0xff] }
 0x2a3   :  { %v1157_v2 = vld [vmem:[#allocation11 + $0x78] sm:$0xff]  ;;  %v3749_v8 = vpack.c.bf16 %v1154_v6, %v1150_v5  ;;  %v1156_v9 = vld [vmem:[#allocation11 + $0x70] sm:$0xff]  ;;  %v1159_v11 = vld [vmem:[#allocation11 + $0x88] sm:$0xff] }
 0x2a4   :  { %3726 = vmatpush1.bf16.msra.mxu1 %v3725_v29  ;;  %v4003_v4 = vpack.c.bf16 %v1157_v2, %v1153_v1  ;;  %v4005_v10 = vpack.c.bf16 %v1156_v9, %v1152_v7  ;;  %v1163_v12 = vld [vmem:[#allocation11 + $0xa8] sm:$0xff]  ;;  %v1161_v13 = vld [vmem:[#allocation11 + $0x98] sm:$0xff]  ;;  %v1158_v16 = vld [vmem:[#allocation11 + $0x80] sm:$0xff] }
 0x2a5   :  { %3728 = vmatprep.subr.bf16.mxu1 %v3727_v33  ;;  %3750 = vmatpush1.bf16.msra.mxu0 %v3749_v8  ;;  %v3751_v14 = vpack.c.bf16 %v1163_v12, %v1159_v11  ;;  %v1165_v15 = vld [vmem:[#allocation11 + $0xb8] sm:$0xff]  ;;  %v1162_v17 = vld [vmem:[#allocation11 + $0xa0] sm:$0xff]  ;;  %v1164_v21 = vld [vmem:[#allocation11 + $0xb0] sm:$0xff] }
 0x2a6   :  { %v4007_v18 = vpack.c.bf16 %v1165_v15, %v1161_v13  ;;  %v3753_v19 = vpack.c.bf16 %v1162_v17, %v1158_v16  ;;  %v1167_v23 = vld [vmem:[#allocation11 + $0xc8] sm:$0xff]  ;;  %v1169_v25 = vld [vmem:[#allocation11 + $0xd8] sm:$0xff]  ;;  %v1166_v28 = vld [vmem:[#allocation11 + $0xc0] sm:$0xff] }
 0x2a7   :  { %3540 = vmatmul.mubr.msk.f32.vlgmr.msra.gmra.mrb[2].mxu1 %vm578_vm0, %v5697_v20  ;;  %3752 = vmatprep.subr.bf16.mxu0 %v3751_v14  ;;  %v1171_v24 = vld [vmem:[#allocation11 + $0xe8] sm:$0xff]  ;;  %v1173_v27 = vld [vmem:[#allocation11 + $0xf8] sm:$0xff]  ;;  %v1170_v29 = vld [vmem:[#allocation11 + $0xe0] sm:$0xff] }
 0x2a8   :  { %3730 = vmatpush1.bf16.msra.mxu1 %v3729_v42  ;;  %788 = vmatprep.mubr.f32.mxu1 %v5387_v0  ;;  %v3755_v26 = vpack.c.bf16 %v1171_v24, %v1167_v23  ;;  %v4011_v30 = vpack.c.bf16 %v1173_v27, %v1169_v25  ;;  %v3757_v31 = vpack.c.bf16 %v1170_v29, %v1166_v28  ;;  %v1168_v32 = vld [vmem:[#allocation11 + $0xd0] sm:$0xff]  ;;  %v1175_v35 = vld [vmem:[#allocation11 + $0x108] sm:$0xff]  ;;  %v1177_v37 = vld [vmem:[#allocation11 + $0x118] sm:$0xff] }
 0x2a9   :  { %3732 = vmatprep.subr.bf16.mxu1 %v3731_v43  ;;  %3754 = vmatpush1.bf16.msra.mxu0 %v3753_v19  ;;  %v1172_v33 = vld [vmem:[#allocation11 + $0xf0] sm:$0xff]  ;;  %v1179_v36 = vld [vmem:[#allocation11 + $0x128] sm:$0xff]  ;;  %v1181_v39 = vld [vmem:[#allocation11 + $0x138] sm:$0xff] }
 0x2aa   :  { %3756 = vmatprep.subr.bf16.mxu0 %v3755_v26  ;;  %v4013_v34 = vpack.c.bf16 %v1172_v33, %v1168_v32  ;;  %v3759_v38 = vpack.c.bf16 %v1179_v36, %v1175_v35  ;;  %v1174_v40 = vld [vmem:[#allocation11 + $0x100] sm:$0xff]  ;;  %v4015_v42 = vpack.c.bf16 %v1181_v39, %v1177_v37  ;;  %v1176_v44 = vld [vmem:[#allocation11 + $0x110] sm:$0xff]  ;;  %v1183_v47 = vld [vmem:[#allocation11 + $0x148] sm:$0xff] }
 0x2ab   :  { %v1178_v41 = vld [vmem:[#allocation11 + $0x120] sm:$0xff]  ;;  %v1180_v45 = vld [vmem:[#allocation11 + $0x130] sm:$0xff]  ;;  %v1189_v51 = vld [vmem:[#allocation11 + $0x178] sm:$0xff] }
 0x2ac   :  { %3734 = vmatpush1.bf16.msra.mxu1 %v3733_v48  ;;  %v3761_v43 = vpack.c.bf16 %v1178_v41, %v1174_v40  ;;  %v4017_v46 = vpack.c.bf16 %v1180_v45, %v1176_v44  ;;  %v1187_v48 = vld [vmem:[#allocation11 + $0x168] sm:$0xff]  ;;  %v1182_v52 = vld [vmem:[#allocation11 + $0x140] sm:$0xff]  ;;  %v1184_v56 = vld [vmem:[#allocation11 + $0x150] sm:$0xff] }
 0x2ad   :  { %3736 = vmatprep.subr.bf16.mxu1 %v3735_v49  ;;  %3758 = vmatpush1.bf16.msra.mxu0 %v3757_v31  ;;  %v1185_v49 = vld [vmem:[#allocation11 + $0x158] sm:$0xff]  ;;  %v3763_v50 = vpack.c.bf16 %v1187_v48, %v1183_v47  ;;  %v1186_v53 = vld [vmem:[#allocation11 + $0x160] sm:$0xff]  ;;  %v1188_v57 = vld [vmem:[#allocation11 + $0x170] sm:$0xff] }
 0x2ae   :  { %3760 = vmatprep.subr.bf16.mxu0 %v3759_v38  ;;  %v4021_v58 = vpack.c.bf16 %v1188_v57, %v1184_v56  ;;  %v1191_v59 = vld [vmem:[#allocation11 + $0x188] sm:$0xff]  ;;  %v1197_v63 = vld [vmem:[#allocation11 + $0x1b8] sm:$0xff]  ;;  %v1190_v1 = vld [vmem:[#allocation11 + $0x180] sm:$0xff] }
 0x2af   :  { %3541 = vmatmul.mubr.msk.f32.vlgmr.msra.gmra.mrb[4].mxu1 %vm578_vm0, %v5697_v20  ;;  %v1194_v2 = vld [vmem:[#allocation11 + $0x1a0] sm:$0xff]  ;;  %v1192_v5 = vld [vmem:[#allocation11 + $0x190] sm:$0xff]  ;;  %v1199_v8 = vld [vmem:[#allocation11 + $0x1c8] sm:$0xff] }
 0x2b0   :  { %3738 = vmatpush1.bf16.msra.mxu1 %v3737_v54  ;;  %859 = vmatprep.mubr.f32.mxu1 %v5387_v0  ;;  %v4019_v54 = vpack.c.bf16 %v1189_v51, %v1185_v49  ;;  %v1196_v6 = vld [vmem:[#allocation11 + $0x1b0] sm:$0xff]  ;;  %v1203_v9 = vld [vmem:[#allocation11 + $0x1e8] sm:$0xff]  ;;  %v1205_v12 = vld [vmem:[#allocation11 + $0x1f8] sm:$0xff] }
 0x2b1   :  { %3740 = vmatprep.subr.bf16.mxu1 %v3739_v55  ;;  %3762 = vmatpush1.bf16.msra.mxu0 %v3761_v43  ;;  %v3765_v55 = vpack.c.bf16 %v1186_v53, %v1182_v52  ;;  %v4025_v7 = vpack.c.bf16 %v1196_v6, %v1192_v5  ;;  %v3771_v11 = vpack.c.bf16 %v1203_v9, %v1199_v8  ;;  %v1198_v13 = vld [vmem:[#allocation11 + $0x1c0] sm:$0xff]  ;;  %v1200_v17 = vld [vmem:[#allocation11 + $0x1d0] sm:$0xff]  ;;  %v1213_v24 = vld [vmem:[#allocation11 + $0x238] sm:$0xff] }
 0x2b2   :  { %3764 = vmatprep.subr.bf16.mxu0 %v3763_v50  ;;  %v1202_v14 = vld [vmem:[#allocation11 + $0x1e0] sm:$0xff]  ;;  %v1208_v29 = vld [vmem:[#allocation11 + $0x210] sm:$0xff]  ;;  %v1215_v32 = vld [vmem:[#allocation11 + $0x248] sm:$0xff] }
 0x2b3   :  { %v3773_v16 = vpack.c.bf16 %v1202_v14, %v1198_v13  ;;  %v1206_v25 = vld [vmem:[#allocation11 + $0x200] sm:$0xff]  ;;  %v1219_v33 = vld [vmem:[#allocation11 + $0x268] sm:$0xff]  ;;  %v1221_v36 = vld [vmem:[#allocation11 + $0x278] sm:$0xff] }
 0x2b4   :  { %3742 = vmatpush1.bf16.msra.mxu1 %v3741_v60  ;;  %v1195_v60 = vld [vmem:[#allocation11 + $0x1a8] sm:$0xff]  ;;  %v1210_v26 = vld [vmem:[#allocation11 + $0x220] sm:$0xff]  ;;  %v3779_v35 = vpack.c.bf16 %v1219_v33, %v1215_v32  ;;  %v1216_v41 = vld [vmem:[#allocation11 + $0x250] sm:$0xff] }
 0x2b5   :  { %4000 = vmatprep.subr.bf16.mxu1 %v3999_v61  ;;  %3766 = vmatpush1.bf16.msra.mxu0 %v3765_v55  ;;  %v1193_v61 = vld [vmem:[#allocation11 + $0x198] sm:$0xff]  ;;  %v3767_v62 = vpack.c.bf16 %v1195_v60, %v1191_v59  ;;  %v3777_v28 = vpack.c.bf16 %v1210_v26, %v1206_v25  ;;  %v1214_v37 = vld [vmem:[#allocation11 + $0x240] sm:$0xff]  ;;  %v1223_v44 = vld [vmem:[#allocation11 + $0x288] sm:$0xff] }
 0x2b6   :  { %v1218_v38 = vld [vmem:[#allocation11 + $0x260] sm:$0xff]  ;;  %v1227_v45 = vld [vmem:[#allocation11 + $0x2a8] sm:$0xff]  ;;  %v1229_v48 = vld [vmem:[#allocation11 + $0x2b8] sm:$0xff] }
 0x2b7   :  { %3542 = vmatmul.mubr.msk.f32.vlgmr.msra.gmra.mrb[6].mxu1 %vm578_vm0, %v5697_v20  ;;  %v1160_v20 = vld [vmem:[#allocation11 + $0x90] sm:$0xff]  ;;  %3768 = vmatprep.subr.bf16.mxu0 %v3767_v62  ;;  %v3781_v40 = vpack.c.bf16 %v1218_v38, %v1214_v37  ;;  %v3783_v47 = vpack.c.bf16 %v1227_v45, %v1223_v44  ;;  %v1222_v49 = vld [vmem:[#allocation11 + $0x280] sm:$0xff]  ;;  %v1231_v56 = vld [vmem:[#allocation11 + $0x2c8] sm:$0xff] }
 0x2b8   :  { %4002 = vmatpush1.bf16.msra.mxu1 %v4001_v3  ;;  %v4009_v22 = vpack.c.bf16 %v1164_v21, %v1160_v20  ;;  %v4023_v3 = vpack.c.bf16 %v1197_v63, %v1193_v61  ;;  %v1207_v20 = vld [vmem:[#allocation11 + $0x208] sm:$0xff]  ;;  %v1226_v50 = vld [vmem:[#allocation11 + $0x2a0] sm:$0xff]  ;;  %v1224_v53 = vld [vmem:[#allocation11 + $0x290] sm:$0xff] }
 0x2b9   :  { %4004 = vmatprep.subr.bf16.mxu1 %v4003_v4  ;;  %v3769_v4 = vpack.c.bf16 %v1194_v2, %v1190_v1  ;;  %v1211_v21 = vld [vmem:[#allocation11 + $0x228] sm:$0xff]  ;;  %v3785_v52 = vpack.c.bf16 %v1226_v50, %v1222_v49  ;;  %v1237_v60 = vld [vmem:[#allocation11 + $0x2f8] sm:$0xff]  ;;  %v1230_v61 = vld [vmem:[#allocation11 + $0x2c0] sm:$0xff] }
 0x2ba   :  { %v3775_v23 = vpack.c.bf16 %v1211_v21, %v1207_v20  ;;  %v1235_v57 = vld [vmem:[#allocation11 + $0x2e8] sm:$0xff]  ;;  %v1234_v62 = vld [vmem:[#allocation11 + $0x2e0] sm:$0xff]  ;;  %v1232_v2 = vld [vmem:[#allocation11 + $0x2d0] sm:$0xff] }
 0x2bb   :  { %3770 = vmatpush1.bf16.msra.mxu0 %v3769_v4  ;;  %v3787_v59 = vpack.c.bf16 %v1235_v57, %v1231_v56  ;;  %v3789_v1 = vpack.c.bf16 %v1234_v62, %v1230_v61  ;;  %v1239_v5 = vld [vmem:[#allocation11 + $0x308] sm:$0xff]  ;;  %v1245_v9 = vld [vmem:[#allocation11 + $0x338] sm:$0xff]  ;;  %v1240_v14 = vld [vmem:[#allocation11 + $0x310] sm:$0xff] }
 0x2bc   :  { %4006 = vmatpush1.bf16.msra.mxu1 %v4005_v10  ;;  %v1201_v10 = vld [vmem:[#allocation11 + $0x1d8] sm:$0xff]  ;;  %3772 = vmatprep.subr.bf16.mxu0 %v3771_v11  ;;  %v1243_v6 = vld [vmem:[#allocation11 + $0x328] sm:$0xff]  ;;  %v1242_v11 = vld [vmem:[#allocation11 + $0x320] sm:$0xff] }
 0x2bd   :  { %4008 = vmatprep.subr.bf16.mxu1 %v4007_v18  ;;  %v4027_v15 = vpack.c.bf16 %v1205_v12, %v1201_v10  ;;  %v1204_v18 = vld [vmem:[#allocation11 + $0x1f0] sm:$0xff]  ;;  %v3791_v8 = vpack.c.bf16 %v1243_v6, %v1239_v5  ;;  %v1238_v10 = vld [vmem:[#allocation11 + $0x300] sm:$0xff]  ;;  %v1253_v21 = vld [vmem:[#allocation11 + $0x378] sm:$0xff] }
 0x2be   :  { %v4029_v19 = vpack.c.bf16 %v1204_v18, %v1200_v17  ;;  %v3793_v13 = vpack.c.bf16 %v1242_v11, %v1238_v10  ;;  %v1247_v17 = vld [vmem:[#allocation11 + $0x348] sm:$0xff]  ;;  %v1248_v26 = vld [vmem:[#allocation11 + $0x350] sm:$0xff]  ;;  %v1261_v33 = vld [vmem:[#allocation11 + $0x3b8] sm:$0xff] }
 0x2bf   :  { %3774 = vmatpush1.bf16.msra.mxu0 %v3773_v16  ;;  %v1251_v18 = vld [vmem:[#allocation11 + $0x368] sm:$0xff]  ;;  %v1256_v37 = vld [vmem:[#allocation11 + $0x390] sm:$0xff]  ;;  %v1269_v45 = vld [vmem:[#allocation11 + $0x3f8] sm:$0xff] }
 0x2c0   :  { %4010 = vmatpush1.bf16.msra.mxu1 %v4009_v22  ;;  %v1209_v22 = vld [vmem:[#allocation11 + $0x218] sm:$0xff]  ;;  %3776 = vmatprep.subr.bf16.mxu0 %v3775_v23  ;;  %v3795_v20 = vpack.c.bf16 %v1251_v18, %v1247_v17  ;;  %v1250_v23 = vld [vmem:[#allocation11 + $0x360] sm:$0xff]  ;;  %v1260_v38 = vld [vmem:[#allocation11 + $0x3b0] sm:$0xff] }
 0x2c1   :  { %4012 = vmatprep.subr.bf16.mxu1 %v4011_v30  ;;  %v4031_v27 = vpack.c.bf16 %v1213_v24, %v1209_v22  ;;  %v1212_v30 = vld [vmem:[#allocation11 + $0x230] sm:$0xff]  ;;  %v1246_v22 = vld [vmem:[#allocation11 + $0x340] sm:$0xff]  ;;  %v1277_v57 = vld [vmem:[#allocation11 + $0x438] sm:$0xff] }
 0x2c2   :  { %v4033_v31 = vpack.c.bf16 %v1212_v30, %v1208_v29  ;;  %v3797_v25 = vpack.c.bf16 %v1250_v23, %v1246_v22  ;;  %v1255_v29 = vld [vmem:[#allocation11 + $0x388] sm:$0xff]  ;;  %v1264_v50 = vld [vmem:[#allocation11 + $0x3d0] sm:$0xff] }
 0x2c3   :  { %3778 = vmatpush1.bf16.msra.mxu0 %v3777_v28  ;;  %v1259_v30 = vld [vmem:[#allocation11 + $0x3a8] sm:$0xff] }
 0x2c4   :  { %4014 = vmatpush1.bf16.msra.mxu1 %v4013_v34  ;;  %v1217_v34 = vld [vmem:[#allocation11 + $0x258] sm:$0xff]  ;;  %3780 = vmatprep.subr.bf16.mxu0 %v3779_v35  ;;  %v3799_v32 = vpack.c.bf16 %v1259_v30, %v1255_v29  ;;  %v5715_v62 = vld [vmem:[#allocation7] sm:$0xff] }
 0x2c5   :  { %4016 = vmatprep.subr.bf16.mxu1 %v4015_v42  ;;  %v4035_v39 = vpack.c.bf16 %v1221_v36, %v1217_v34  ;;  %v1220_v42 = vld [vmem:[#allocation11 + $0x270] sm:$0xff]  ;;  %v1254_v34 = vld [vmem:[#allocation11 + $0x380] sm:$0xff] }
 0x2c6   :  { %v4037_v43 = vpack.c.bf16 %v1220_v42, %v1216_v41  ;;  %v1258_v36 = vld [vmem:[#allocation11 + $0x3a0] sm:$0xff]  ;;  %v1263_v41 = vld [vmem:[#allocation11 + $0x3c8] sm:$0xff] }
 0x2c7   :  { %3782 = vmatpush1.bf16.msra.mxu0 %v3781_v40  ;;  %v4057_v40 = vpack.c.bf16 %v1260_v38, %v1256_v37  ;;  %v1267_v42 = vld [vmem:[#allocation11 + $0x3e8] sm:$0xff] }
 0x2c8   :  { %4018 = vmatpush1.bf16.msra.mxu1 %v4017_v46  ;;  %v1225_v46 = vld [vmem:[#allocation11 + $0x298] sm:$0xff]  ;;  %3784 = vmatprep.subr.bf16.mxu0 %v3783_v47  ;;  %v3803_v44 = vpack.c.bf16 %v1267_v42, %v1263_v41  ;;  %v1266_v47 = vld [vmem:[#allocation11 + $0x3e0] sm:$0xff] }
 0x2c9   :  { %4020 = vmatprep.subr.bf16.mxu1 %v4019_v54  ;;  %v4039_v51 = vpack.c.bf16 %v1229_v48, %v1225_v46  ;;  %v1228_v54 = vld [vmem:[#allocation11 + $0x2b0] sm:$0xff]  ;;  %v1262_v46 = vld [vmem:[#allocation11 + $0x3c0] sm:$0xff] }
 0x2ca   :  { %v4041_v55 = vpack.c.bf16 %v1228_v54, %v1224_v53  ;;  %v3805_v49 = vpack.c.bf16 %v1266_v47, %v1262_v46  ;;  %v1271_v53 = vld [vmem:[#allocation11 + $0x408] sm:$0xff] }
 0x2cb   :  { %3786 = vmatpush1.bf16.msra.mxu0 %v3785_v52  ;;  %v1275_v54 = vld [vmem:[#allocation11 + $0x428] sm:$0xff] }
 0x2cc   :  { %4022 = vmatpush1.bf16.msra.mxu1 %v4021_v58  ;;  %v1233_v58 = vld [vmem:[#allocation11 + $0x2d8] sm:$0xff]  ;;  %3788 = vmatprep.subr.bf16.mxu0 %v3787_v59  ;;  %v3807_v56 = vpack.c.bf16 %v1275_v54, %v1271_v53  ;;  %v538_v59 = vlaneseq }
 0x2cd   :  { %4024 = vmatprep.subr.bf16.mxu1 %v4023_v3  ;;  %v4043_v63 = vpack.c.bf16 %v1237_v60, %v1233_v58  ;;  %v1236_v3 = vld [vmem:[#allocation11 + $0x2f0] sm:$0xff] }
 0x2ce   :  { %v4045_v4 = vpack.c.bf16 %v1236_v3, %v1232_v2  ;;  %v5710_v60 = vshrl.u32 %v538_v59, 7 }
 0x2cf   :  { %3790 = vmatpush1.bf16.msra.mxu0 %v3789_v1 }
 0x2d0   :  { %4026 = vmatpush1.bf16.msra.mxu1 %v4025_v7  ;;  %v1241_v7 = vld [vmem:[#allocation11 + $0x318] sm:$0xff]  ;;  %3792 = vmatprep.subr.bf16.mxu0 %v3791_v8  ;;  %v5713_v61 = vsub.s32 0, %v5710_v60  ;;  %v5732_v22 = vsub.s32 2, %v5710_v60 }
 0x2d1   :  { %4028 = vmatprep.subr.bf16.mxu1 %v4027_v15  ;;  %v4047_v12 = vpack.c.bf16 %v1245_v9, %v1241_v7  ;;  %v1244_v15 = vld [vmem:[#allocation11 + $0x330] sm:$0xff]  ;;  %v5725_v7 = vsub.s32 3, %v5710_v60 }
 0x2d2   :  { %v4049_v16 = vpack.c.bf16 %v1244_v15, %v1240_v14  ;;  %v541_v1 = vrot.slane %v5715_v62, %v5713_v61  ;;  %v549_v30 = vrot.slane %v5715_v62, %v5732_v22 }
 0x2d3   :  { %3794 = vmatpush1.bf16.msra.mxu0 %v3793_v13  ;;  %v553_v13 = vrot.slane %v5715_v62, %v5725_v7 }
 0x2d4   :  { %4030 = vmatpush1.bf16.msra.mxu1 %v4029_v19  ;;  %v1249_v19 = vld [vmem:[#allocation11 + $0x358] sm:$0xff]  ;;  %3796 = vmatprep.subr.bf16.mxu0 %v3795_v20 }
 0x2d5   :  { %4032 = vmatprep.subr.bf16.mxu1 %v4031_v27  ;;  %v4051_v24 = vpack.c.bf16 %v1253_v21, %v1249_v19  ;;  %v1252_v27 = vld [vmem:[#allocation11 + $0x370] sm:$0xff] }
 0x2d6   :  { %v4053_v28 = vpack.c.bf16 %v1252_v27, %v1248_v26 }
 0x2d7   :  { %3798 = vmatpush1.bf16.msra.mxu0 %v3797_v25  ;;  %v5736_v25 = vsub.s32 5, %v5710_v60 }
 0x2d8   :  { %4034 = vmatpush1.bf16.msra.mxu1 %v4033_v31  ;;  %v1257_v31 = vld [vmem:[#allocation11 + $0x398] sm:$0xff]  ;;  %3800 = vmatprep.subr.bf16.mxu0 %v3799_v32 }
 0x2d9   :  { %4036 = vmatprep.subr.bf16.mxu1 %v4035_v39  ;;  %v4055_v35 = vpack.c.bf16 %v1261_v33, %v1257_v31  ;;  %v3801_v39 = vpack.c.bf16 %v1258_v36, %v1254_v34  ;;  %v561_v34 = vrot.slane %v5715_v62, %v5736_v25 }
 0x2db   :  { %3802 = vmatpush1.bf16.msra.mxu0 %v3801_v39 }
 0x2dc   :  { %4038 = vmatpush1.bf16.msra.mxu1 %v4037_v43  ;;  %v1265_v43 = vld [vmem:[#allocation11 + $0x3d8] sm:$0xff]  ;;  %3804 = vmatprep.subr.bf16.mxu0 %v3803_v44 }
 0x2dd   :  { %4040 = vmatprep.subr.bf16.mxu1 %v4039_v51  ;;  %v4059_v48 = vpack.c.bf16 %v1269_v45, %v1265_v43  ;;  %v1268_v51 = vld [vmem:[#allocation11 + $0x3f0] sm:$0xff] }
 0x2de   :  { %v4061_v52 = vpack.c.bf16 %v1268_v51, %v1264_v50 }
 0x2df   :  { %3806 = vmatpush1.bf16.msra.mxu0 %v3805_v49 }
 0x2e0   :  { %4042 = vmatpush1.bf16.msra.mxu1 %v4041_v55  ;;  %v1273_v55 = vld [vmem:[#allocation11 + $0x418] sm:$0xff]  ;;  %3808 = vmatprep.subr.bf16.mxu0 %v3807_v56 }
 0x2e1   :  { %4044 = vmatprep.subr.bf16.mxu1 %v4043_v63  ;;  %v4063_v58 = vpack.c.bf16 %v1277_v57, %v1273_v55  ;;  %v5718_v63 = vsub.s32 1, %v5710_v60 }
 0x2e3   :  { %v545_v2 = vrot.slane %v5715_v62, %v5718_v63 }
 0x2e4   :  { %4046 = vmatpush1.bf16.msra.mxu1 %v4045_v4 }
 0x2e5   :  { %4048 = vmatprep.subr.bf16.mxu1 %v4047_v12 }
 0x2e8   :  { %4050 = vmatpush1.bf16.msra.mxu1 %v4049_v16 }
 0x2e9   :  { %4052 = vmatprep.subr.bf16.mxu1 %v4051_v24 }
 0x2ec   :  { %4054 = vmatpush1.bf16.msra.mxu1 %v4053_v28 }
 0x2ed   :  { %4056 = vmatprep.subr.bf16.mxu1 %v4055_v35 }
 0x2f0   :  { %4058 = vmatpush1.bf16.msra.mxu1 %v4057_v40 }
 0x2f1   :  { %4060 = vmatprep.subr.bf16.mxu1 %v4059_v48 }
 0x2f4   :  { %4062 = vmatpush1.bf16.msra.mxu1 %v4061_v52 }
 0x2f5   :  { %4064 = vmatprep.subr.bf16.mxu1 %v4063_v58 }
 0x372   :  { %v648_v3 = vpop.f32.mrb[0].mxu1 }
 0x373   :  { %v649_v4 = vadd.f32 %v648_v3, %v541_v1  ;;  %v650_v5 = vpop.f32.mrb[1].mxu1 }
 0x374   :  { %v651_v6 = vadd.f32 %v650_v5, %v545_v2 }
 0x375   :  { %v867_v8 = vsel %vm866_vm1, %v649_v4, 0.0 }
 0x376   :  { %v868_v9 = vrot.slane %v867_v8, 4  ;;  %v874_v10 = vsel %vm866_vm1, %v651_v6, 0.0 }
 0x377   :  { %v875_v11 = vrot.slane %v874_v10, 4 }
 0x378   :  { %v869_v12 = vadd.f32 %v868_v9, %v867_v8 }
 0x379   :  { %v876_v14 = vadd.f32 %v875_v11, %v874_v10 }
 0x37a   :  { %v870_v15 = vrot.slane %v869_v12, 2  ;;  %v719_v16 = vpop.f32.mrb[2].mxu1 }
 0x37b   :  { %v877_v17 = vrot.slane %v876_v14, 2  ;;  %v721_v18 = vpop.f32.mrb[3].mxu1  ;;  %v5748_v40 = vadd.f32 %v719_v16, %v549_v30 }
 0x37c   :  { %v871_v19 = vadd.f32 %v870_v15, %v869_v12  ;;  %v722_v20 = vadd.f32 %v721_v18, %v553_v13 }
 0x37d   :  { %v878_v21 = vadd.f32 %v877_v17, %v876_v14  ;;  %v881_v49 = vsel %vm866_vm1, %v5748_v40, 0.0 }
 0x37e   :  { %v872_v23 = vrot.slane %v871_v19, 1  ;;  %v888_v24 = vsel %vm866_vm1, %v722_v20, 0.0  ;;  %v882_v58 = vrot.slane %v881_v49, 4 }
 0x37f   :  { %v879_v26 = vrot.slane %v878_v21, 1  ;;  %v889_v27 = vrot.slane %v888_v24, 4 }
 0x380   :  { %v873_v28 = vadd.f32 %v872_v23, %v871_v19  ;;  %v883_v8 = vadd.f32 %v882_v58, %v881_v49  ;;  %v1270_v58 = vld [vmem:[#allocation11 + $0x400] sm:$0xff] }
 0x381   :  { %v880_v29 = vadd.f32 %v879_v26, %v878_v21  ;;  %v890_v31 = vadd.f32 %v889_v27, %v888_v24 }
 0x382   :  { %v924_v32 = vmul.f32 0.25, %v873_v28  ;;  %v5740_v33 = vpop.f32.mrb[4].mxu1  ;;  %v884_v16 = vrot.slane %v883_v8, 2 }
 0x383   :  { %v925_v35 = vmul.f32 0.25, %v880_v29  ;;  %v891_v36 = vrot.slane %v890_v31, 2  ;;  %v792_v37 = vpop.f32.mrb[5].mxu1 }
 0x384   :  { %v5744_v38 = vsub.f32 %v649_v4, %v924_v32  ;;  %v5752_v43 = vadd.f32 %v792_v37, %v561_v34  ;;  %v885_v26 = vadd.f32 %v884_v16, %v883_v8  ;;  %v1283_v8 = vld [vmem:[#allocation11 + $0x468] sm:$0xff] }
 0x385   :  { %v5746_v39 = vsub.f32 %v651_v6, %v925_v35  ;;  %v892_v41 = vadd.f32 %v891_v36, %v890_v31  ;;  %v5771_v35 = vld [vmem:[#allocation8] sm:$0xff] }
 0x386   :  { %v940_v42 = vmul.f32 %v5744_v38, %v5744_v38  ;;  %v902_v52 = vsel %vm866_vm1, %v5752_v43, 0.0  ;;  %v886_v30 = vrot.slane %v885_v26, 1 }
 0x387   :  { %v941_v44 = vmul.f32 %v5746_v39, %v5746_v39  ;;  %v893_v45 = vrot.slane %v892_v41, 1  ;;  %v903_v2 = vrot.slane %v902_v52, 4 }
 0x388   :  { %v948_v46 = vsel %vm866_vm1, %v940_v42, 0.0  ;;  %v887_v36 = vadd.f32 %v886_v30, %v885_v26  ;;  %v1291_v26 = vld [vmem:[#allocation11 + $0x4a8] sm:$0xff] }
 0x389   :  { %v949_v47 = vrot.slane %v948_v46, 4  ;;  %v955_v48 = vsel %vm866_vm1, %v941_v44, 0.0  ;;  %v894_v50 = vadd.f32 %v893_v45, %v892_v41  ;;  %v904_v11 = vadd.f32 %v903_v2, %v902_v52  ;;  %v5773_v41 = vld [vmem:[#allocation10] sm:$0xff] }
 0x38a   :  { %v956_v51 = vrot.slane %v955_v48, 4  ;;  %v5762_v53 = vpop.f32.mrb[6].mxu1  ;;  %v1040_v44 = vrot.slane %v5771_v35, %v5713_v61  ;;  %v926_v49 = vmul.f32 0.25, %v887_v36  ;;  %v1093_v52 = vrot.slane %v5773_v41, %v5718_v63  ;;  %v1290_v36 = vld [vmem:[#allocation11 + $0x4a0] sm:$0xff] }
 0x38b   :  { %v950_v54 = vadd.f32 %v949_v47, %v948_v46  ;;  %v927_v55 = vmul.f32 0.25, %v894_v50  ;;  %v5764_v56 = vpop.f32.mrb[7].mxu1  ;;  %v905_v19 = vrot.slane %v904_v11, 2  ;;  %v1044_v46 = vrot.slane %v5771_v35, %v5718_v63 }
 0x38c   :  { %v957_v57 = vadd.f32 %v956_v51, %v955_v48  ;;  %v1089_v50 = vrot.slane %v5773_v41, %v5713_v61  ;;  %v5786_v2 = vsub.f32 %v5748_v40, %v926_v49  ;;  %v1052_v40 = vrot.slane %v5771_v35, %v5725_v7  ;;  %v1297_v49 = vld [vmem:[#allocation11 + $0x4d8] sm:$0xff] }
 0x38d   :  { %v951_v59 = vrot.slane %v950_v54, 2  ;;  %v5766_v1 = vsub.f32 %v722_v20, %v927_v55  ;;  %v906_v28 = vadd.f32 %v905_v19, %v904_v11 }
 0x38e   :  { %v958_v3 = vrot.slane %v957_v57, 2 }
 0x38f   :  { %v952_v4 = vadd.f32 %v951_v59, %v950_v54  ;;  %v943_v5 = vmul.f32 %v5766_v1, %v5766_v1  ;;  %v907_v32 = vrot.slane %v906_v28, 1  ;;  %v1274_v59 = vld [vmem:[#allocation11 + $0x420] sm:$0xff] }
 0x390   :  { %v959_v6 = vadd.f32 %v958_v3, %v957_v57 }
 0x391   :  { %v953_v9 = vrot.slane %v952_v4, 1  ;;  %v969_v10 = vsel %vm866_vm1, %v943_v5, 0.0  ;;  %v908_v42 = vadd.f32 %v907_v32, %v906_v28  ;;  %v1279_v5 = vld [vmem:[#allocation11 + $0x448] sm:$0xff]  ;;  %v1293_v28 = vld [vmem:[#allocation11 + $0x4b8] sm:$0xff] }
 0x392   :  { %v960_v12 = vrot.slane %v959_v6, 1  ;;  %v970_v13 = vrot.slane %v969_v10, 4  ;;  %v3811_v19 = vpack.c.bf16 %v1283_v8, %v1279_v5  ;;  %v1296_v5 = vld [vmem:[#allocation11 + $0x4d0] sm:$0xff]  ;;  %v1303_v8 = vld [vmem:[#allocation11 + $0x508] sm:$0xff] }
 0x393   :  { %v954_v14 = vadd.f32 %v953_v9, %v952_v4  ;;  %v929_v54 = vmul.f32 0.25, %v908_v42  ;;  %v1272_v4 = vld [vmem:[#allocation11 + $0x410] sm:$0xff]  ;;  %v1281_v9 = vld [vmem:[#allocation11 + $0x458] sm:$0xff] }
 0x394   :  { %v961_v15 = vadd.f32 %v960_v12, %v959_v6  ;;  %v971_v17 = vadd.f32 %v970_v13, %v969_v10  ;;  %v1285_v10 = vld [vmem:[#allocation11 + $0x478] sm:$0xff]  ;;  %v3809_v12 = vpack.c.bf16 %v1274_v59, %v1270_v58  ;;  %v1294_v58 = vld [vmem:[#allocation11 + $0x4c0] sm:$0xff] }
 0x395   :  { %v1004_v18 = vmul.f32 0.25, %v954_v14  ;;  %v1278_v14 = vld [vmem:[#allocation11 + $0x440] sm:$0xff] }
 0x396   :  { %v1005_v20 = vmul.f32 0.25, %v961_v15  ;;  %v972_v21 = vrot.slane %v971_v17, 2  ;;  %v1282_v15 = vld [vmem:[#allocation11 + $0x460] sm:$0xff] }
 0x397   :  { %v1012_v23 = vadd.f32 1e-05, %v1004_v18  ;;  %v1298_v59 = vld [vmem:[#allocation11 + $0x4e0] sm:$0xff] }
 0x398   :  { %v1013_v24 = vadd.f32 1e-05, %v1005_v20  ;;  %v973_v27 = vadd.f32 %v972_v21, %v971_v17  ;;  %v942_v17 = vmul.f32 %v5786_v2, %v5786_v2  ;;  %v4067_v20 = vpack.c.bf16 %v1285_v10, %v1281_v9  ;;  %v1280_v21 = vld [vmem:[#allocation11 + $0x450] sm:$0xff]  ;;  %v1307_v10 = vld [vmem:[#allocation11 + $0x528] sm:$0xff] }
 0x399   :  { %4557 = vrsqrt.f32 %v1012_v23  ;;  %v1284_v23 = vld [vmem:[#allocation11 + $0x470] sm:$0xff] }
 0x39a   :  { %4559 = vrsqrt.f32 %v1013_v24  ;;  %v974_v29 = vrot.slane %v973_v27, 1  ;;  %v1287_v24 = vld [vmem:[#allocation11 + $0x488] sm:$0xff]  ;;  %v4069_v32 = vpack.c.bf16 %v1284_v23, %v1280_v21 }
 0x39b   :  { %v3815_v42 = vpack.c.bf16 %v1291_v26, %v1287_v24  ;;  %v1311_v21 = vld [vmem:[#allocation11 + $0x548] sm:$0xff]  ;;  %v1317_v26 = vld [vmem:[#allocation11 + $0x578] sm:$0xff] }
 0x39c   :  { %v975_v31 = vadd.f32 %v974_v29, %v973_v27  ;;  %v1289_v27 = vld [vmem:[#allocation11 + $0x498] sm:$0xff]  ;;  %v1101_v29 = vrot.slane %v5773_v41, %v5725_v7  ;;  %v1315_v24 = vld [vmem:[#allocation11 + $0x568] sm:$0xff] }
 0x39e   :  { %v1007_v34 = vmul.f32 0.25, %v975_v31  ;;  %v3813_v31 = vpack.c.bf16 %v1282_v15, %v1278_v14  ;;  %v3821_v14 = vpack.c.bf16 %v1298_v59, %v1294_v58  ;;  %v1320_v59 = vld [vmem:[#allocation11 + $0x590] sm:$0xff] }
 0x3a0   :  { %v1015_v37 = vadd.f32 1e-05, %v1007_v34  ;;  %v1286_v34 = vld [vmem:[#allocation11 + $0x480] sm:$0xff] }
 0x3a2   :  { %4561 = vrsqrt.f32 %v1015_v37  ;;  %v962_v37 = vsel %vm866_vm1, %v942_v17, 0.0  ;;  %v3823_v17 = vpack.c.bf16 %v1307_v10, %v1303_v8  ;;  %v1333_v8 = vld [vmem:[#allocation11 + $0x5f8] sm:$0xff] }
 0x3a3   :  { %v4558_v45 = vpop.eup %4557 }
 0x3a4   :  { %v4560_v47 = vpop.eup %4559  ;;  %v1028_v48 = vmul.f32 %v4558_v45, %v5744_v38  ;;  %v1276_v38 = vld [vmem:[#allocation11 + $0x430] sm:$0xff] }
 0x3a5   :  { %v1029_v51 = vmul.f32 %v4560_v47, %v5746_v39  ;;  %v5789_v39 = vsub.f32 %v5752_v43, %v929_v54  ;;  %v4065_v13 = vpack.c.bf16 %v1276_v38, %v1272_v4  ;;  %v1288_v45 = vld [vmem:[#allocation11 + $0x490] sm:$0xff]  ;;  %v1295_v47 = vld [vmem:[#allocation11 + $0x4c8] sm:$0xff]  ;;  %v963_v54 = vrot.slane %v962_v37, 4 }
 0x3a6   :  { %v1077_v55 = vmul.f32 %v1040_v44, %v1028_v48  ;;  %v4071_v44 = vpack.c.bf16 %v1293_v28, %v1289_v27  ;;  %v1299_v48 = vld [vmem:[#allocation11 + $0x4e8] sm:$0xff] }
 0x3a7   :  { %v1078_v57 = vmul.f32 %v1044_v46, %v1029_v51  ;;  %v945_v30 = vmul.f32 %v5789_v39, %v5789_v39  ;;  %v1292_v46 = vld [vmem:[#allocation11 + $0x4b0] sm:$0xff]  ;;  %v3819_v4 = vpack.c.bf16 %v1299_v48, %v1295_v47  ;;  %v1325_v47 = vld [vmem:[#allocation11 + $0x5b8] sm:$0xff]  ;;  %v5806_v48 = vsub.s32 7, %v5710_v60 }
 0x3a8   :  { %v1126_v3 = vadd.f32 %v1089_v50, %v1077_v55  ;;  %v1301_v50 = vld [vmem:[#allocation11 + $0x4f8] sm:$0xff]  ;;  %v3817_v55 = vpack.c.bf16 %v1290_v36, %v1286_v34  ;;  %v1312_v36 = vld [vmem:[#allocation11 + $0x550] sm:$0xff] }
 0x3a9   :  { %v1127_v6 = vadd.f32 %v1093_v52, %v1078_v57  ;;  %v983_v52 = vsel %vm866_vm1, %v945_v30, 0.0  ;;  %v4073_v57 = vpack.c.bf16 %v1292_v46, %v1288_v45  ;;  %v4075_v38 = vpack.c.bf16 %v1301_v50, %v1297_v49  ;;  %v1310_v30 = vld [vmem:[#allocation11 + $0x540] sm:$0xff]  ;;  %v1323_v45 = vld [vmem:[#allocation11 + $0x5a8] sm:$0xff]  ;;  %v1321_v46 = vld [vmem:[#allocation11 + $0x598] sm:$0xff] }
 0x3aa   :  { %v1134_v18 = vmax.f32 %v1126_v3, 0.0  ;;  %v984_v9 = vrot.slane %v983_v52, 4  ;;  %v4087_v58 = vpack.c.bf16 %v1325_v47, %v1321_v46 }
 0x3ab   :  { %v1135_v11 = vmax.f32 %v1127_v6, 0.0  ;;  %v1300_v6 = vld [vmem:[#allocation11 + $0x4f0] sm:$0xff] }
 0x3ac   :  { %v4562_v16 = vpop.eup %4561  ;;  %v4077_v15 = vpack.c.bf16 %v1300_v6, %v1296_v5  ;;  %v985_v23 = vadd.f32 %v984_v9, %v983_v52  ;;  %v1318_v52 = vld [vmem:[#allocation11 + $0x580] sm:$0xff]  ;;  %v1331_v5 = vld [vmem:[#allocation11 + $0x5e8] sm:$0xff]  ;;  %v1329_v6 = vld [vmem:[#allocation11 + $0x5d8] sm:$0xff]  ;;  %v569_v9 = vrot.slane %v5715_v62, %v5806_v48 }
 0x3ad   :  { %v1031_v43 = vmul.f32 %v4562_v16, %v5766_v1  ;;  %1742 = vmatprep.mubr.f32.mxu0 %v1135_v11  ;;  %2026 = vmatprep.mubr.f32.mxu1 %v1135_v11  ;;  %v1305_v11 = vld [vmem:[#allocation11 + $0x518] sm:$0xff]  ;;  %v1306_v16 = vld [vmem:[#allocation11 + $0x520] sm:$0xff] }
 0x3ae   :  { %1743 = vmatmul.mubr.f32.vlgmr.msra.gmra.mrb[0].mxu0 %v1134_v18  ;;  %2027 = vmatmul.mubr.f32.vlgmr.msra.gmra.mrb[8].mxu1 %v1134_v18 }
 0x3af   :  { %3810 = vmatpush1.bf16.msra.mxu0 %v3809_v12  ;;  %4066 = vmatpush1.bf16.msra.mxu1 %v4065_v13  ;;  %v1080_v1 = vmul.f32 %v1052_v40, %v1031_v43  ;;  %v1309_v12 = vld [vmem:[#allocation11 + $0x538] sm:$0xff]  ;;  %v964_v13 = vadd.f32 %v963_v54, %v962_v37  ;;  %v1302_v40 = vld [vmem:[#allocation11 + $0x500] sm:$0xff]  ;;  %v986_v37 = vrot.slane %v985_v23, 2 }
 0x3b0   :  { %3812 = vmatprep.subr.bf16.mxu0 %v3811_v19  ;;  %4068 = vmatprep.subr.bf16.mxu1 %v4067_v20  ;;  %v4079_v18 = vpack.c.bf16 %v1309_v12, %v1305_v11  ;;  %v1304_v19 = vld [vmem:[#allocation11 + $0x510] sm:$0xff]  ;;  %v1313_v43 = vld [vmem:[#allocation11 + $0x558] sm:$0xff]  ;;  %v3825_v28 = vpack.c.bf16 %v1306_v16, %v1302_v40  ;;  %v1322_v54 = vld [vmem:[#allocation11 + $0x5a0] sm:$0xff]  ;;  %v4091_v16 = vpack.c.bf16 %v1333_v8, %v1329_v6 }
 0x3b1   :  { %v1129_v51 = vadd.f32 %v1101_v29, %v1080_v1  ;;  %v1308_v20 = vld [vmem:[#allocation11 + $0x530] sm:$0xff]  ;;  %v965_v27 = vrot.slane %v964_v13, 2  ;;  %v4083_v34 = vpack.c.bf16 %v1317_v26, %v1313_v43  ;;  %v3833_v11 = vpack.c.bf16 %v1322_v54, %v1318_v52 }
 0x3b2   :  { %v4081_v29 = vpack.c.bf16 %v1308_v20, %v1304_v19  ;;  %v1316_v1 = vld [vmem:[#allocation11 + $0x570] sm:$0xff]  ;;  %v1335_v19 = vld [vmem:[#allocation11 + $0x608] sm:$0xff] }
 0x3b3   :  { %3814 = vmatpush1.bf16.msra.mxu0 %v3813_v31  ;;  %4070 = vmatpush1.bf16.msra.mxu1 %v4069_v32  ;;  %v1137_v3 = vmax.f32 %v1129_v51, 0.0  ;;  %v1314_v31 = vld [vmem:[#allocation11 + $0x560] sm:$0xff]  ;;  %v3827_v32 = vpack.c.bf16 %v1315_v24, %v1311_v21  ;;  %v966_v49 = vadd.f32 %v965_v27, %v964_v13  ;;  %v4085_v51 = vpack.c.bf16 %v1316_v1, %v1312_v36  ;;  %v1339_v21 = vld [vmem:[#allocation11 + $0x628] sm:$0xff] }
 0x3b4   :  { %3816 = vmatprep.subr.bf16.mxu0 %v3815_v42  ;;  %4072 = vmatprep.subr.bf16.mxu1 %v4071_v44  ;;  %v1319_v42 = vld [vmem:[#allocation11 + $0x588] sm:$0xff]  ;;  %v5803_v44 = vsub.s32 4, %v5710_v60  ;;  %v3829_v50 = vpack.c.bf16 %v1314_v31, %v1310_v30  ;;  %v1326_v13 = vld [vmem:[#allocation11 + $0x5c0] sm:$0xff]  ;;  %v5816_v24 = vadd.f32 %v5764_v56, %v569_v9  ;;  %v3839_v31 = vpack.c.bf16 %v1339_v21, %v1335_v19  ;;  %v1361_v21 = vld [vmem:[#allocation11 + $0x6d8] sm:$0xff] }
 0x3b5   :  { %1813 = vmatprep.mubr.f32.mxu0 %v1137_v3  ;;  %2097 = vmatprep.mubr.f32.mxu1 %v1137_v3  ;;  %v1324_v3 = vld [vmem:[#allocation11 + $0x5b0] sm:$0xff]  ;;  %v967_v10 = vrot.slane %v966_v49, 1  ;;  %v1343_v36 = vld [vmem:[#allocation11 + $0x648] sm:$0xff] }
 0x3b6   :  { %v4089_v12 = vpack.c.bf16 %v1324_v3, %v1320_v59  ;;  %v1347_v56 = vld [vmem:[#allocation11 + $0x668] sm:$0xff]  ;;  %v1348_v59 = vld [vmem:[#allocation11 + $0x670] sm:$0xff] }
 0x3b7   :  { %3818 = vmatpush1.bf16.msra.mxu0 %v3817_v55  ;;  %4074 = vmatpush1.bf16.msra.mxu1 %v4073_v57  ;;  %v987_v55 = vadd.f32 %v986_v37, %v985_v23  ;;  %v3831_v57 = vpack.c.bf16 %v1323_v45, %v1319_v42  ;;  %v1341_v23 = vld [vmem:[#allocation11 + $0x638] sm:$0xff]  ;;  %v968_v43 = vadd.f32 %v967_v10, %v966_v49  ;;  %v916_v45 = vsel %vm866_vm1, %v5816_v24, 0.0  ;;  %v1351_v3 = vld [vmem:[#allocation11 + $0x688] sm:$0xff] }
 0x3b8   :  { %3820 = vmatprep.subr.bf16.mxu0 %v3819_v4  ;;  %4076 = vmatprep.subr.bf16.mxu1 %v4075_v38  ;;  %v1327_v4 = vld [vmem:[#allocation11 + $0x5c8] sm:$0xff]  ;;  %v557_v38 = vrot.slane %v5715_v62, %v5803_v44  ;;  %v1337_v62 = vld [vmem:[#allocation11 + $0x618] sm:$0xff]  ;;  %v917_v6 = vrot.slane %v916_v45, 4 }
 0x3b9   :  { %v3835_v40 = vpack.c.bf16 %v1331_v5, %v1327_v4  ;;  %v1345_v37 = vld [vmem:[#allocation11 + $0x658] sm:$0xff]  ;;  %v1006_v46 = vmul.f32 0.25, %v968_v43  ;;  %v1355_v4 = vld [vmem:[#allocation11 + $0x6a8] sm:$0xff] }
 0x3ba   :  { %v5813_v20 = vadd.f32 %v5740_v33, %v557_v38  ;;  %v1336_v33 = vld [vmem:[#allocation11 + $0x610] sm:$0xff]  ;;  %v1349_v42 = vld [vmem:[#allocation11 + $0x678] sm:$0xff]  ;;  %v1363_v19 = vld [vmem:[#allocation11 + $0x6e8] sm:$0xff] }
 0x3bb   :  { %3822 = vmatpush1.bf16.msra.mxu0 %v3821_v14  ;;  %4078 = vmatpush1.bf16.msra.mxu1 %v4077_v15  ;;  %v1330_v14 = vld [vmem:[#allocation11 + $0x5e0] sm:$0xff]  ;;  %v988_v15 = vrot.slane %v987_v55, 1  ;;  %v1353_v38 = vld [vmem:[#allocation11 + $0x698] sm:$0xff]  ;;  %v1014_v8 = vadd.f32 1e-05, %v1006_v46 }
 0x3bc   :  { %3824 = vmatprep.subr.bf16.mxu0 %v3823_v17  ;;  %4080 = vmatprep.subr.bf16.mxu1 %v4079_v18  ;;  %v1328_v17 = vld [vmem:[#allocation11 + $0x5d0] sm:$0xff]  ;;  %v3837_v26 = vpack.c.bf16 %v1330_v14, %v1326_v13  ;;  %v895_v1 = vsel %vm866_vm1, %v5813_v20, 0.0  ;;  %v1357_v5 = vld [vmem:[#allocation11 + $0x6b8] sm:$0xff]  ;;  %v1366_v46 = vld [vmem:[#allocation11 + $0x700] sm:$0xff] }
 0x3bd   :  { %v1332_v18 = vld [vmem:[#allocation11 + $0x5f0] sm:$0xff]  ;;  %v989_v30 = vadd.f32 %v988_v15, %v987_v55  ;;  %v896_v52 = vrot.slane %v895_v1, 4  ;;  %v3843_v55 = vpack.c.bf16 %v1347_v56, %v1343_v36  ;;  %v3847_v15 = vpack.c.bf16 %v1355_v4, %v1351_v3  ;;  %v1371_v36 = vld [vmem:[#allocation11 + $0x728] sm:$0xff]  ;;  %v1373_v56 = vld [vmem:[#allocation11 + $0x738] sm:$0xff] }
 0x3be   :  { %v4093_v27 = vpack.c.bf16 %v1332_v18, %v1328_v17  ;;  %v1356_v17 = vld [vmem:[#allocation11 + $0x6b0] sm:$0xff]  ;;  %v1359_v18 = vld [vmem:[#allocation11 + $0x6c8] sm:$0xff]  ;;  %4563 = vrsqrt.f32 %v1014_v8 }
 0x3bf   :  { %3826 = vmatpush1.bf16.msra.mxu0 %v3825_v28  ;;  %4082 = vmatpush1.bf16.msra.mxu1 %v4081_v29  ;;  %v1334_v28 = vld [vmem:[#allocation11 + $0x600] sm:$0xff]  ;;  %v1009_v54 = vmul.f32 0.25, %v989_v30  ;;  %v897_v13 = vadd.f32 %v896_v52, %v895_v1  ;;  %v3851_v30 = vpack.c.bf16 %v1363_v19, %v1359_v18  ;;  %v1369_v1 = vld [vmem:[#allocation11 + $0x718] sm:$0xff]  ;;  %v1368_v52 = vld [vmem:[#allocation11 + $0x710] sm:$0xff]  ;;  %v1048_v19 = vrot.slane %v5771_v35, %v5732_v22 }
 0x3c0   :  { %3828 = vmatprep.subr.bf16.mxu0 %v3827_v32  ;;  %4084 = vmatprep.subr.bf16.mxu1 %v4083_v34  ;;  %v1338_v29 = vld [vmem:[#allocation11 + $0x620] sm:$0xff]  ;;  %v4095_v32 = vpack.c.bf16 %v1341_v23, %v1337_v62  ;;  %v1340_v34 = vld [vmem:[#allocation11 + $0x630] sm:$0xff]  ;;  %v1365_v62 = vld [vmem:[#allocation11 + $0x6f8] sm:$0xff]  ;;  %v918_v23 = vadd.f32 %v917_v6, %v916_v45 }
 0x3c1   :  { %v3841_v47 = vpack.c.bf16 %v1338_v29, %v1334_v28  ;;  %v4097_v49 = vpack.c.bf16 %v1340_v34, %v1336_v33  ;;  %v1017_v14 = vadd.f32 1e-05, %v1009_v54  ;;  %v1362_v28 = vld [vmem:[#allocation11 + $0x6e0] sm:$0xff]  ;;  %v898_v29 = vrot.slane %v897_v13, 2  ;;  %v1364_v33 = vld [vmem:[#allocation11 + $0x6f0] sm:$0xff]  ;;  %v1367_v34 = vld [vmem:[#allocation11 + $0x708] sm:$0xff] }
 0x3c2   :  { %v1372_v54 = vld [vmem:[#allocation11 + $0x730] sm:$0xff]  ;;  %v1378_v6 = vld [vmem:[#allocation11 + $0x760] sm:$0xff] }
 0x3c3   :  { %3830 = vmatpush1.bf16.msra.mxu0 %v3829_v50  ;;  %4086 = vmatpush1.bf16.msra.mxu1 %v4085_v51  ;;  %v1342_v50 = vld [vmem:[#allocation11 + $0x640] sm:$0xff]  ;;  %4565 = vrsqrt.f32 %v1017_v14  ;;  %v1376_v8 = vld [vmem:[#allocation11 + $0x750] sm:$0xff]  ;;  %v1387_v14 = vld [vmem:[#allocation11 + $0x7a8] sm:$0xff] }
 0x3c4   :  { %3832 = vmatprep.subr.bf16.mxu0 %v3831_v57  ;;  %4088 = vmatprep.subr.bf16.mxu1 %v4087_v58  ;;  %v1346_v51 = vld [vmem:[#allocation11 + $0x660] sm:$0xff]  ;;  %v4099_v57 = vpack.c.bf16 %v1349_v42, %v1345_v37  ;;  %v1344_v58 = vld [vmem:[#allocation11 + $0x650] sm:$0xff]  ;;  %v919_v37 = vrot.slane %v918_v23, 2 }
 0x3c5   :  { %v3845_v9 = vpack.c.bf16 %v1346_v51, %v1342_v50  ;;  %v4101_v10 = vpack.c.bf16 %v1348_v59, %v1344_v58  ;;  %v3855_v50 = vpack.c.bf16 %v1371_v36, %v1367_v34  ;;  %v4111_v51 = vpack.c.bf16 %v1373_v56, %v1369_v1  ;;  %v1377_v58 = vld [vmem:[#allocation11 + $0x758] sm:$0xff]  ;;  %v1395_v34 = vld [vmem:[#allocation11 + $0x7e8] sm:$0xff] }
 0x3c6   :  { %v1381_v59 = vld [vmem:[#allocation11 + $0x778] sm:$0xff]  ;;  %v920_v3 = vadd.f32 %v919_v37, %v918_v23  ;;  %v1060_v56 = vrot.slane %v5771_v35, %v5736_v25  ;;  %v1403_v35 = vld [vmem:[#allocation11 + $0x828] sm:$0xff] }
 0x3c7   :  { %3834 = vmatpush1.bf16.msra.mxu0 %v3833_v11  ;;  %4090 = vmatpush1.bf16.msra.mxu1 %v4089_v12  ;;  %v1350_v11 = vld [vmem:[#allocation11 + $0x680] sm:$0xff]  ;;  %v1393_v36 = vld [vmem:[#allocation11 + $0x7d8] sm:$0xff] }
 0x3c8   :  { %3836 = vmatprep.subr.bf16.mxu0 %v3835_v40  ;;  %4092 = vmatprep.subr.bf16.mxu1 %v4091_v16  ;;  %v1354_v12 = vld [vmem:[#allocation11 + $0x6a0] sm:$0xff]  ;;  %v4103_v40 = vpack.c.bf16 %v1357_v5, %v1353_v38  ;;  %v1352_v16 = vld [vmem:[#allocation11 + $0x690] sm:$0xff]  ;;  %v4113_v38 = vpack.c.bf16 %v1372_v54, %v1368_v52  ;;  %v1397_v1 = vld [vmem:[#allocation11 + $0x7f8] sm:$0xff] }
 0x3c9   :  { %v3849_v43 = vpack.c.bf16 %v1354_v12, %v1350_v11  ;;  %v1374_v5 = vld [vmem:[#allocation11 + $0x740] sm:$0xff]  ;;  %v4115_v11 = vpack.c.bf16 %v1381_v59, %v1377_v58  ;;  %v1380_v12 = vld [vmem:[#allocation11 + $0x770] sm:$0xff]  ;;  %v4123_v52 = vpack.c.bf16 %v1397_v1, %v1393_v36  ;;  %v1405_v58 = vld [vmem:[#allocation11 + $0x838] sm:$0xff] }
 0x3ca   :  { %v1396_v54 = vld [vmem:[#allocation11 + $0x7f0] sm:$0xff]  ;;  %v1414_v1 = vld [vmem:[#allocation11 + $0x880] sm:$0xff] }
 0x3cb   :  { %3838 = vmatpush1.bf16.msra.mxu0 %v3837_v26  ;;  %4094 = vmatpush1.bf16.msra.mxu1 %v4093_v27  ;;  %v4105_v26 = vpack.c.bf16 %v1356_v17, %v1352_v16  ;;  %v1358_v27 = vld [vmem:[#allocation11 + $0x6c0] sm:$0xff]  ;;  %v1389_v16 = vld [vmem:[#allocation11 + $0x7b8] sm:$0xff]  ;;  %v921_v17 = vrot.slane %v920_v3, 1 }
 0x3cc   :  { %3840 = vmatprep.subr.bf16.mxu0 %v3839_v31  ;;  %4096 = vmatprep.subr.bf16.mxu1 %v4095_v32  ;;  %v4107_v31 = vpack.c.bf16 %v1365_v62, %v1361_v21  ;;  %v1360_v32 = vld [vmem:[#allocation11 + $0x6d0] sm:$0xff]  ;;  %v3853_v42 = vpack.c.bf16 %v1362_v28, %v1358_v27  ;;  %v3861_v21 = vpack.c.bf16 %v1378_v6, %v1374_v5 }
 0x3cd   :  { %v4109_v45 = vpack.c.bf16 %v1364_v33, %v1360_v32  ;;  %v4117_v62 = vpack.c.bf16 %v1380_v12, %v1376_v8  ;;  %v1391_v32 = vld [vmem:[#allocation11 + $0x7c8] sm:$0xff]  ;;  %v922_v37 = vadd.f32 %v921_v17, %v920_v3  ;;  %v1109_v3 = vrot.slane %v5773_v41, %v5736_v25  ;;  %v1398_v8 = vld [vmem:[#allocation11 + $0x800] sm:$0xff]  ;;  %v1409_v25 = vld [vmem:[#allocation11 + $0x858] sm:$0xff] }
 0x3cf   :  { %3842 = vmatpush1.bf16.msra.mxu0 %v3841_v47  ;;  %4098 = vmatpush1.bf16.msra.mxu1 %v4097_v49  ;;  %v1370_v47 = vld [vmem:[#allocation11 + $0x720] sm:$0xff]  ;;  %v899_v49 = vadd.f32 %v898_v29, %v897_v13  ;;  %v1383_v13 = vld [vmem:[#allocation11 + $0x788] sm:$0xff] }
 0x3d0   :  { %3844 = vmatprep.subr.bf16.mxu0 %v3843_v55  ;;  %4100 = vmatprep.subr.bf16.mxu1 %v4099_v57  ;;  %v1375_v55 = vld [vmem:[#allocation11 + $0x748] sm:$0xff]  ;;  %v3857_v4 = vpack.c.bf16 %v1370_v47, %v1366_v46  ;;  %v3863_v23 = vpack.c.bf16 %v1387_v14, %v1383_v13  ;;  %v1394_v46 = vld [vmem:[#allocation11 + $0x7e0] sm:$0xff]  ;;  %v1392_v47 = vld [vmem:[#allocation11 + $0x7d0] sm:$0xff] }
 0x3d1   :  { %v1379_v57 = vld [vmem:[#allocation11 + $0x768] sm:$0xff]  ;;  %v4125_v5 = vpack.c.bf16 %v1396_v54, %v1392_v47  ;;  %v1400_v13 = vld [vmem:[#allocation11 + $0x810] sm:$0xff] }
 0x3d2   :  { %v1404_v14 = vld [vmem:[#allocation11 + $0x830] sm:$0xff]  ;;  %v1423_v47 = vld [vmem:[#allocation11 + $0x8c8] sm:$0xff] }
 0x3d3   :  { %3846 = vmatpush1.bf16.msra.mxu0 %v3845_v9  ;;  %4102 = vmatpush1.bf16.msra.mxu1 %v4101_v10  ;;  %v900_v9 = vrot.slane %v899_v49, 1  ;;  %v3859_v10 = vpack.c.bf16 %v1379_v57, %v1375_v55  ;;  %v1399_v55 = vld [vmem:[#allocation11 + $0x808] sm:$0xff]  ;;  %v1401_v57 = vld [vmem:[#allocation11 + $0x818] sm:$0xff] }
 0x3d4   :  { %3848 = vmatprep.subr.bf16.mxu0 %v3847_v15  ;;  %4104 = vmatprep.subr.bf16.mxu1 %v4103_v40  ;;  %v4564_v15 = vpop.eup %4563  ;;  %v1385_v40 = vld [vmem:[#allocation11 + $0x798] sm:$0xff]  ;;  %v3871_v6 = vpack.c.bf16 %v1403_v35, %v1399_v55  ;;  %v4127_v12 = vpack.c.bf16 %v1405_v58, %v1401_v57  ;;  %v1422_v35 = vld [vmem:[#allocation11 + $0x8c0] sm:$0xff] }
 0x3d5   :  { %v4566_v18 = vpop.eup %4565  ;;  %v1030_v27 = vmul.f32 %v4564_v15, %v5786_v2  ;;  %v901_v28 = vadd.f32 %v900_v9, %v899_v49  ;;  %v4119_v29 = vpack.c.bf16 %v1389_v16, %v1385_v40  ;;  %v1097_v49 = vrot.slane %v5773_v41, %v5732_v22  ;;  %v1402_v9 = vld [vmem:[#allocation11 + $0x820] sm:$0xff]  ;;  %v1407_v15 = vld [vmem:[#allocation11 + $0x848] sm:$0xff]  ;;  %v1413_v41 = vld [vmem:[#allocation11 + $0x878] sm:$0xff] }
 0x3d6   :  { %v1033_v33 = vmul.f32 %v4566_v18, %v5789_v39  ;;  %v3867_v39 = vpack.c.bf16 %v1395_v34, %v1391_v32  ;;  %v1411_v40 = vld [vmem:[#allocation11 + $0x868] sm:$0xff]  ;;  %v3873_v18 = vpack.c.bf16 %v1402_v9, %v1398_v8  ;;  %v1426_v57 = vld [vmem:[#allocation11 + $0x8e0] sm:$0xff]  ;;  %v1433_v8 = vld [vmem:[#allocation11 + $0x918] sm:$0xff] }
 0x3d7   :  { %3850 = vmatpush1.bf16.msra.mxu0 %v3849_v43  ;;  %4106 = vmatpush1.bf16.msra.mxu1 %v4105_v26  ;;  %v1382_v43 = vld [vmem:[#allocation11 + $0x780] sm:$0xff]  ;;  %v1437_v9 = vld [vmem:[#allocation11 + $0x938] sm:$0xff] }
 0x3d8   :  { %3852 = vmatprep.subr.bf16.mxu0 %v3851_v30  ;;  %4108 = vmatprep.subr.bf16.mxu1 %v4107_v31  ;;  %v1386_v26 = vld [vmem:[#allocation11 + $0x7a0] sm:$0xff]  ;;  %v1384_v30 = vld [vmem:[#allocation11 + $0x790] sm:$0xff]  ;;  %v1082_v59 = vmul.f32 %v1060_v56, %v1033_v33 }
 0x3d9   :  { %v1388_v31 = vld [vmem:[#allocation11 + $0x7b0] sm:$0xff]  ;;  %v1418_v56 = vld [vmem:[#allocation11 + $0x8a0] sm:$0xff] }
 0x3da   :  { %v4121_v2 = vpack.c.bf16 %v1388_v31, %v1384_v30  ;;  %v1131_v16 = vadd.f32 %v1109_v3, %v1082_v59  ;;  %v1419_v30 = vld [vmem:[#allocation11 + $0x8a8] sm:$0xff]  ;;  %v1421_v31 = vld [vmem:[#allocation11 + $0x8b8] sm:$0xff]  ;;  %v3881_v54 = vpack.c.bf16 %v1418_v56, %v1414_v1  ;;  %v1424_v3 = vld [vmem:[#allocation11 + $0x8d0] sm:$0xff] }
 0x3db   :  { %3854 = vmatpush1.bf16.msra.mxu0 %v3853_v42  ;;  %4110 = vmatpush1.bf16.msra.mxu1 %v4109_v45  ;;  %v3865_v42 = vpack.c.bf16 %v1386_v26, %v1382_v43  ;;  %v1390_v45 = vld [vmem:[#allocation11 + $0x7c0] sm:$0xff]  ;;  %v3875_v43 = vpack.c.bf16 %v1411_v40, %v1407_v15  ;;  %v4131_v26 = vpack.c.bf16 %v1413_v41, %v1409_v25  ;;  %v1432_v41 = vld [vmem:[#allocation11 + $0x910] sm:$0xff]  ;;  %v1449_v1 = vld [vmem:[#allocation11 + $0x998] sm:$0xff] }
 0x3dc   :  { %3856 = vmatprep.subr.bf16.mxu0 %v3855_v50  ;;  %4112 = vmatprep.subr.bf16.mxu1 %v4111_v51  ;;  %v1079_v50 = vmul.f32 %v1048_v19, %v1030_v27  ;;  %v928_v51 = vmul.f32 0.25, %v901_v28  ;;  %v4129_v19 = vpack.c.bf16 %v1404_v14, %v1400_v13  ;;  %v1408_v27 = vld [vmem:[#allocation11 + $0x850] sm:$0xff]  ;;  %v1139_v32 = vmax.f32 %v1131_v16, 0.0  ;;  %v1430_v14 = vld [vmem:[#allocation11 + $0x900] sm:$0xff]  ;;  %v1453_v56 = vld [vmem:[#allocation11 + $0x9b8] sm:$0xff] }
 0x3dd   :  { %v1412_v28 = vld [vmem:[#allocation11 + $0x870] sm:$0xff]  ;;  %v1434_v15 = vld [vmem:[#allocation11 + $0x920] sm:$0xff]  ;;  %v4143_v25 = vpack.c.bf16 %v1437_v9, %v1433_v8 }
 0x3de   :  { %v4133_v36 = vpack.c.bf16 %v1412_v28, %v1408_v27  ;;  %v1436_v16 = vld [vmem:[#allocation11 + $0x930] sm:$0xff]  ;;  %v1438_v27 = vld [vmem:[#allocation11 + $0x940] sm:$0xff] }
 0x3df   :  { %3858 = vmatpush1.bf16.msra.mxu0 %v3857_v4  ;;  %4114 = vmatpush1.bf16.msra.mxu1 %v4113_v38  ;;  %v931_v4 = vmul.f32 0.25, %v922_v37  ;;  %v3869_v38 = vpack.c.bf16 %v1394_v46, %v1390_v45  ;;  %v1416_v45 = vld [vmem:[#allocation11 + $0x890] sm:$0xff]  ;;  %v1442_v28 = vld [vmem:[#allocation11 + $0x960] sm:$0xff] }
 0x3e0   :  { %3860 = vmatprep.subr.bf16.mxu0 %v3859_v10  ;;  %4116 = vmatprep.subr.bf16.mxu1 %v4115_v11  ;;  %v5833_v10 = vsub.f32 %v5813_v20, %v928_v51  ;;  %v1128_v11 = vadd.f32 %v1097_v49, %v1079_v50  ;;  %v1406_v20 = vld [vmem:[#allocation11 + $0x840] sm:$0xff]  ;;  %v1420_v46 = vld [vmem:[#allocation11 + $0x8b0] sm:$0xff]  ;;  %v1427_v49 = vld [vmem:[#allocation11 + $0x8e8] sm:$0xff] }
 0x3e1   :  { %v5836_v17 = vsub.f32 %v5816_v24, %v931_v4  ;;  %v1417_v24 = vld [vmem:[#allocation11 + $0x898] sm:$0xff]  ;;  %v4137_v55 = vpack.c.bf16 %v1420_v46, %v1416_v45  ;;  %v3883_v58 = vpack.c.bf16 %v1427_v49, %v1423_v47  ;;  %v1428_v4 = vld [vmem:[#allocation11 + $0x8f0] sm:$0xff]  ;;  %v4595_v45 = vld [vmem:[#allocation7] sm:$0xff] }
 0x3e2   :  { %v1425_v50 = vld [vmem:[#allocation11 + $0x8d8] sm:$0xff]  ;;  %v4141_v13 = vpack.c.bf16 %v1428_v4, %v1424_v3  ;;  %v1446_v46 = vld [vmem:[#allocation11 + $0x980] sm:$0xff] }
 0x3e3   :  { %3862 = vmatpush1.bf16.msra.mxu0 %v3861_v21  ;;  %4118 = vmatpush1.bf16.msra.mxu1 %v4117_v62  ;;  %v1410_v21 = vld [vmem:[#allocation11 + $0x860] sm:$0xff]  ;;  %v944_v62 = vmul.f32 %v5833_v10, %v5833_v10  ;;  %v947_v33 = vmul.f32 %v5836_v17, %v5836_v17  ;;  %v1429_v51 = vld [vmem:[#allocation11 + $0x8f8] sm:$0xff] }
 0x3e4   :  { %3864 = vmatprep.subr.bf16.mxu0 %v3863_v23  ;;  %4120 = vmatprep.subr.bf16.mxu1 %v4119_v29  ;;  %v1136_v23 = vmax.f32 %v1128_v11, 0.0  ;;  %v1415_v29 = vld [vmem:[#allocation11 + $0x888] sm:$0xff]  ;;  %v3877_v34 = vpack.c.bf16 %v1410_v21, %v1406_v20  ;;  %v4139_v59 = vpack.c.bf16 %v1429_v51, %v1425_v50  ;;  %v1441_v21 = vld [vmem:[#allocation11 + $0x958] sm:$0xff]  ;;  %v1450_v47 = vld [vmem:[#allocation11 + $0x9a0] sm:$0xff]  ;;  %v4151_v51 = vpack.c.bf16 %v1453_v56, %v1449_v1 }
 0x3e5   :  { %v976_v37 = vsel %vm866_vm1, %v944_v62, 0.0  ;;  %v1443_v20 = vld [vmem:[#allocation11 + $0x968] sm:$0xff]  ;;  %v1445_v62 = vld [vmem:[#allocation11 + $0x978] sm:$0xff]  ;;  %v1454_v4 = vld [vmem:[#allocation11 + $0x9c0] sm:$0xff] }
 0x3e7   :  { %3866 = vmatpush1.bf16.msra.mxu0 %v3865_v42  ;;  %4122 = vmatpush1.bf16.msra.mxu1 %v4121_v2  ;;  %v3879_v42 = vpack.c.bf16 %v1419_v30, %v1415_v29  ;;  %v4135_v2 = vpack.c.bf16 %v1421_v31, %v1417_v24  ;;  %v5845_v29 = vsub.s32 6, %v5710_v60  ;;  %v4147_v24 = vpack.c.bf16 %v1445_v62, %v1441_v21  ;;  %v1440_v31 = vld [vmem:[#allocation11 + $0x950] sm:$0xff] }
 0x3e8   :  { %3868 = vmatprep.subr.bf16.mxu0 %v3867_v39  ;;  %4124 = vmatprep.subr.bf16.mxu1 %v4123_v52  ;;  %v997_v39 = vsel %vm866_vm1, %v947_v33, 0.0  ;;  %v977_v52 = vrot.slane %v976_v37, 4 }
 0x3e9   :  { %v565_v60 = vrot.slane %v4595_v45, %v5845_v29  ;;  %v1479_v45 = vld [vmem:[#allocation11 + $0xa88] sm:$0xff] }
 0x3ea   :  { %v978_v11 = vadd.f32 %v977_v52, %v976_v37  ;;  %v3893_v37 = vpack.c.bf16 %v1442_v28, %v1438_v27  ;;  %v1452_v52 = vld [vmem:[#allocation11 + $0x9b0] sm:$0xff]  ;;  %v1475_v27 = vld [vmem:[#allocation11 + $0xa68] sm:$0xff]  ;;  %v1473_v28 = vld [vmem:[#allocation11 + $0xa58] sm:$0xff] }
 0x3eb   :  { %3870 = vmatpush1.bf16.msra.mxu0 %v3869_v38  ;;  %4126 = vmatpush1.bf16.msra.mxu1 %v4125_v5  ;;  %v1431_v38 = vld [vmem:[#allocation11 + $0x908] sm:$0xff]  ;;  %v998_v5 = vrot.slane %v997_v39, 4 }
 0x3ec   :  { %3872 = vmatprep.subr.bf16.mxu0 %v3871_v6  ;;  %4128 = vmatprep.subr.bf16.mxu1 %v4127_v12  ;;  %v1435_v6 = vld [vmem:[#allocation11 + $0x928] sm:$0xff]  ;;  %v3885_v12 = vpack.c.bf16 %v1426_v57, %v1422_v35  ;;  %v1457_v35 = vld [vmem:[#allocation11 + $0x9d8] sm:$0xff] }
 0x3ed   :  { %v3887_v40 = vpack.c.bf16 %v1435_v6, %v1431_v38  ;;  %v1461_v57 = vld [vmem:[#allocation11 + $0x9f8] sm:$0xff]  ;;  %v1458_v38 = vld [vmem:[#allocation11 + $0x9e0] sm:$0xff] }
 0x3ee   :  { %1814 = vmatmul.mubr.f32.vlgmr.msra.gmra.mrb[0].mxu0 %v1136_v23  ;;  %2098 = vmatmul.mubr.f32.vlgmr.msra.gmra.mrb[8].mxu1 %v1136_v23  ;;  %v979_v23 = vrot.slane %v978_v11, 2  ;;  %v4155_v9 = vpack.c.bf16 %v1461_v57, %v1457_v35 }
 0x3ef   :  { %3874 = vmatpush1.bf16.msra.mxu0 %v3873_v18  ;;  %4130 = vmatpush1.bf16.msra.mxu1 %v4129_v19  ;;  %v1439_v18 = vld [vmem:[#allocation11 + $0x948] sm:$0xff]  ;;  %v999_v19 = vadd.f32 %v998_v5, %v997_v39  ;;  %v1448_v39 = vld [vmem:[#allocation11 + $0x990] sm:$0xff]  ;;  %v5849_v5 = vadd.f32 %v5762_v53, %v565_v60 }
 0x3f0   :  { %3876 = vmatprep.subr.bf16.mxu0 %v3875_v43  ;;  %4132 = vmatprep.subr.bf16.mxu1 %v4131_v26  ;;  %v3889_v43 = vpack.c.bf16 %v1434_v15, %v1430_v14  ;;  %v4145_v26 = vpack.c.bf16 %v1436_v16, %v1432_v41  ;;  %v3891_v30 = vpack.c.bf16 %v1443_v20, %v1439_v18  ;;  %v1467_v14 = vld [vmem:[#allocation11 + $0xa28] sm:$0xff]  ;;  %v1465_v15 = vld [vmem:[#allocation11 + $0xa18] sm:$0xff]  ;;  %v1462_v18 = vld [vmem:[#allocation11 + $0xa00] sm:$0xff] }
 0x3f1   :  { %1884 = vmatprep.mubr.f32.mxu0 %v1139_v32  ;;  %2168 = vmatprep.mubr.f32.mxu1 %v1139_v32  ;;  %v1444_v32 = vld [vmem:[#allocation11 + $0x970] sm:$0xff]  ;;  %v1000_v33 = vrot.slane %v999_v19, 2  ;;  %v4153_v3 = vpack.c.bf16 %v1452_v52, %v1448_v39  ;;  %v3901_v41 = vpack.c.bf16 %v1458_v38, %v1454_v4  ;;  %v909_v53 = vsel %vm866_vm1, %v5849_v5, 0.0  ;;  %v1483_v60 = vld [vmem:[#allocation11 + $0xaa8] sm:$0xff]  ;;  %v1478_v52 = vld [vmem:[#allocation11 + $0xa80] sm:$0xff] }
 0x3f2   :  { %v3911_v35 = vpack.c.bf16 %v1483_v60, %v1479_v45  ;;  %v1491_v4 = vld [vmem:[#allocation11 + $0xae8] sm:$0xff]  ;;  %v1489_v38 = vld [vmem:[#allocation11 + $0xad8] sm:$0xff]  ;;  %v1508_v45 = vld [vmem:[#allocation11 + $0xb70] sm:$0xff] }
 0x3f3   :  { %3878 = vmatpush1.bf16.msra.mxu0 %v3877_v34  ;;  %4134 = vmatpush1.bf16.msra.mxu1 %v4133_v36  ;;  %v1447_v34 = vld [vmem:[#allocation11 + $0x988] sm:$0xff]  ;;  %v1001_v49 = vadd.f32 %v1000_v33, %v999_v19  ;;  %v1466_v19 = vld [vmem:[#allocation11 + $0xa20] sm:$0xff] }
 0x3f4   :  { %3880 = vmatprep.subr.bf16.mxu0 %v3879_v42  ;;  %4136 = vmatprep.subr.bf16.mxu1 %v4135_v2  ;;  %v1451_v36 = vld [vmem:[#allocation11 + $0x9a8] sm:$0xff]  ;;  %v980_v42 = vadd.f32 %v979_v23, %v978_v11  ;;  %v4149_v2 = vpack.c.bf16 %v1444_v32, %v1440_v31  ;;  %v1456_v11 = vld [vmem:[#allocation11 + $0x9d0] sm:$0xff]  ;;  %v910_v31 = vrot.slane %v909_v53, 4  ;;  %v3905_v32 = vpack.c.bf16 %v1466_v19, %v1462_v18  ;;  %v1497_v18 = vld [vmem:[#allocation11 + $0xb18] sm:$0xff] }
 0x3f5   :  { %v3895_v50 = vpack.c.bf16 %v1451_v36, %v1447_v34  ;;  %v1002_v6 = vrot.slane %v1001_v49, 1  ;;  %v1464_v23 = vld [vmem:[#allocation11 + $0xa10] sm:$0xff]  ;;  %v1470_v34 = vld [vmem:[#allocation11 + $0xa40] sm:$0xff]  ;;  %v1501_v19 = vld [vmem:[#allocation11 + $0xb38] sm:$0xff] }
 0x3f6   :  { %v1474_v36 = vld [vmem:[#allocation11 + $0xa60] sm:$0xff]  ;;  %v1511_v60 = vld [vmem:[#allocation11 + $0xb88] sm:$0xff] }
 0x3f7   :  { %3882 = vmatpush1.bf16.msra.mxu0 %v3881_v54  ;;  %4138 = vmatpush1.bf16.msra.mxu1 %v4137_v55  ;;  %v1455_v54 = vld [vmem:[#allocation11 + $0x9c8] sm:$0xff]  ;;  %v1003_v20 = vadd.f32 %v1002_v6, %v1001_v49  ;;  %v1493_v6 = vld [vmem:[#allocation11 + $0xaf8] sm:$0xff] }
 0x3f8   :  { %3884 = vmatprep.subr.bf16.mxu0 %v3883_v58  ;;  %4140 = vmatprep.subr.bf16.mxu1 %v4139_v59  ;;  %v1459_v55 = vld [vmem:[#allocation11 + $0x9e8] sm:$0xff]  ;;  %v981_v58 = vrot.slane %v980_v42, 1  ;;  %v3897_v59 = vpack.c.bf16 %v1450_v47, %v1446_v46  ;;  %v1481_v46 = vld [vmem:[#allocation11 + $0xa98] sm:$0xff] }
 0x3f9   :  { %v3899_v8 = vpack.c.bf16 %v1459_v55, %v1455_v54  ;;  %v1011_v1 = vmul.f32 0.25, %v1003_v20  ;;  %v1485_v47 = vld [vmem:[#allocation11 + $0xab8] sm:$0xff]  ;;  %v1482_v54 = vld [vmem:[#allocation11 + $0xaa0] sm:$0xff] }
 0x3fa   :  { %v4167_v57 = vpack.c.bf16 %v1485_v47, %v1481_v46  ;;  %v1515_v47 = vld [vmem:[#allocation11 + $0xba8] sm:$0xff] }
 0x3fb   :  { %3886 = vmatpush1.bf16.msra.mxu0 %v3885_v12  ;;  %4142 = vmatpush1.bf16.msra.mxu1 %v4141_v13  ;;  %v1460_v12 = vld [vmem:[#allocation11 + $0x9f0] sm:$0xff]  ;;  %v1463_v13 = vld [vmem:[#allocation11 + $0xa08] sm:$0xff]  ;;  %v1019_v55 = vadd.f32 1e-05, %v1011_v1  ;;  %v1502_v1 = vld [vmem:[#allocation11 + $0xb40] sm:$0xff] }
 0x3fc   :  { %3888 = vmatprep.subr.bf16.mxu0 %v3887_v40  ;;  %4144 = vmatprep.subr.bf16.mxu1 %v4143_v25  ;;  %v1469_v40 = vld [vmem:[#allocation11 + $0xa38] sm:$0xff]  ;;  %v982_v25 = vadd.f32 %v981_v58, %v980_v42  ;;  %v4157_v16 = vpack.c.bf16 %v1460_v12, %v1456_v11  ;;  %v3903_v21 = vpack.c.bf16 %v1467_v14, %v1463_v13  ;;  %v1472_v42 = vld [vmem:[#allocation11 + $0xa50] sm:$0xff]  ;;  %v1486_v12 = vld [vmem:[#allocation11 + $0xac0] sm:$0xff] }
 0x3fd   :  { %v4159_v62 = vpack.c.bf16 %v1469_v40, %v1465_v15  ;;  %v1480_v58 = vld [vmem:[#allocation11 + $0xa90] sm:$0xff]  ;;  %v1490_v13 = vld [vmem:[#allocation11 + $0xae0] sm:$0xff]  ;;  %v4171_v15 = vpack.c.bf16 %v1493_v6, %v1489_v38 }
 0x3fe   :  { %v1488_v40 = vld [vmem:[#allocation11 + $0xad0] sm:$0xff]  ;;  %v3917_v20 = vpack.c.bf16 %v1490_v13, %v1486_v12  ;;  %v1521_v12 = vld [vmem:[#allocation11 + $0xbd8] sm:$0xff] }
 0x3ff   :  { %3890 = vmatpush1.bf16.msra.mxu0 %v3889_v43  ;;  %4146 = vmatpush1.bf16.msra.mxu1 %v4145_v26  ;;  %v1468_v43 = vld [vmem:[#allocation11 + $0xa30] sm:$0xff]  ;;  %v1471_v26 = vld [vmem:[#allocation11 + $0xa48] sm:$0xff]  ;;  %v1525_v13 = vld [vmem:[#allocation11 + $0xbf8] sm:$0xff] }
 0x400   :  { %3892 = vmatprep.subr.bf16.mxu0 %v3891_v30  ;;  %4148 = vmatprep.subr.bf16.mxu1 %v4147_v24  ;;  %v1477_v30 = vld [vmem:[#allocation11 + $0xa78] sm:$0xff]  ;;  %v1008_v24 = vmul.f32 0.25, %v982_v25  ;;  %v4161_v33 = vpack.c.bf16 %v1468_v43, %v1464_v23  ;;  %v3907_v56 = vpack.c.bf16 %v1475_v27, %v1471_v26  ;;  %v1492_v25 = vld [vmem:[#allocation11 + $0xaf0] sm:$0xff]  ;;  %v1498_v23 = vld [vmem:[#allocation11 + $0xb20] sm:$0xff]  ;;  %v4175_v26 = vpack.c.bf16 %v1501_v19, %v1497_v18 }
 0x401   :  { %v1496_v27 = vld [vmem:[#allocation11 + $0xb10] sm:$0xff] }
 0x402   :  { %v1016_v49 = vadd.f32 1e-05, %v1008_v24  ;;  %v1507_v24 = vld [vmem:[#allocation11 + $0xb68] sm:$0xff]  ;;  %v1512_v38 = vld [vmem:[#allocation11 + $0xb90] sm:$0xff] }
 0x403   :  { %3894 = vmatpush1.bf16.msra.mxu0 %v3893_v37  ;;  %4150 = vmatpush1.bf16.msra.mxu1 %v4149_v2  ;;  %v4163_v37 = vpack.c.bf16 %v1477_v30, %v1473_v28  ;;  %v1476_v2 = vld [vmem:[#allocation11 + $0xa70] sm:$0xff]  ;;  %v1503_v30 = vld [vmem:[#allocation11 + $0xb48] sm:$0xff] }
 0x404   :  { %3896 = vmatprep.subr.bf16.mxu0 %v3895_v50  ;;  %4152 = vmatprep.subr.bf16.mxu1 %v4151_v51  ;;  %v911_v50 = vadd.f32 %v910_v31, %v909_v53  ;;  %v3909_v51 = vpack.c.bf16 %v1474_v36, %v1470_v34  ;;  %v4165_v39 = vpack.c.bf16 %v1476_v2, %v1472_v42  ;;  %4567 = vrsqrt.f32 %v1016_v49  ;;  %v1500_v28 = vld [vmem:[#allocation11 + $0xb30] sm:$0xff]  ;;  %v1505_v31 = vld [vmem:[#allocation11 + $0xb58] sm:$0xff] }
 0x405   :  { %4569 = vrsqrt.f32 %v1019_v55  ;;  %v4177_v36 = vpack.c.bf16 %v1500_v28, %v1496_v27  ;;  %v1504_v2 = vld [vmem:[#allocation11 + $0xb50] sm:$0xff]  ;;  %v1513_v49 = vld [vmem:[#allocation11 + $0xb98] sm:$0xff] }
 0x406   :  { %v1516_v6 = vld [vmem:[#allocation11 + $0xbb0] sm:$0xff] }
 0x407   :  { %3898 = vmatpush1.bf16.msra.mxu0 %v3897_v59  ;;  %4154 = vmatpush1.bf16.msra.mxu1 %v4153_v3  ;;  %v1484_v59 = vld [vmem:[#allocation11 + $0xab0] sm:$0xff]  ;;  %v1487_v3 = vld [vmem:[#allocation11 + $0xac8] sm:$0xff] }
 0x408   :  { %3900 = vmatprep.subr.bf16.mxu0 %v3899_v8  ;;  %4156 = vmatprep.subr.bf16.mxu1 %v4155_v9  ;;  %v912_v8 = vrot.slane %v911_v50, 2  ;;  %v3913_v9 = vpack.c.bf16 %v1482_v54, %v1478_v52  ;;  %v4169_v11 = vpack.c.bf16 %v1484_v59, %v1480_v58  ;;  %v3915_v14 = vpack.c.bf16 %v1491_v4, %v1487_v3  ;;  %v1514_v58 = vld [vmem:[#allocation11 + $0xba0] sm:$0xff] }
 0x409   :  { %v3927_v3 = vpack.c.bf16 %v1515_v47, %v1511_v60  ;;  %v1534_v47 = vld [vmem:[#allocation11 + $0xc40] sm:$0xff] }
 0x40a   :  { %v913_v53 = vadd.f32 %v912_v8, %v911_v50  ;;  %v1517_v50 = vld [vmem:[#allocation11 + $0xbb8] sm:$0xff]  ;;  %v1519_v8 = vld [vmem:[#allocation11 + $0xbc8] sm:$0xff] }
 0x40b   :  { %3902 = vmatpush1.bf16.msra.mxu0 %v3901_v41  ;;  %4158 = vmatpush1.bf16.msra.mxu1 %v4157_v16  ;;  %v1495_v41 = vld [vmem:[#allocation11 + $0xb08] sm:$0xff]  ;;  %v4183_v4 = vpack.c.bf16 %v1517_v50, %v1513_v49  ;;  %v1538_v49 = vld [vmem:[#allocation11 + $0xc60] sm:$0xff] }
 0x40c   :  { %3904 = vmatprep.subr.bf16.mxu0 %v3903_v21  ;;  %4160 = vmatprep.subr.bf16.mxu1 %v4159_v62  ;;  %v1499_v16 = vld [vmem:[#allocation11 + $0xb28] sm:$0xff]  ;;  %v4173_v21 = vpack.c.bf16 %v1492_v25, %v1488_v40  ;;  %v1494_v62 = vld [vmem:[#allocation11 + $0xb00] sm:$0xff] }
 0x40d   :  { %v3919_v43 = vpack.c.bf16 %v1499_v16, %v1495_v41  ;;  %v3921_v34 = vpack.c.bf16 %v1498_v23, %v1494_v62  ;;  %v1518_v25 = vld [vmem:[#allocation11 + $0xbc0] sm:$0xff]  ;;  %v5861_v16 = vld [vmem:[#allocation10] sm:$0xff]  ;;  %v1527_v62 = vld [vmem:[#allocation11 + $0xc08] sm:$0xff] }
 0x40e   :  { %v4568_v46 = vpop.eup %4567  ;;  %v1522_v41 = vld [vmem:[#allocation11 + $0xbe0] sm:$0xff]  ;;  %v1105_v18 = vrot.slane %v5861_v16, %v5803_v44  ;;  %v1531_v23 = vld [vmem:[#allocation11 + $0xc28] sm:$0xff]  ;;  %v1117_v28 = vrot.slane %v5861_v16, %v5806_v48 }
 0x40f   :  { %3906 = vmatpush1.bf16.msra.mxu0 %v3905_v32  ;;  %4162 = vmatpush1.bf16.msra.mxu1 %v4161_v33  ;;  %v1509_v32 = vld [vmem:[#allocation11 + $0xb78] sm:$0xff]  ;;  %v914_v33 = vrot.slane %v913_v53, 1  ;;  %v1032_v59 = vmul.f32 %v4568_v46, %v5833_v10  ;;  %v4185_v10 = vpack.c.bf16 %v1516_v6, %v1512_v38  ;;  %v3941_v38 = vpack.c.bf16 %v1538_v49, %v1534_v47  ;;  %v1570_v47 = vld [vmem:[#allocation11 + $0xd60] sm:$0xff] }
 0x410   :  { %3908 = vmatprep.subr.bf16.mxu0 %v3907_v56  ;;  %4164 = vmatprep.subr.bf16.mxu1 %v4163_v37  ;;  %v1506_v56 = vld [vmem:[#allocation11 + $0xb60] sm:$0xff]  ;;  %v3923_v37 = vpack.c.bf16 %v1507_v24, %v1503_v30  ;;  %v4179_v42 = vpack.c.bf16 %v1509_v32, %v1505_v31 }
 0x411   :  { %v915_v54 = vadd.f32 %v914_v33, %v913_v53  ;;  %v3925_v55 = vpack.c.bf16 %v1506_v56, %v1502_v1  ;;  %v4187_v53 = vpack.c.bf16 %v1525_v13, %v1521_v12  ;;  %v1526_v31 = vld [vmem:[#allocation11 + $0xc00] sm:$0xff]  ;;  %v1528_v1 = vld [vmem:[#allocation11 + $0xc10] sm:$0xff] }
 0x412   :  { %v1530_v32 = vld [vmem:[#allocation11 + $0xc20] sm:$0xff]  ;;  %v1532_v56 = vld [vmem:[#allocation11 + $0xc30] sm:$0xff] }
 0x413   :  { %3910 = vmatpush1.bf16.msra.mxu0 %v3909_v51  ;;  %4166 = vmatpush1.bf16.msra.mxu1 %v4165_v39  ;;  %v4570_v51 = vpop.eup %4569  ;;  %v5853_v39 = vld [vmem:[#allocation8] sm:$0xff]  ;;  %v3937_v60 = vpack.c.bf16 %v1530_v32, %v1526_v31  ;;  %v4193_v46 = vpack.c.bf16 %v1532_v56, %v1528_v1  ;;  %v1558_v32 = vld [vmem:[#allocation11 + $0xd00] sm:$0xff] }
 0x414   :  { %3912 = vmatprep.subr.bf16.mxu0 %v3911_v35  ;;  %4168 = vmatprep.subr.bf16.mxu1 %v4167_v57  ;;  %v1056_v52 = vrot.slane %v5853_v39, %v5803_v44  ;;  %v4181_v35 = vpack.c.bf16 %v1508_v45, %v1504_v2  ;;  %v1510_v57 = vld [vmem:[#allocation11 + $0xb80] sm:$0xff]  ;;  %v3933_v44 = vpack.c.bf16 %v1522_v41, %v1518_v25  ;;  %v1537_v2 = vld [vmem:[#allocation11 + $0xc58] sm:$0xff]  ;;  %v1544_v13 = vld [vmem:[#allocation11 + $0xc90] sm:$0xff] }
 0x415   :  { %v3929_v40 = vpack.c.bf16 %v1514_v58, %v1510_v57  ;;  %v1547_v57 = vld [vmem:[#allocation11 + $0xca8] sm:$0xff]  ;;  %v1545_v58 = vld [vmem:[#allocation11 + $0xc98] sm:$0xff]  ;;  %v1560_v1 = vld [vmem:[#allocation11 + $0xd10] sm:$0xff] }
 0x416   :  { %v1081_v19 = vmul.f32 %v1056_v52, %v1032_v59  ;;  %v1549_v59 = vld [vmem:[#allocation11 + $0xcb8] sm:$0xff]  ;;  %v1564_v56 = vld [vmem:[#allocation11 + $0xd30] sm:$0xff] }
 0x417   :  { %3914 = vmatpush1.bf16.msra.mxu0 %v3913_v9  ;;  %4170 = vmatpush1.bf16.msra.mxu1 %v4169_v11  ;;  %v1035_v9 = vmul.f32 %v4570_v51, %v5836_v17  ;;  %v1523_v11 = vld [vmem:[#allocation11 + $0xbe8] sm:$0xff]  ;;  %v4199_v12 = vpack.c.bf16 %v1549_v59, %v1545_v58  ;;  %v1557_v25 = vld [vmem:[#allocation11 + $0xcf8] sm:$0xff] }
 0x418   :  { %3916 = vmatprep.subr.bf16.mxu0 %v3915_v14  ;;  %4172 = vmatprep.subr.bf16.mxu1 %v4171_v15  ;;  %v1068_v14 = vrot.slane %v5853_v39, %v5806_v48  ;;  %v930_v15 = vmul.f32 0.25, %v915_v54  ;;  %v3931_v17 = vpack.c.bf16 %v1523_v11, %v1519_v8  ;;  %v1130_v33 = vadd.f32 %v1105_v18, %v1081_v19  ;;  %v1541_v48 = vld [vmem:[#allocation11 + $0xc78] sm:$0xff]  ;;  %v1536_v54 = vld [vmem:[#allocation11 + $0xc50] sm:$0xff]  ;;  %v1542_v8 = vld [vmem:[#allocation11 + $0xc80] sm:$0xff] }
 0x419   :  { %v4195_v52 = vpack.c.bf16 %v1541_v48, %v1537_v2  ;;  %v1569_v2 = vld [vmem:[#allocation11 + $0xd58] sm:$0xff] }
 0x41a   :  { %v1084_v27 = vmul.f32 %v1068_v14, %v1035_v9  ;;  %v5868_v30 = vsub.f32 %v5849_v5, %v930_v15  ;;  %v1138_v50 = vmax.f32 %v1130_v33, 0.0  ;;  %v1546_v9 = vld [vmem:[#allocation11 + $0xca0] sm:$0xff]  ;;  %v1548_v14 = vld [vmem:[#allocation11 + $0xcb0] sm:$0xff]  ;;  %v1551_v15 = vld [vmem:[#allocation11 + $0xcc8] sm:$0xff] }
 0x41b   :  { %3918 = vmatpush1.bf16.msra.mxu0 %v3917_v20  ;;  %4174 = vmatpush1.bf16.msra.mxu1 %v4173_v21  ;;  %v1520_v20 = vld [vmem:[#allocation11 + $0xbd0] sm:$0xff]  ;;  %v3945_v18 = vpack.c.bf16 %v1546_v9, %v1542_v8  ;;  %v4201_v19 = vpack.c.bf16 %v1548_v14, %v1544_v13  ;;  %v1562_v33 = vld [vmem:[#allocation11 + $0xd20] sm:$0xff]  ;;  %v1573_v48 = vld [vmem:[#allocation11 + $0xd78] sm:$0xff] }
 0x41c   :  { %3920 = vmatprep.subr.bf16.mxu0 %v3919_v43  ;;  %4176 = vmatprep.subr.bf16.mxu1 %v4175_v26  ;;  %v1524_v21 = vld [vmem:[#allocation11 + $0xbf0] sm:$0xff]  ;;  %v1529_v43 = vld [vmem:[#allocation11 + $0xc18] sm:$0xff]  ;;  %v1133_v45 = vadd.f32 %v1117_v28, %v1084_v27  ;;  %v946_v5 = vmul.f32 %v5868_v30, %v5868_v30  ;;  %v1587_v13 = vld [vmem:[#allocation11 + $0xde8] sm:$0xff] }
 0x41d   :  { %v1533_v26 = vld [vmem:[#allocation11 + $0xc38] sm:$0xff]  ;;  %v4189_v24 = vpack.c.bf16 %v1524_v21, %v1520_v20  ;;  %v1576_v9 = vld [vmem:[#allocation11 + $0xd90] sm:$0xff] }
 0x41e   :  { %v1561_v27 = vld [vmem:[#allocation11 + $0xd18] sm:$0xff] }
 0x41f   :  { %3922 = vmatpush1.bf16.msra.mxu0 %v3921_v34  ;;  %4178 = vmatpush1.bf16.msra.mxu1 %v4177_v36  ;;  %v3935_v34 = vpack.c.bf16 %v1531_v23, %v1527_v62  ;;  %v4191_v36 = vpack.c.bf16 %v1533_v26, %v1529_v43  ;;  %v1552_v62 = vld [vmem:[#allocation11 + $0xcd0] sm:$0xff]  ;;  %v1559_v43 = vld [vmem:[#allocation11 + $0xd08] sm:$0xff]  ;;  %v1565_v28 = vld [vmem:[#allocation11 + $0xd38] sm:$0xff] }
 0x420   :  { %3924 = vmatprep.subr.bf16.mxu0 %v3923_v37  ;;  %4180 = vmatprep.subr.bf16.mxu1 %v4179_v42  ;;  %v1535_v37 = vld [vmem:[#allocation11 + $0xc48] sm:$0xff]  ;;  %v1556_v23 = vld [vmem:[#allocation11 + $0xcf0] sm:$0xff]  ;;  %v1585_v14 = vld [vmem:[#allocation11 + $0xdd8] sm:$0xff] }
 0x421   :  { %v1539_v42 = vld [vmem:[#allocation11 + $0xc68] sm:$0xff]  ;;  %v4205_v31 = vpack.c.bf16 %v1556_v23, %v1552_v62  ;;  %v1593_v23 = vld [vmem:[#allocation11 + $0xe18] sm:$0xff] }
 0x422   :  { %v3939_v51 = vpack.c.bf16 %v1539_v42, %v1535_v37  ;;  %v1563_v26 = vld [vmem:[#allocation11 + $0xd28] sm:$0xff] }
 0x423   :  { %3926 = vmatpush1.bf16.msra.mxu0 %v3925_v55  ;;  %4182 = vmatpush1.bf16.msra.mxu1 %v4181_v35  ;;  %v1540_v55 = vld [vmem:[#allocation11 + $0xc70] sm:$0xff]  ;;  %v1543_v35 = vld [vmem:[#allocation11 + $0xc88] sm:$0xff] }
 0x424   :  { %3928 = vmatprep.subr.bf16.mxu0 %v3927_v3  ;;  %4184 = vmatprep.subr.bf16.mxu1 %v4183_v4  ;;  %v1141_v3 = vmax.f32 %v1133_v45, 0.0  ;;  %v990_v4 = vsel %vm866_vm1, %v946_v5, 0.0  ;;  %v4197_v6 = vpack.c.bf16 %v1540_v55, %v1536_v54  ;;  %v3943_v11 = vpack.c.bf16 %v1547_v57, %v1543_v35  ;;  %v1567_v37 = vld [vmem:[#allocation11 + $0xd48] sm:$0xff]  ;;  %v1577_v35 = vld [vmem:[#allocation11 + $0xd98] sm:$0xff] }
 0x425   :  { %v991_v41 = vrot.slane %v990_v4, 4  ;;  %v1571_v42 = vld [vmem:[#allocation11 + $0xd68] sm:$0xff]  ;;  %v3953_v5 = vpack.c.bf16 %v1562_v33, %v1558_v32  ;;  %v1581_v57 = vld [vmem:[#allocation11 + $0xdb8] sm:$0xff]  ;;  %v1592_v33 = vld [vmem:[#allocation11 + $0xe10] sm:$0xff] }
 0x426   :  { %v3955_v49 = vpack.c.bf16 %v1571_v42, %v1567_v37  ;;  %v1575_v54 = vld [vmem:[#allocation11 + $0xd88] sm:$0xff]  ;;  %v4215_v8 = vpack.c.bf16 %v1581_v57, %v1577_v35  ;;  %v1605_v37 = vld [vmem:[#allocation11 + $0xe78] sm:$0xff] }
 0x427   :  { %3930 = vmatpush1.bf16.msra.mxu0 %v3929_v40  ;;  %4186 = vmatpush1.bf16.msra.mxu1 %v4185_v10  ;;  %v1555_v40 = vld [vmem:[#allocation11 + $0xce8] sm:$0xff]  ;;  %v1553_v10 = vld [vmem:[#allocation11 + $0xcd8] sm:$0xff] }
 0x428   :  { %3932 = vmatprep.subr.bf16.mxu0 %v3931_v17  ;;  %4188 = vmatprep.subr.bf16.mxu1 %v4187_v53  ;;  %v1550_v17 = vld [vmem:[#allocation11 + $0xcc0] sm:$0xff]  ;;  %v3947_v20 = vpack.c.bf16 %v1555_v40, %v1551_v15  ;;  %v4203_v21 = vpack.c.bf16 %v1557_v25, %v1553_v10  ;;  %v1579_v55 = vld [vmem:[#allocation11 + $0xda8] sm:$0xff]  ;;  %v1589_v15 = vld [vmem:[#allocation11 + $0xdf8] sm:$0xff] }
 0x429   :  { %v1554_v53 = vld [vmem:[#allocation11 + $0xce0] sm:$0xff]  ;;  %v1595_v62 = vld [vmem:[#allocation11 + $0xe28] sm:$0xff] }
 0x42b   :  { %3934 = vmatpush1.bf16.msra.mxu0 %v3933_v44  ;;  %4190 = vmatpush1.bf16.msra.mxu1 %v4189_v24  ;;  %v992_v44 = vadd.f32 %v991_v41, %v990_v4  ;;  %v3949_v24 = vpack.c.bf16 %v1554_v53, %v1550_v17  ;;  %v1574_v4 = vld [vmem:[#allocation11 + $0xd80] sm:$0xff]  ;;  %v4219_v17 = vpack.c.bf16 %v1589_v15, %v1585_v14  ;;  %v1584_v53 = vld [vmem:[#allocation11 + $0xdd0] sm:$0xff] }
 0x42c   :  { %3936 = vmatprep.subr.bf16.mxu0 %v3935_v34  ;;  %4192 = vmatprep.subr.bf16.mxu1 %v4191_v36  ;;  %v3951_v34 = vpack.c.bf16 %v1563_v26, %v1559_v43  ;;  %v4207_v36 = vpack.c.bf16 %v1565_v28, %v1561_v27  ;;  %v1582_v41 = vld [vmem:[#allocation11 + $0xdc0] sm:$0xff]  ;;  %v1597_v43 = vld [vmem:[#allocation11 + $0xe38] sm:$0xff] }
 0x42d   :  { %v993_v45 = vrot.slane %v992_v44, 2  ;;  %v4223_v32 = vpack.c.bf16 %v1597_v43, %v1593_v23  ;;  %v1614_v15 = vld [vmem:[#allocation11 + $0xec0] sm:$0xff] }
 0x42e   :  { %1885 = vmatmul.mubr.f32.vlgmr.msra.gmra.mrb[0].mxu0 %v1138_v50  ;;  %2169 = vmatmul.mubr.f32.vlgmr.msra.gmra.mrb[8].mxu1 %v1138_v50  ;;  %v4211_v50 = vpack.c.bf16 %v1573_v48, %v1569_v2  ;;  %v1622_v23 = vld [vmem:[#allocation11 + $0xf00] sm:$0xff] }
 0x42f   :  { %3938 = vmatpush1.bf16.msra.mxu0 %v3937_v60  ;;  %4194 = vmatpush1.bf16.msra.mxu1 %v4193_v46  ;;  %v4209_v60 = vpack.c.bf16 %v1564_v56, %v1560_v1  ;;  %v1566_v46 = vld [vmem:[#allocation11 + $0xd40] sm:$0xff]  ;;  %v994_v58 = vadd.f32 %v993_v45, %v992_v44  ;;  %v1603_v1 = vld [vmem:[#allocation11 + $0xe68] sm:$0xff]  ;;  %v1601_v56 = vld [vmem:[#allocation11 + $0xe58] sm:$0xff] }
 0x430   :  { %3940 = vmatprep.subr.bf16.mxu0 %v3939_v51  ;;  %4196 = vmatprep.subr.bf16.mxu1 %v4195_v52  ;;  %v1568_v51 = vld [vmem:[#allocation11 + $0xd50] sm:$0xff]  ;;  %v3957_v59 = vpack.c.bf16 %v1570_v47, %v1566_v46  ;;  %v1590_v44 = vld [vmem:[#allocation11 + $0xe00] sm:$0xff]  ;;  %v4227_v46 = vpack.c.bf16 %v1605_v37, %v1601_v56 }
 0x431   :  { %1955 = vmatprep.mubr.f32.mxu0 %v1141_v3  ;;  %2239 = vmatprep.mubr.f32.mxu1 %v1141_v3  ;;  %v1572_v52 = vld [vmem:[#allocation11 + $0xd70] sm:$0xff]  ;;  %v995_v40 = vrot.slane %v994_v58, 1  ;;  %v1598_v45 = vld [vmem:[#allocation11 + $0xe40] sm:$0xff] }
 0x432   :  { %v4213_v3 = vpack.c.bf16 %v1572_v52, %v1568_v51  ;;  %v1600_v47 = vld [vmem:[#allocation11 + $0xe50] sm:$0xff]  ;;  %v1611_v51 = vld [vmem:[#allocation11 + $0xea8] sm:$0xff]  ;;  %v1609_v52 = vld [vmem:[#allocation11 + $0xe98] sm:$0xff] }
 0x433   :  { %3942 = vmatpush1.bf16.msra.mxu0 %v3941_v38  ;;  %4198 = vmatpush1.bf16.msra.mxu1 %v4197_v6  ;;  %v1578_v38 = vld [vmem:[#allocation11 + $0xda0] sm:$0xff]  ;;  %v3959_v6 = vpack.c.bf16 %v1579_v55, %v1575_v54  ;;  %v996_v26 = vadd.f32 %v995_v40, %v994_v58  ;;  %v1613_v54 = vld [vmem:[#allocation11 + $0xeb8] sm:$0xff] }
 0x434   :  { %3944 = vmatprep.subr.bf16.mxu0 %v3943_v11  ;;  %4200 = vmatprep.subr.bf16.mxu1 %v4199_v12  ;;  %v1580_v11 = vld [vmem:[#allocation11 + $0xdb0] sm:$0xff]  ;;  %v1583_v12 = vld [vmem:[#allocation11 + $0xdc8] sm:$0xff]  ;;  %v3961_v10 = vpack.c.bf16 %v1578_v38, %v1574_v4  ;;  %v1606_v58 = vld [vmem:[#allocation11 + $0xe80] sm:$0xff]  ;;  %v4231_v4 = vpack.c.bf16 %v1613_v54, %v1609_v52 }
 0x435   :  { %v4217_v25 = vpack.c.bf16 %v1580_v11, %v1576_v9  ;;  %v1010_v42 = vmul.f32 0.25, %v996_v26  ;;  %v1608_v38 = vld [vmem:[#allocation11 + $0xe90] sm:$0xff]  ;;  %v1619_v9 = vld [vmem:[#allocation11 + $0xee8] sm:$0xff]  ;;  %v1617_v11 = vld [vmem:[#allocation11 + $0xed8] sm:$0xff] }
 0x436   :  { %v1618_v40 = vld [vmem:[#allocation11 + $0xee0] sm:$0xff] }
 0x437   :  { %3946 = vmatpush1.bf16.msra.mxu0 %v3945_v18  ;;  %4202 = vmatpush1.bf16.msra.mxu1 %v4201_v19  ;;  %v1586_v18 = vld [vmem:[#allocation11 + $0xde0] sm:$0xff]  ;;  %v3963_v19 = vpack.c.bf16 %v1587_v13, %v1583_v12  ;;  %v1018_v55 = vadd.f32 1e-05, %v1010_v42  ;;  %v1621_v12 = vld [vmem:[#allocation11 + $0xef8] sm:$0xff] }
 0x438   :  { %3948 = vmatprep.subr.bf16.mxu0 %v3947_v20  ;;  %4204 = vmatprep.subr.bf16.mxu1 %v4203_v21  ;;  %v1588_v20 = vld [vmem:[#allocation11 + $0xdf0] sm:$0xff]  ;;  %v1591_v21 = vld [vmem:[#allocation11 + $0xe08] sm:$0xff]  ;;  %v3965_v27 = vpack.c.bf16 %v1586_v18, %v1582_v41  ;;  %v1626_v43 = vld [vmem:[#allocation11 + $0xf20] sm:$0xff] }
 0x439   :  { %v4221_v28 = vpack.c.bf16 %v1588_v20, %v1584_v53  ;;  %4571 = vrsqrt.f32 %v1018_v55  ;;  %v1616_v41 = vld [vmem:[#allocation11 + $0xed0] sm:$0xff]  ;;  %v1625_v53 = vld [vmem:[#allocation11 + $0xf18] sm:$0xff]  ;;  %v1634_v56 = vld [vmem:[#allocation11 + $0xf60] sm:$0xff] }
 0x43a   :  { %v1620_v18 = vld [vmem:[#allocation11 + $0xef0] sm:$0xff]  ;;  %v1629_v20 = vld [vmem:[#allocation11 + $0xf38] sm:$0xff]  ;;  %v1638_v54 = vld [vmem:[#allocation11 + $0xf80] sm:$0xff] }
 0x43b   :  { %3950 = vmatpush1.bf16.msra.mxu0 %v3949_v24  ;;  %4206 = vmatpush1.bf16.msra.mxu1 %v4205_v31  ;;  %v1594_v24 = vld [vmem:[#allocation11 + $0xe20] sm:$0xff]  ;;  %v3967_v31 = vpack.c.bf16 %v1595_v62, %v1591_v21  ;;  %v3981_v21 = vpack.c.bf16 %v1618_v40, %v1614_v15  ;;  %v4237_v62 = vpack.c.bf16 %v1620_v18, %v1616_v41  ;;  %v1652_v15 = vld [vmem:[#allocation11 + $0xff0] sm:$0xff] }
 0x43c   :  { %3952 = vmatprep.subr.bf16.mxu0 %v3951_v34  ;;  %4208 = vmatprep.subr.bf16.mxu1 %v4207_v36  ;;  %v1596_v34 = vld [vmem:[#allocation11 + $0xe30] sm:$0xff]  ;;  %v1599_v36 = vld [vmem:[#allocation11 + $0xe48] sm:$0xff]  ;;  %v3969_v2 = vpack.c.bf16 %v1594_v24, %v1590_v44  ;;  %v1642_v55 = vld [vmem:[#allocation11 + $0xfa0] sm:$0xff]  ;;  %v1113_v40 = vrot.slane %v5861_v16, %v5845_v29 }
 0x43d   :  { %v4225_v48 = vpack.c.bf16 %v1596_v34, %v1592_v33  ;;  %v1628_v44 = vld [vmem:[#allocation11 + $0xf30] sm:$0xff]  ;;  %v1631_v24 = vld [vmem:[#allocation11 + $0xf48] sm:$0xff]  ;;  %v1637_v33 = vld [vmem:[#allocation11 + $0xf78] sm:$0xff]  ;;  %v3985_v34 = vpack.c.bf16 %v1626_v43, %v1622_v23 }
 0x43e   :  { %v2388_v16 = vld [vmem:[#allocation17 + $0x20] sm:$0xff] }
 0x43f   :  { %3954 = vmatpush1.bf16.msra.mxu0 %v3953_v5  ;;  %4210 = vmatpush1.bf16.msra.mxu1 %v4209_v60  ;;  %v1602_v5 = vld [vmem:[#allocation11 + $0xe60] sm:$0xff]  ;;  %v3971_v60 = vpack.c.bf16 %v1603_v1, %v1599_v36 }
 0x440   :  { %3956 = vmatprep.subr.bf16.mxu0 %v3955_v49  ;;  %4212 = vmatprep.subr.bf16.mxu1 %v4211_v50  ;;  %v1604_v49 = vld [vmem:[#allocation11 + $0xe70] sm:$0xff]  ;;  %v1607_v50 = vld [vmem:[#allocation11 + $0xe88] sm:$0xff]  ;;  %v3973_v35 = vpack.c.bf16 %v1602_v5, %v1598_v45  ;;  %v1630_v1 = vld [vmem:[#allocation11 + $0xf40] sm:$0xff] }
 0x441   :  { %v4229_v57 = vpack.c.bf16 %v1604_v49, %v1600_v47  ;;  %v1636_v45 = vld [vmem:[#allocation11 + $0xf70] sm:$0xff]  ;;  %v1639_v5 = vld [vmem:[#allocation11 + $0xf88] sm:$0xff]  ;;  %v1645_v47 = vld [vmem:[#allocation11 + $0xfb8] sm:$0xff]  ;;  %v1064_v49 = vrot.slane %v5853_v39, %v5845_v29  ;;  %v3993_v39 = vpack.c.bf16 %v1642_v55, %v1638_v54 }
 0x442   :  { %v2409_v55 = vld [vmem:[#allocation17 + $0xc8] sm:$0xff] }
 0x443   :  { %3958 = vmatpush1.bf16.msra.mxu0 %v3957_v59  ;;  %4214 = vmatpush1.bf16.msra.mxu1 %v4213_v3  ;;  %v1610_v59 = vld [vmem:[#allocation11 + $0xea0] sm:$0xff]  ;;  %v3975_v3 = vpack.c.bf16 %v1611_v51, %v1607_v50  ;;  %v4572_v37 = vpop.eup %4571  ;;  %v3989_v51 = vpack.c.bf16 %v1634_v56, %v1630_v1  ;;  %v2396_v56 = vld [vmem:[#allocation17 + $0x60] sm:$0xff] }
 0x444   :  { %3960 = vmatprep.subr.bf16.mxu0 %v3959_v6  ;;  %4216 = vmatprep.subr.bf16.mxu1 %v4215_v8  ;;  %v1612_v6 = vld [vmem:[#allocation11 + $0xeb0] sm:$0xff]  ;;  %v1615_v8 = vld [vmem:[#allocation11 + $0xec8] sm:$0xff]  ;;  %v3977_v13 = vpack.c.bf16 %v1610_v59, %v1606_v58  ;;  %v1034_v50 = vmul.f32 %v4572_v37, %v5868_v30  ;;  %v2398_v37 = vld [vmem:[#allocation17 + $0x70] sm:$0xff] }
 0x445   :  { %v4233_v14 = vpack.c.bf16 %v1612_v6, %v1608_v38  ;;  %v1640_v58 = vld [vmem:[#allocation11 + $0xf90] sm:$0xff]  ;;  %v1649_v38 = vld [vmem:[#allocation11 + $0xfd8] sm:$0xff] }
 0x446   :  { %v1644_v59 = vld [vmem:[#allocation11 + $0xfb0] sm:$0xff]  ;;  %v1653_v6 = vld [vmem:[#allocation11 + $0xff8] sm:$0xff] }
 0x447   :  { %3962 = vmatpush1.bf16.msra.mxu0 %v3961_v10  ;;  %4218 = vmatpush1.bf16.msra.mxu1 %v4217_v25  ;;  %v3979_v10 = vpack.c.bf16 %v1619_v9, %v1615_v8  ;;  %v4235_v25 = vpack.c.bf16 %v1621_v12, %v1617_v11  ;;  %v1083_v8 = vmul.f32 %v1064_v49, %v1034_v50  ;;  %v1646_v9 = vld [vmem:[#allocation11 + $0xfc0] sm:$0xff] }
 0x448   :  { %3964 = vmatprep.subr.bf16.mxu0 %v3963_v19  ;;  %4220 = vmatprep.subr.bf16.mxu1 %v4219_v17  ;;  %v1623_v19 = vld [vmem:[#allocation11 + $0xf08] sm:$0xff]  ;;  %v4249_v30 = vpack.c.bf16 %v1644_v59, %v1640_v58  ;;  %v4251_v12 = vpack.c.bf16 %v1653_v6, %v1649_v38  ;;  %v2410_v59 = vld [vmem:[#allocation17 + $0xd0] sm:$0xff] }
 0x449   :  { %v1627_v17 = vld [vmem:[#allocation11 + $0xf28] sm:$0xff] }
 0x44a   :  { %v3983_v26 = vpack.c.bf16 %v1627_v17, %v1623_v19  ;;  %v1132_v19 = vadd.f32 %v1113_v40, %v1083_v8  ;;  %v2407_v49 = vld [vmem:[#allocation17 + $0xb8] sm:$0xff]  ;;  %v2408_v58 = vld [vmem:[#allocation17 + $0xc0] sm:$0xff]  ;;  %v2421_v40 = vld [vmem:[#allocation17 + $0x128] sm:$0xff] }
 0x44b   :  { %3966 = vmatpush1.bf16.msra.mxu0 %v3965_v27  ;;  %4222 = vmatpush1.bf16.msra.mxu1 %v4221_v28  ;;  %v4239_v27 = vpack.c.bf16 %v1629_v20, %v1625_v53  ;;  %v1624_v28 = vld [vmem:[#allocation11 + $0xf10] sm:$0xff]  ;;  %v2386_v20 = vld [vmem:[#allocation17 + $0x10] sm:$0xff]  ;;  %v2415_v38 = vld [vmem:[#allocation17 + $0xf8] sm:$0xff] }
 0x44c   :  { %3968 = vmatprep.subr.bf16.mxu0 %v3967_v31  ;;  %4224 = vmatprep.subr.bf16.mxu1 %v4223_v32  ;;  %v1635_v31 = vld [vmem:[#allocation11 + $0xf68] sm:$0xff]  ;;  %v1633_v32 = vld [vmem:[#allocation11 + $0xf58] sm:$0xff]  ;;  %v4241_v36 = vpack.c.bf16 %v1628_v44, %v1624_v28  ;;  %v1140_v43 = vmax.f32 %v1132_v19, 0.0 }
 0x44d   :  { %v3987_v42 = vpack.c.bf16 %v1635_v31, %v1631_v24  ;;  %v2384_v53 = vld [vmem:[#allocation17] sm:$0xff]  ;;  %v2393_v28 = vld [vmem:[#allocation17 + $0x48] sm:$0xff]  ;;  %v2395_v44 = vld [vmem:[#allocation17 + $0x58] sm:$0xff] }
 0x44e   :  { %v4257_v23 = vpack.c.bf16 %v2386_v20, %v2384_v53  ;;  %v4263_v24 = vpack.c.bf16 %v2395_v44, %v2393_v28  ;;  %v2392_v31 = vld [vmem:[#allocation17 + $0x40] sm:$0xff]  ;;  %v2427_v53 = vld [vmem:[#allocation17 + $0x158] sm:$0xff]  ;;  %v2433_v44 = vld [vmem:[#allocation17 + $0x188] sm:$0xff] }
 0x44f   :  { %3970 = vmatpush1.bf16.msra.mxu0 %v3969_v2  ;;  %4226 = vmatpush1.bf16.msra.mxu1 %v4225_v48  ;;  %v4243_v2 = vpack.c.bf16 %v1637_v33, %v1633_v32  ;;  %v1632_v48 = vld [vmem:[#allocation11 + $0xf50] sm:$0xff]  ;;  %v2394_v32 = vld [vmem:[#allocation17 + $0x50] sm:$0xff] }
 0x450   :  { %3972 = vmatprep.subr.bf16.mxu0 %v3971_v60  ;;  %4228 = vmatprep.subr.bf16.mxu1 %v4227_v46  ;;  %v1643_v60 = vld [vmem:[#allocation11 + $0xfa8] sm:$0xff]  ;;  %v1641_v46 = vld [vmem:[#allocation11 + $0xf98] sm:$0xff]  ;;  %v4245_v52 = vpack.c.bf16 %v1636_v45, %v1632_v48  ;;  %v4265_v33 = vpack.c.bf16 %v2394_v32, %v2392_v31 }
 0x451   :  { %v2403_v48 = vld [vmem:[#allocation17 + $0x98] sm:$0xff]  ;;  %v2412_v8 = vld [vmem:[#allocation17 + $0xe0] sm:$0xff] }
 0x452   :  { %v2432_v32 = vld [vmem:[#allocation17 + $0x180] sm:$0xff] }
 0x453   :  { %3974 = vmatpush1.bf16.msra.mxu0 %v3973_v35  ;;  %4230 = vmatpush1.bf16.msra.mxu1 %v4229_v57  ;;  %v3991_v35 = vpack.c.bf16 %v1643_v60, %v1639_v5  ;;  %v4247_v57 = vpack.c.bf16 %v1645_v47, %v1641_v46  ;;  %v2400_v5 = vld [vmem:[#allocation17 + $0x80] sm:$0xff]  ;;  %v2402_v60 = vld [vmem:[#allocation17 + $0x90] sm:$0xff]  ;;  %v2405_v47 = vld [vmem:[#allocation17 + $0xa8] sm:$0xff] }
 0x454   :  { %3976 = vmatprep.subr.bf16.mxu0 %v3975_v3  ;;  %4232 = vmatprep.subr.bf16.mxu1 %v4231_v4  ;;  %v1647_v3 = vld [vmem:[#allocation11 + $0xfc8] sm:$0xff]  ;;  %v4273_v46 = vpack.c.bf16 %v2402_v60, %v2400_v5  ;;  %v4275_v50 = vpack.c.bf16 %v2407_v49, %v2405_v47  ;;  %v2445_v49 = vld [vmem:[#allocation17 + $0x1e8] sm:$0xff] }
 0x455   :  { %v1651_v4 = vld [vmem:[#allocation11 + $0xfe8] sm:$0xff] }
 0x456   :  { %v3995_v11 = vpack.c.bf16 %v1651_v4, %v1647_v3  ;;  %v4281_v3 = vpack.c.bf16 %v2410_v59, %v2408_v58  ;;  %v2413_v4 = vld [vmem:[#allocation17 + $0xe8] sm:$0xff]  ;;  %v2440_v60 = vld [vmem:[#allocation17 + $0x1c0] sm:$0xff]  ;;  %v1654_v59 = vld [vmem:[#allocation13] sm:$0xf] }
 0x457   :  { %3978 = vmatpush1.bf16.msra.mxu0 %v3977_v13  ;;  %4234 = vmatpush1.bf16.msra.mxu1 %v4233_v14  ;;  %v1650_v13 = vld [vmem:[#allocation11 + $0xfe0] sm:$0xff]  ;;  %v1648_v14 = vld [vmem:[#allocation11 + $0xfd0] sm:$0xff]  ;;  %v4283_v6 = vpack.c.bf16 %v2415_v38, %v2413_v4  ;;  %v1669_v4 = vrot.slane %v1654_v59, %v5732_v22  ;;  %v1665_v38 = vrot.slane %v1654_v59, %v5718_v63 }
 0x458   :  { %3980 = vmatprep.subr.bf16.mxu0 %v3979_v10  ;;  %4236 = vmatprep.subr.bf16.mxu1 %v4235_v25  ;;  %v2385_v10 = vld [vmem:[#allocation17 + $0x8] sm:$0xff]  ;;  %v2387_v25 = vld [vmem:[#allocation17 + $0x18] sm:$0xff]  ;;  %v3997_v41 = vpack.c.bf16 %v1650_v13, %v1646_v9  ;;  %v4253_v18 = vpack.c.bf16 %v1652_v15, %v1648_v14  ;;  %v2416_v13 = vld [vmem:[#allocation17 + $0x100] sm:$0xff] }
 0x459   :  { %v4255_v17 = vpack.c.bf16 %v2387_v25, %v2385_v10  ;;  %v2417_v9 = vld [vmem:[#allocation17 + $0x108] sm:$0xff]  ;;  %v2418_v14 = vld [vmem:[#allocation17 + $0x110] sm:$0xff]  ;;  %v2423_v10 = vld [vmem:[#allocation17 + $0x138] sm:$0xff] }
 0x45a   :  { %v4289_v15 = vpack.c.bf16 %v2418_v14, %v2416_v13  ;;  %v4291_v25 = vpack.c.bf16 %v2423_v10, %v2421_v40 }
 0x45b   :  { %3982 = vmatpush1.bf16.msra.mxu0 %v3981_v21  ;;  %4238 = vmatpush1.bf16.msra.mxu1 %v4237_v62  ;;  %v2389_v21 = vld [vmem:[#allocation17 + $0x28] sm:$0xff]  ;;  %v2391_v62 = vld [vmem:[#allocation17 + $0x38] sm:$0xff] }
 0x45c   :  { %3984 = vmatprep.subr.bf16.mxu0 %v3983_v26  ;;  %4240 = vmatprep.subr.bf16.mxu1 %v4239_v27  ;;  %v4259_v29 = vpack.c.bf16 %v2391_v62, %v2389_v21  ;;  %v2390_v26 = vld [vmem:[#allocation17 + $0x30] sm:$0xff]  ;;  %v2424_v21 = vld [vmem:[#allocation17 + $0x140] sm:$0xff] }
 0x45d   :  { %v4261_v27 = vpack.c.bf16 %v2390_v26, %v2388_v16  ;;  %v2426_v62 = vld [vmem:[#allocation17 + $0x150] sm:$0xff]  ;;  %v2428_v26 = vld [vmem:[#allocation17 + $0x160] sm:$0xff] }
 0x45f   :  { %3986 = vmatpush1.bf16.msra.mxu0 %v3985_v34  ;;  %4242 = vmatpush1.bf16.msra.mxu1 %v4241_v36  ;;  %v2397_v34 = vld [vmem:[#allocation17 + $0x68] sm:$0xff]  ;;  %v2399_v36 = vld [vmem:[#allocation17 + $0x78] sm:$0xff] }
 0x460   :  { %3988 = vmatprep.subr.bf16.mxu0 %v3987_v42  ;;  %4244 = vmatprep.subr.bf16.mxu1 %v4243_v2  ;;  %v4267_v1 = vpack.c.bf16 %v2399_v36, %v2397_v34  ;;  %v4269_v42 = vpack.c.bf16 %v2398_v37, %v2396_v56  ;;  %v2401_v2 = vld [vmem:[#allocation17 + $0x88] sm:$0xff]  ;;  %v2436_v37 = vld [vmem:[#allocation17 + $0x1a0] sm:$0xff] }
 0x461   :  { %v4271_v45 = vpack.c.bf16 %v2403_v48, %v2401_v2  ;;  %v2437_v36 = vld [vmem:[#allocation17 + $0x1a8] sm:$0xff] }
 0x462   :  { %v2441_v48 = vld [vmem:[#allocation17 + $0x1c8] sm:$0xff] }
 0x463   :  { %3990 = vmatpush1.bf16.msra.mxu0 %v3989_v51  ;;  %4246 = vmatpush1.bf16.msra.mxu1 %v4245_v52  ;;  %v2404_v51 = vld [vmem:[#allocation17 + $0xa0] sm:$0xff]  ;;  %v2406_v52 = vld [vmem:[#allocation17 + $0xb0] sm:$0xff] }
 0x464   :  { %3992 = vmatprep.subr.bf16.mxu0 %v3991_v35  ;;  %4248 = vmatprep.subr.bf16.mxu1 %v4247_v57  ;;  %v4277_v54 = vpack.c.bf16 %v2406_v52, %v2404_v51  ;;  %v2411_v35 = vld [vmem:[#allocation17 + $0xd8] sm:$0xff]  ;;  %v2444_v51 = vld [vmem:[#allocation17 + $0x1e0] sm:$0xff] }
 0x465   :  { %v4279_v57 = vpack.c.bf16 %v2411_v35, %v2409_v55  ;;  %v2449_v35 = vld [vmem:[#allocation17 + $0x208] sm:$0xff] }
 0x467   :  { %3994 = vmatpush1.bf16.msra.mxu0 %v3993_v39  ;;  %4250 = vmatpush1.bf16.msra.mxu1 %v4249_v30  ;;  %v2414_v39 = vld [vmem:[#allocation17 + $0xf0] sm:$0xff] }
 0x468   :  { %3996 = vmatprep.subr.bf16.mxu0 %v3995_v11  ;;  %4252 = vmatprep.subr.bf16.mxu1 %v4251_v12  ;;  %v4285_v30 = vpack.c.bf16 %v2414_v39, %v2412_v8  ;;  %v2419_v11 = vld [vmem:[#allocation17 + $0x118] sm:$0xff] }
 0x469   :  { %v4287_v12 = vpack.c.bf16 %v2419_v11, %v2417_v9 }
 0x46b   :  { %3998 = vmatpush1.bf16.msra.mxu0 %v3997_v41  ;;  %4254 = vmatpush1.bf16.msra.mxu1 %v4253_v18  ;;  %v2420_v41 = vld [vmem:[#allocation17 + $0x120] sm:$0xff]  ;;  %v2422_v18 = vld [vmem:[#allocation17 + $0x130] sm:$0xff] }
 0x46c   :  { %4256 = vmatprep.subr.bf16.mxu0 %v4255_v17  ;;  %v4293_v19 = vpack.c.bf16 %v2422_v18, %v2420_v41  ;;  %v2425_v17 = vld [vmem:[#allocation17 + $0x148] sm:$0xff] }
 0x46d   :  { %v4295_v20 = vpack.c.bf16 %v2427_v53, %v2425_v17 }
 0x46e   :  { %1956 = vmatmul.mubr.f32.vlgmr.msra.gmra.mrb[0].mxu0 %v1140_v43  ;;  %2240 = vmatmul.mubr.f32.vlgmr.msra.gmra.mrb[8].mxu1 %v1140_v43  ;;  %v2429_v43 = vld [vmem:[#allocation17 + $0x168] sm:$0xff] }
 0x46f   :  { %4258 = vmatpush1.bf16.msra.mxu0 %v4257_v23  ;;  %v4297_v23 = vpack.c.bf16 %v2426_v62, %v2424_v21 }
 0x470   :  { %4260 = vmatprep.subr.bf16.mxu0 %v4259_v29  ;;  %v2431_v29 = vld [vmem:[#allocation17 + $0x178] sm:$0xff] }
 0x471   :  { %v4299_v16 = vpack.c.bf16 %v2431_v29, %v2429_v43 }
 0x473   :  { %4262 = vmatpush1.bf16.msra.mxu0 %v4261_v27  ;;  %v2430_v27 = vld [vmem:[#allocation17 + $0x170] sm:$0xff] }
 0x474   :  { %4264 = vmatprep.subr.bf16.mxu0 %v4263_v24  ;;  %v4301_v28 = vpack.c.bf16 %v2430_v27, %v2428_v26  ;;  %v2435_v24 = vld [vmem:[#allocation17 + $0x198] sm:$0xff] }
 0x475   :  { %v4303_v31 = vpack.c.bf16 %v2435_v24, %v2433_v44 }
 0x477   :  { %4266 = vmatpush1.bf16.msra.mxu0 %v4265_v33  ;;  %v2434_v33 = vld [vmem:[#allocation17 + $0x190] sm:$0xff] }
 0x478   :  { %4268 = vmatprep.subr.bf16.mxu0 %v4267_v1  ;;  %v4305_v34 = vpack.c.bf16 %v2434_v33, %v2432_v32  ;;  %v2439_v1 = vld [vmem:[#allocation17 + $0x1b8] sm:$0xff] }
 0x479   :  { %v4307_v56 = vpack.c.bf16 %v2439_v1, %v2437_v36 }
 0x47b   :  { %4270 = vmatpush1.bf16.msra.mxu0 %v4269_v42  ;;  %v2438_v42 = vld [vmem:[#allocation17 + $0x1b0] sm:$0xff] }
 0x47c   :  { %4272 = vmatprep.subr.bf16.mxu0 %v4271_v45  ;;  %v4309_v2 = vpack.c.bf16 %v2438_v42, %v2436_v37  ;;  %v2443_v45 = vld [vmem:[#allocation17 + $0x1d8] sm:$0xff] }
 0x47d   :  { %v4311_v5 = vpack.c.bf16 %v2443_v45, %v2441_v48 }
 0x47f   :  { %4274 = vmatpush1.bf16.msra.mxu0 %v4273_v46  ;;  %v2442_v46 = vld [vmem:[#allocation17 + $0x1d0] sm:$0xff] }
 0x480   :  { %4276 = vmatprep.subr.bf16.mxu0 %v4275_v50  ;;  %v4313_v47 = vpack.c.bf16 %v2442_v46, %v2440_v60  ;;  %v2447_v50 = vld [vmem:[#allocation17 + $0x1f8] sm:$0xff] }
 0x481   :  { %v4315_v52 = vpack.c.bf16 %v2447_v50, %v2445_v49 }
 0x483   :  { %4278 = vmatpush1.bf16.msra.mxu0 %v4277_v54  ;;  %v2446_v54 = vld [vmem:[#allocation17 + $0x1f0] sm:$0xff] }
 0x484   :  { %4280 = vmatprep.subr.bf16.mxu0 %v4279_v57  ;;  %v4317_v55 = vpack.c.bf16 %v2446_v54, %v2444_v51  ;;  %v2451_v57 = vld [vmem:[#allocation17 + $0x218] sm:$0xff] }
 0x485   :  { %v4319_v58 = vpack.c.bf16 %v2451_v57, %v2449_v35 }
 0x487   :  { %4282 = vmatpush1.bf16.msra.mxu0 %v4281_v3  ;;  %v1661_v3 = vrot.slane %v1654_v59, %v5713_v61 }
 0x488   :  { %4284 = vmatprep.subr.bf16.mxu0 %v4283_v6  ;;  %v1673_v6 = vrot.slane %v1654_v59, %v5725_v7 }
 0x48b   :  { %4286 = vmatpush1.bf16.msra.mxu0 %v4285_v30 }
 0x48c   :  { %4288 = vmatprep.subr.bf16.mxu0 %v4287_v12 }
 0x48f   :  { %4290 = vmatpush1.bf16.msra.mxu0 %v4289_v15 }
 0x490   :  { %4292 = vmatprep.subr.bf16.mxu0 %v4291_v25 }
 0x493   :  { %4294 = vmatpush1.bf16.msra.mxu0 %v4293_v19 }
 0x494   :  { %4296 = vmatprep.subr.bf16.mxu0 %v4295_v20 }
 0x497   :  { %4298 = vmatpush1.bf16.msra.mxu0 %v4297_v23 }
 0x498   :  { %4300 = vmatprep.subr.bf16.mxu0 %v4299_v16 }
 0x49b   :  { %4302 = vmatpush1.bf16.msra.mxu0 %v4301_v28 }
 0x49c   :  { %4304 = vmatprep.subr.bf16.mxu0 %v4303_v31 }
 0x49f   :  { %4306 = vmatpush1.bf16.msra.mxu0 %v4305_v34 }
 0x4a0   :  { %4308 = vmatprep.subr.bf16.mxu0 %v4307_v56 }
 0x4a3   :  { %4310 = vmatpush1.bf16.msra.mxu0 %v4309_v2 }
 0x4a4   :  { %4312 = vmatprep.subr.bf16.mxu0 %v4311_v5 }
 0x4a7   :  { %4314 = vmatpush1.bf16.msra.mxu0 %v4313_v47 }
 0x4a8   :  { %4316 = vmatprep.subr.bf16.mxu0 %v4315_v52 }
 0x4ab   :  { %4318 = vmatpush1.bf16.msra.mxu0 %v4317_v55 }
 0x4ac   :  { %4320 = vmatprep.subr.bf16.mxu0 %v4319_v58 }
 0x541   :  { %v1957_v8 = vpop.f32.mrb[0].mxu0  ;;  %v2241_v39 = vpop.f32.mrb[8].mxu1 }
 0x542   :  { %v4460_v30 = vadd.f32 %v1957_v8, %v1661_v3  ;;  %v4462_v9 = vadd.f32 %v2241_v39, %v1669_v4  ;;  %v1959_v11 = vpop.f32.mrb[1].mxu0  ;;  %v2243_v12 = vpop.f32.mrb[9].mxu1 }
 0x543   :  { %v4461_v13 = vadd.f32 %v1959_v11, %v1665_v38  ;;  %v4463_v14 = vadd.f32 %v2243_v12, %v1673_v6 }
 0x544   :  { %v2246_v15 = vsel %vm866_vm1, %v4460_v30, 0.0  ;;  %v2260_v40 = vsel %vm866_vm1, %v4462_v9, 0.0 }
 0x545   :  { %v2247_v10 = vrot.slane %v2246_v15, 4  ;;  %v2261_v25 = vrot.slane %v2260_v40, 4  ;;  %v2253_v41 = vsel %vm866_vm1, %v4461_v13, 0.0  ;;  %v2267_v18 = vsel %vm866_vm1, %v4463_v14, 0.0 }
 0x546   :  { %v2254_v19 = vrot.slane %v2253_v41, 4  ;;  %v2268_v17 = vrot.slane %v2267_v18, 4 }
 0x547   :  { %v2248_v53 = vadd.f32 %v2247_v10, %v2246_v15  ;;  %v2262_v20 = vadd.f32 %v2261_v25, %v2260_v40 }
 0x548   :  { %v2255_v21 = vadd.f32 %v2254_v19, %v2253_v41  ;;  %v2269_v62 = vadd.f32 %v2268_v17, %v2267_v18 }
 0x549   :  { %v2249_v23 = vrot.slane %v2248_v53, 2  ;;  %v2263_v43 = vrot.slane %v2262_v20, 2 }
 0x54a   :  { %v2256_v29 = vrot.slane %v2255_v21, 2  ;;  %v2270_v16 = vrot.slane %v2269_v62, 2 }
 0x54b   :  { %v2250_v26 = vadd.f32 %v2249_v23, %v2248_v53  ;;  %v2264_v27 = vadd.f32 %v2263_v43, %v2262_v20 }
 0x54c   :  { %v2257_v28 = vadd.f32 %v2256_v29, %v2255_v21  ;;  %v2271_v44 = vadd.f32 %v2270_v16, %v2269_v62 }
 0x54d   :  { %v2251_v24 = vrot.slane %v2250_v26, 1  ;;  %v2265_v31 = vrot.slane %v2264_v27, 1 }
 0x54e   :  { %v2258_v32 = vrot.slane %v2257_v28, 1  ;;  %v2272_v33 = vrot.slane %v2271_v44, 1 }
 0x54f   :  { %v2252_v34 = vadd.f32 %v2251_v24, %v2250_v26  ;;  %v2266_v36 = vadd.f32 %v2265_v31, %v2264_v27  ;;  %v1655_v27 = vld [vmem:[#allocation14] sm:$0xf] }
 0x550   :  { %v2259_v1 = vadd.f32 %v2258_v32, %v2257_v28  ;;  %v2273_v56 = vadd.f32 %v2272_v33, %v2271_v44  ;;  %v2334_v28 = vrot.slane %v1655_v27, %v5713_v61  ;;  %v1656_v44 = vld [vmem:[#allocation16] sm:$0xf]  ;;  %v2342_v31 = vrot.slane %v1655_v27, %v5732_v22 }
 0x551   :  { %v2274_v37 = vmul.f32 0.25, %v2252_v34  ;;  %v2276_v42 = vmul.f32 0.25, %v2266_v36  ;;  %v2338_v34 = vrot.slane %v1655_v27, %v5718_v63 }
 0x552   :  { %v2275_v2 = vmul.f32 0.25, %v2259_v1  ;;  %v2277_v48 = vmul.f32 0.25, %v2273_v56  ;;  %v2359_v56 = vrot.slane %v1656_v44, %v5713_v61 }
 0x553   :  { %v2278_v45 = vsub.f32 %v4460_v30, %v2274_v37  ;;  %v2280_v5 = vsub.f32 %v4462_v9, %v2276_v42  ;;  %v2346_v37 = vrot.slane %v1655_v27, %v5725_v7  ;;  %v2367_v42 = vrot.slane %v1656_v44, %v5732_v22  ;;  %v2455_v22 = vld [vmem:[#allocation17 + $0x238] sm:$0xff]  ;;  %v2473_v27 = vld [vmem:[#allocation17 + $0x2c8] sm:$0xff] }
 0x554   :  { %v2279_v60 = vsub.f32 %v4461_v13, %v2275_v2  ;;  %v5886_v46 = vsub.f32 %v4463_v14, %v2277_v48 }
 0x555   :  { %v2282_v47 = vmul.f32 %v2278_v45, %v2278_v45  ;;  %v2284_v49 = vmul.f32 %v2280_v5, %v2280_v5 }
 0x556   :  { %v2283_v50 = vmul.f32 %v2279_v60, %v2279_v60  ;;  %v2285_v51 = vmul.f32 %v5886_v46, %v5886_v46 }
 0x557   :  { %v2286_v52 = vsel %vm866_vm1, %v2282_v47, 0.0  ;;  %v2300_v54 = vsel %vm866_vm1, %v2284_v49, 0.0  ;;  %v2363_v49 = vrot.slane %v1656_v44, %v5718_v63 }
 0x558   :  { %v2287_v55 = vrot.slane %v2286_v52, 4  ;;  %v2301_v35 = vrot.slane %v2300_v54, 4  ;;  %v2293_v57 = vsel %vm866_vm1, %v2283_v50, 0.0  ;;  %v2307_v58 = vsel %vm866_vm1, %v2285_v51, 0.0 }
 0x559   :  { %v2294_v59 = vrot.slane %v2293_v57, 4  ;;  %v2308_v3 = vrot.slane %v2307_v58, 4 }
 0x55a   :  { %v2288_v4 = vadd.f32 %v2287_v55, %v2286_v52  ;;  %v2302_v38 = vadd.f32 %v2301_v35, %v2300_v54  ;;  %v2448_v55 = vld [vmem:[#allocation17 + $0x200] sm:$0xff] }
 0x55b   :  { %v2295_v6 = vadd.f32 %v2294_v59, %v2293_v57  ;;  %v2309_v8 = vadd.f32 %v2308_v3, %v2307_v58  ;;  %v2453_v59 = vld [vmem:[#allocation17 + $0x228] sm:$0xff] }
 0x55c   :  { %v2289_v39 = vrot.slane %v2288_v4, 2  ;;  %v2303_v30 = vrot.slane %v2302_v38, 2 }
 0x55d   :  { %v2296_v9 = vrot.slane %v2295_v6, 2  ;;  %v2310_v11 = vrot.slane %v2309_v8, 2 }
 0x55e   :  { %v2290_v12 = vadd.f32 %v2289_v39, %v2288_v4  ;;  %v2304_v13 = vadd.f32 %v2303_v30, %v2302_v38  ;;  %v2454_v39 = vld [vmem:[#allocation17 + $0x230] sm:$0xff]  ;;  %v2459_v30 = vld [vmem:[#allocation17 + $0x258] sm:$0xff] }
 0x55f   :  { %v2297_v14 = vadd.f32 %v2296_v9, %v2295_v6  ;;  %v2311_v15 = vadd.f32 %v2310_v11, %v2309_v8  ;;  %v4323_v6 = vpack.c.bf16 %v2455_v22, %v2453_v59  ;;  %v2452_v8 = vld [vmem:[#allocation17 + $0x220] sm:$0xff] }
 0x560   :  { %v2291_v40 = vrot.slane %v2290_v12, 1  ;;  %v2305_v10 = vrot.slane %v2304_v13, 1  ;;  %v4325_v9 = vpack.c.bf16 %v2454_v39, %v2452_v8  ;;  %v2492_v39 = vld [vmem:[#allocation17 + $0x360] sm:$0xff] }
 0x561   :  { %v2298_v25 = vrot.slane %v2297_v14, 1  ;;  %v2312_v41 = vrot.slane %v2311_v15, 1 }
 0x562   :  { %v2292_v18 = vadd.f32 %v2291_v40, %v2290_v12  ;;  %v2306_v19 = vadd.f32 %v2305_v10, %v2304_v13  ;;  %v2456_v12 = vld [vmem:[#allocation17 + $0x240] sm:$0xff]  ;;  %v2458_v13 = vld [vmem:[#allocation17 + $0x250] sm:$0xff] }
 0x563   :  { %v2299_v17 = vadd.f32 %v2298_v25, %v2297_v14  ;;  %v2313_v53 = vadd.f32 %v2312_v41, %v2311_v15  ;;  %v2461_v14 = vld [vmem:[#allocation17 + $0x268] sm:$0xff]  ;;  %v2463_v15 = vld [vmem:[#allocation17 + $0x278] sm:$0xff]  ;;  %v4329_v40 = vpack.c.bf16 %v2458_v13, %v2456_v12  ;;  %v2460_v25 = vld [vmem:[#allocation17 + $0x260] sm:$0xff] }
 0x564   :  { %v2314_v20 = vmul.f32 0.25, %v2292_v18  ;;  %v2316_v21 = vmul.f32 0.25, %v2306_v19  ;;  %v4331_v10 = vpack.c.bf16 %v2463_v15, %v2461_v14  ;;  %v2462_v41 = vld [vmem:[#allocation17 + $0x270] sm:$0xff]  ;;  %v2465_v18 = vld [vmem:[#allocation17 + $0x288] sm:$0xff]  ;;  %v2467_v19 = vld [vmem:[#allocation17 + $0x298] sm:$0xff] }
 0x565   :  { %v2315_v62 = vmul.f32 0.25, %v2299_v17  ;;  %v2317_v23 = vmul.f32 0.25, %v2313_v53  ;;  %v4333_v17 = vpack.c.bf16 %v2462_v41, %v2460_v25  ;;  %v4335_v53 = vpack.c.bf16 %v2467_v19, %v2465_v18  ;;  %v2496_v12 = vld [vmem:[#allocation17 + $0x380] sm:$0xff]  ;;  %v2498_v13 = vld [vmem:[#allocation17 + $0x390] sm:$0xff]  ;;  %v2501_v14 = vld [vmem:[#allocation17 + $0x3a8] sm:$0xff] }
 0x566   :  { %v2318_v43 = vadd.f32 1e-05, %v2314_v20  ;;  %v2320_v29 = vadd.f32 1e-05, %v2316_v21  ;;  %v2464_v20 = vld [vmem:[#allocation17 + $0x280] sm:$0xff]  ;;  %v2466_v21 = vld [vmem:[#allocation17 + $0x290] sm:$0xff] }
 0x567   :  { %v2319_v16 = vadd.f32 1e-05, %v2315_v62  ;;  %v2321_v26 = vadd.f32 1e-05, %v2317_v23  ;;  %v2469_v62 = vld [vmem:[#allocation17 + $0x2a8] sm:$0xff]  ;;  %v2471_v23 = vld [vmem:[#allocation17 + $0x2b8] sm:$0xff] }
 0x568   :  { %4573 = vrsqrt.f32 %v2318_v43  ;;  %v4337_v43 = vpack.c.bf16 %v2466_v21, %v2464_v20  ;;  %v2503_v15 = vld [vmem:[#allocation17 + $0x3b8] sm:$0xff]  ;;  %v2500_v25 = vld [vmem:[#allocation17 + $0x3a0] sm:$0xff]  ;;  %v2502_v41 = vld [vmem:[#allocation17 + $0x3b0] sm:$0xff] }
 0x569   :  { %4575 = vrsqrt.f32 %v2320_v29  ;;  %v4339_v29 = vpack.c.bf16 %v2471_v23, %v2469_v62  ;;  %v2505_v18 = vld [vmem:[#allocation17 + $0x3c8] sm:$0xff]  ;;  %v2507_v19 = vld [vmem:[#allocation17 + $0x3d8] sm:$0xff]  ;;  %v2504_v20 = vld [vmem:[#allocation17 + $0x3c0] sm:$0xff] }
 0x56a   :  { %4577 = vrsqrt.f32 %v2319_v16  ;;  %v2468_v16 = vld [vmem:[#allocation17 + $0x2a0] sm:$0xff]  ;;  %v2506_v21 = vld [vmem:[#allocation17 + $0x3d0] sm:$0xff]  ;;  %v2509_v62 = vld [vmem:[#allocation17 + $0x3e8] sm:$0xff] }
 0x56b   :  { %4579 = vrsqrt.f32 %v2321_v26  ;;  %v2470_v26 = vld [vmem:[#allocation17 + $0x2b0] sm:$0xff]  ;;  %v2511_v23 = vld [vmem:[#allocation17 + $0x3f8] sm:$0xff] }
 0x572   :  { %v4574_v24 = vpop.eup %4573 }
 0x573   :  { %v4576_v32 = vpop.eup %4575  ;;  %v2326_v33 = vmul.f32 %v4574_v24, %v2278_v45  ;;  %v2371_v45 = vrot.slane %v1656_v44, %v5725_v7  ;;  %v2457_v7 = vld [vmem:[#allocation17 + $0x248] sm:$0xff]  ;;  %v4341_v44 = vpack.c.bf16 %v2470_v26, %v2468_v16  ;;  %v2508_v16 = vld [vmem:[#allocation17 + $0x3e0] sm:$0xff]  ;;  %v2510_v26 = vld [vmem:[#allocation17 + $0x3f0] sm:$0xff] }
 0x574   :  { %v4578_v36 = vpop.eup %4577  ;;  %v2328_v1 = vmul.f32 %v4576_v32, %v2280_v5  ;;  %v2450_v5 = vld [vmem:[#allocation17 + $0x210] sm:$0xff]  ;;  %v4327_v11 = vpack.c.bf16 %v2459_v30, %v2457_v7  ;;  %v2497_v7 = vld [vmem:[#allocation17 + $0x388] sm:$0xff]  ;;  %v2499_v30 = vld [vmem:[#allocation17 + $0x398] sm:$0xff] }
 0x575   :  { %v4580_v2 = vpop.eup %4579  ;;  %v2351_v48 = vmul.f32 %v2334_v28, %v2326_v33  ;;  %v2327_v47 = vmul.f32 %v4578_v36, %v2279_v60  ;;  %v4321_v60 = vpack.c.bf16 %v2450_v5, %v2448_v55  ;;  %v2475_v28 = vld [vmem:[#allocation17 + $0x2d8] sm:$0xff]  ;;  %v2474_v32 = vld [vmem:[#allocation17 + $0x2d0] sm:$0xff]  ;;  %v2477_v33 = vld [vmem:[#allocation17 + $0x2e8] sm:$0xff] }
 0x576   :  { %v2353_v50 = vmul.f32 %v2342_v31, %v2328_v1  ;;  %v2329_v51 = vmul.f32 %v4580_v2, %v5886_v46  ;;  %v4343_v24 = vpack.c.bf16 %v2475_v28, %v2473_v27  ;;  %v2472_v31 = vld [vmem:[#allocation17 + $0x2c0] sm:$0xff]  ;;  %v2483_v2 = vld [vmem:[#allocation17 + $0x318] sm:$0xff]  ;;  %v2486_v5 = vld [vmem:[#allocation17 + $0x330] sm:$0xff]  ;;  %v4381_v27 = vpack.c.bf16 %v2510_v26, %v2508_v16 }
 0x577   :  { %v2352_v52 = vmul.f32 %v2338_v34, %v2327_v47  ;;  %v2376_v54 = vadd.f32 %v2359_v56, %v2351_v48  ;;  %v2479_v34 = vld [vmem:[#allocation17 + $0x2f8] sm:$0xff]  ;;  %v4345_v36 = vpack.c.bf16 %v2474_v32, %v2472_v31  ;;  %v2476_v56 = vld [vmem:[#allocation17 + $0x2e0] sm:$0xff] }
 0x578   :  { %v2354_v35 = vmul.f32 %v2346_v37, %v2329_v51  ;;  %v5903_v57 = vadd.f32 %v2367_v42, %v2353_v50  ;;  %v4347_v1 = vpack.c.bf16 %v2479_v34, %v2477_v33  ;;  %v2478_v37 = vld [vmem:[#allocation17 + $0x2f0] sm:$0xff]  ;;  %v2481_v42 = vld [vmem:[#allocation17 + $0x308] sm:$0xff]  ;;  %v2484_v55 = vld [vmem:[#allocation17 + $0x320] sm:$0xff] }
 0x579   :  { %v2377_v58 = vadd.f32 %v2363_v49, %v2352_v52  ;;  %v2380_v38 = vmax.f32 %v2376_v54, 0.0  ;;  %v4349_v48 = vpack.c.bf16 %v2478_v37, %v2476_v56  ;;  %v4351_v47 = vpack.c.bf16 %v2483_v2, %v2481_v42  ;;  %v2480_v49 = vld [vmem:[#allocation17 + $0x300] sm:$0xff]  ;;  %v2482_v50 = vld [vmem:[#allocation17 + $0x310] sm:$0xff]  ;;  %v2485_v51 = vld [vmem:[#allocation17 + $0x328] sm:$0xff] }
 0x57a   :  { %v2379_v3 = vadd.f32 %v2371_v45, %v2354_v35  ;;  %v2487_v45 = vld [vmem:[#allocation17 + $0x338] sm:$0xff]  ;;  %v4353_v52 = vpack.c.bf16 %v2482_v50, %v2480_v49  ;;  %v2489_v35 = vld [vmem:[#allocation17 + $0x348] sm:$0xff]  ;;  %v4357_v59 = vpack.c.bf16 %v2486_v5, %v2484_v55  ;;  %v2382_v28 = vmax.f32 %v5903_v57, 0.0 }
 0x57b   :  { %v2381_v4 = vmax.f32 %v2377_v58, 0.0  ;;  %v4355_v54 = vpack.c.bf16 %v2487_v45, %v2485_v51  ;;  %v2491_v58 = vld [vmem:[#allocation17 + $0x358] sm:$0xff]  ;;  %v2738_v32 = vld [vmem:[#allocation23] sm:$0xff]  ;;  %v2739_v33 = vld [vmem:[#allocation23 + $0x8] sm:$0xff] }
 0x57c   :  { %v2383_v46 = vmax.f32 %v2379_v3, 0.0  ;;  %v4359_v22 = vpack.c.bf16 %v2491_v58, %v2489_v35  ;;  %v2488_v3 = vld [vmem:[#allocation17 + $0x340] sm:$0xff]  ;;  %v4385_v34 = vpack.c.bf16 %v2739_v33, %v2738_v32  ;;  %v2740_v37 = vld [vmem:[#allocation23 + $0x10] sm:$0xff]  ;;  %v2743_v50 = vld [vmem:[#allocation23 + $0x28] sm:$0xff] }
 0x57d   :  { %2590 = vmatprep.mubr.f32.mxu0 %v2381_v4  ;;  %v2490_v4 = vld [vmem:[#allocation17 + $0x350] sm:$0xff]  ;;  %v2741_v42 = vld [vmem:[#allocation23 + $0x18] sm:$0xff]  ;;  %v2742_v49 = vld [vmem:[#allocation23 + $0x20] sm:$0xff] }
 0x57e   :  { %2591 = vmatmul.mubr.f32.vlgmr.msra.gmra.mrb[2].mxu0 %v2380_v38  ;;  %v2495_v38 = vld [vmem:[#allocation17 + $0x378] sm:$0xff]  ;;  %v4389_v2 = vpack.c.bf16 %v2741_v42, %v2740_v37  ;;  %v4393_v51 = vpack.c.bf16 %v2743_v50, %v2742_v49  ;;  %v2762_v58 = vld [vmem:[#allocation23 + $0xc0] sm:$0xff] }
 0x57f   :  { %4322 = vmatpush1.bf16.msra.mxu0 %v4321_v60  ;;  %2661 = vmatprep.mubr.f32.mxu0 %v2383_v46  ;;  %v2493_v60 = vld [vmem:[#allocation17 + $0x368] sm:$0xff]  ;;  %v2494_v46 = vld [vmem:[#allocation17 + $0x370] sm:$0xff]  ;;  %v2745_v5 = vld [vmem:[#allocation23 + $0x38] sm:$0xff] }
 0x580   :  { %4324 = vmatprep.subr.bf16.mxu0 %v4323_v6  ;;  %v4361_v6 = vpack.c.bf16 %v2490_v4, %v2488_v3  ;;  %v4363_v8 = vpack.c.bf16 %v2495_v38, %v2493_v60  ;;  %v2760_v45 = vld [vmem:[#allocation23 + $0xb0] sm:$0xff]  ;;  %v2746_v3 = vld [vmem:[#allocation23 + $0x40] sm:$0xff]  ;;  %v2747_v4 = vld [vmem:[#allocation23 + $0x48] sm:$0xff] }
 0x581   :  { %v2744_v55 = vld [vmem:[#allocation23 + $0x30] sm:$0xff]  ;;  %v4401_v60 = vpack.c.bf16 %v2747_v4, %v2746_v3 }
 0x582   :  { %v4397_v35 = vpack.c.bf16 %v2745_v5, %v2744_v55  ;;  %v2764_v38 = vld [vmem:[#allocation23 + $0xd0] sm:$0xff] }
 0x583   :  { %4326 = vmatpush1.bf16.msra.mxu0 %v4325_v9  ;;  %v4365_v9 = vpack.c.bf16 %v2494_v46, %v2492_v39  ;;  %v2748_v39 = vld [vmem:[#allocation23 + $0x50] sm:$0xff]  ;;  %v2749_v46 = vld [vmem:[#allocation23 + $0x58] sm:$0xff] }
 0x584   :  { %4328 = vmatprep.subr.bf16.mxu0 %v4327_v11  ;;  %v4367_v11 = vpack.c.bf16 %v2499_v30, %v2497_v7  ;;  %v4405_v7 = vpack.c.bf16 %v2749_v46, %v2748_v39  ;;  %v2766_v30 = vld [vmem:[#allocation23 + $0xe0] sm:$0xff]  ;;  %v2514_v39 = vld [vmem:[#allocation22] sm:$0x3] }
 0x587   :  { %4330 = vmatpush1.bf16.msra.mxu0 %v4329_v40  ;;  %v4369_v40 = vpack.c.bf16 %v2498_v13, %v2496_v12  ;;  %v2750_v12 = vld [vmem:[#allocation23 + $0x60] sm:$0xff]  ;;  %v2751_v13 = vld [vmem:[#allocation23 + $0x68] sm:$0xff] }
 0x588   :  { %4332 = vmatprep.subr.bf16.mxu0 %v4331_v10  ;;  %v4371_v10 = vpack.c.bf16 %v2503_v15, %v2501_v14  ;;  %v4409_v14 = vpack.c.bf16 %v2751_v13, %v2750_v12  ;;  %v2768_v15 = vld [vmem:[#allocation23 + $0xf0] sm:$0xff]  ;;  %v2727_v12 = vrot.slane %v2514_v39, %v5713_v61 }
 0x58b   :  { %4334 = vmatpush1.bf16.msra.mxu0 %v4333_v17  ;;  %v4373_v17 = vpack.c.bf16 %v2502_v41, %v2500_v25  ;;  %v2753_v41 = vld [vmem:[#allocation23 + $0x78] sm:$0xff] }
 0x58c   :  { %4336 = vmatprep.subr.bf16.mxu0 %v4335_v53  ;;  %v4375_v53 = vpack.c.bf16 %v2507_v19, %v2505_v18  ;;  %v2512_v19 = vld [vmem:[#allocation19] sm:$0x3] }
 0x58f   :  { %4338 = vmatpush1.bf16.msra.mxu0 %v4337_v43  ;;  %v4377_v43 = vpack.c.bf16 %v2506_v21, %v2504_v20 }
 0x590   :  { %4340 = vmatprep.subr.bf16.mxu0 %v4339_v29  ;;  %v4379_v29 = vpack.c.bf16 %v2511_v23, %v2509_v62 }
 0x593   :  { %4342 = vmatpush1.bf16.msra.mxu0 %v4341_v44  ;;  %v2754_v44 = vld [vmem:[#allocation23 + $0x80] sm:$0xff] }
 0x594   :  { %4344 = vmatprep.subr.bf16.mxu0 %v4343_v24  ;;  %v2755_v24 = vld [vmem:[#allocation23 + $0x88] sm:$0xff] }
 0x595   :  { %v4383_v31 = vpack.c.bf16 %v2755_v24, %v2754_v44 }
 0x597   :  { %4346 = vmatpush1.bf16.msra.mxu0 %v4345_v36  ;;  %4384 = vmatprep.subr.bf16.mxu1 %v4383_v31  ;;  %v2756_v36 = vld [vmem:[#allocation23 + $0x90] sm:$0xff] }
 0x598   :  { %4348 = vmatprep.subr.bf16.mxu0 %v4347_v1  ;;  %4386 = vmatpush3.bf16.msra.mxu1 %v4385_v34  ;;  %v2757_v1 = vld [vmem:[#allocation23 + $0x98] sm:$0xff] }
 0x599   :  { %v4387_v56 = vpack.c.bf16 %v2757_v1, %v2756_v36 }
 0x59b   :  { %4350 = vmatpush1.bf16.msra.mxu0 %v4349_v48  ;;  %4388 = vmatprep.subr.bf16.mxu1 %v4387_v56  ;;  %v2758_v48 = vld [vmem:[#allocation23 + $0xa0] sm:$0xff] }
 0x59c   :  { %4352 = vmatprep.subr.bf16.mxu0 %v4351_v47  ;;  %4390 = vmatpush3.bf16.msra.mxu1 %v4389_v2  ;;  %v2759_v47 = vld [vmem:[#allocation23 + $0xa8] sm:$0xff] }
 0x59d   :  { %v4391_v57 = vpack.c.bf16 %v2759_v47, %v2758_v48 }
 0x59f   :  { %4354 = vmatpush1.bf16.msra.mxu0 %v4353_v52  ;;  %4392 = vmatprep.subr.bf16.mxu1 %v4391_v57  ;;  %v2761_v52 = vld [vmem:[#allocation23 + $0xb8] sm:$0xff] }
 0x5a0   :  { %4356 = vmatprep.subr.bf16.mxu0 %v4355_v54  ;;  %4394 = vmatpush3.bf16.msra.mxu1 %v4393_v51  ;;  %v4395_v54 = vpack.c.bf16 %v2761_v52, %v2760_v45 }
 0x5a2   :  { %4396 = vmatprep.subr.bf16.mxu1 %v4395_v54 }
 0x5a3   :  { %4358 = vmatpush1.bf16.msra.mxu0 %v4357_v59  ;;  %v2763_v59 = vld [vmem:[#allocation23 + $0xc8] sm:$0xff] }
 0x5a4   :  { %4360 = vmatprep.subr.bf16.mxu0 %v4359_v22  ;;  %4398 = vmatpush3.bf16.msra.mxu1 %v4397_v35  ;;  %v4399_v22 = vpack.c.bf16 %v2763_v59, %v2762_v58 }
 0x5a6   :  { %4400 = vmatprep.subr.bf16.mxu1 %v4399_v22 }
 0x5a7   :  { %4362 = vmatpush1.bf16.msra.mxu0 %v4361_v6  ;;  %v2765_v6 = vld [vmem:[#allocation23 + $0xd8] sm:$0xff] }
 0x5a8   :  { %4364 = vmatprep.subr.bf16.mxu0 %v4363_v8  ;;  %4402 = vmatpush3.bf16.msra.mxu1 %v4401_v60  ;;  %v4403_v8 = vpack.c.bf16 %v2765_v6, %v2764_v38 }
 0x5aa   :  { %4404 = vmatprep.subr.bf16.mxu1 %v4403_v8  ;;  %v2513_v8 = vld [vmem:[#allocation20] sm:$0x3] }
 0x5ab   :  { %4366 = vmatpush1.bf16.msra.mxu0 %v4365_v9  ;;  %v2767_v9 = vld [vmem:[#allocation23 + $0xe8] sm:$0xff]  ;;  %v2714_v46 = vrot.slane %v2513_v8, %v5713_v61 }
 0x5ac   :  { %4368 = vmatprep.subr.bf16.mxu0 %v4367_v11  ;;  %4406 = vmatpush3.bf16.msra.mxu1 %v4405_v7  ;;  %v4407_v11 = vpack.c.bf16 %v2767_v9, %v2766_v30  ;;  %v2718_v30 = vrot.slane %v2513_v8, %v5718_v63 }
 0x5ae   :  { %4408 = vmatprep.subr.bf16.mxu1 %v4407_v11 }
 0x5af   :  { %4370 = vmatpush1.bf16.msra.mxu0 %v4369_v40  ;;  %v2769_v40 = vld [vmem:[#allocation23 + $0xf8] sm:$0xff] }
 0x5b0   :  { %4372 = vmatprep.subr.bf16.mxu0 %v4371_v10  ;;  %v2752_v10 = vld [vmem:[#allocation23 + $0x70] sm:$0xff]  ;;  %4410 = vmatpush3.bf16.msra.mxu1 %v4409_v14  ;;  %v4411_v25 = vpack.c.bf16 %v2769_v40, %v2768_v15  ;;  %v2731_v14 = vrot.slane %v2514_v39, %v5718_v63 }
 0x5b1   :  { %v4413_v18 = vpack.c.bf16 %v2753_v41, %v2752_v10 }
 0x5b2   :  { %4412 = vmatprep.subr.bf16.mxu1 %v4411_v25 }
 0x5b3   :  { %4374 = vmatpush1.bf16.msra.mxu0 %v4373_v17  ;;  %v2519_v17 = vrot.slane %v2512_v19, %v5713_v61  ;;  %v5388_v61 = vmov 0.0|0.0  }
 0x5b4   :  { %4376 = vmatprep.subr.bf16.mxu0 %v4375_v53  ;;  %4414 = vmatpush3.bf16.msra.mxu1 %v4413_v18  ;;  %v2523_v53 = vrot.slane %v2512_v19, %v5718_v63  ;;  %v2885_v19 = vld [vmem:[%s6031_s13] sm:$0xff]  ;;  %v2887_v63 = vld [vmem:[%s6031_s13 + $0x10] sm:$0xff] }
 0x5b5   :  { %4415 = vmatprep.subr.bf16.mxu1 %v5388_v61 }
 0x5b7   :  { %4378 = vmatpush1.bf16.msra.mxu0 %v4377_v43 }
 0x5b8   :  { %4380 = vmatprep.subr.bf16.mxu0 %v4379_v29 }
 0x5bb   :  { %4382 = vmatpush1.bf16.msra.mxu0 %v4381_v27 }
 0x5be   :  { %2662 = vmatmul.mubr.f32.vlgmr.msra.gmra.mrb[2].mxu0 %v2382_v28 }
 0x691   :  { %v2663_v20 = vpop.f32.mrb[2].mxu0 }
 0x692   :  { %v4464_v21 = vadd.f32 %v2663_v20, %v2519_v17  ;;  %v2665_v62 = vpop.f32.mrb[3].mxu0  ;;  %v2886_v17 = vld [vmem:[%s6031_s13 + $0x8] sm:$0xff]  ;;  %v2888_v20 = vld [vmem:[%s6031_s13 + $0x18] sm:$0xff] }
 0x693   :  { %v4465_v23 = vadd.f32 %v2665_v62, %v2523_v53  ;;  %v4416_v53 = vpack.c.bf16 %v2886_v17, %v2885_v19  ;;  %v2889_v62 = vld [vmem:[%s6031_s13 + $0x20] sm:$0xff]  ;;  %v3022_v19 = vld [vmem:[%s6032_s21 + $0x28] sm:$0xff] }
 0x694   :  { %v2668_v43 = vsel %vm866_vm1, %v4464_v21, 0.0 }
 0x695   :  { %v2669_v29 = vrot.slane %v2668_v43, 4  ;;  %v2675_v16 = vsel %vm866_vm1, %v4465_v23, 0.0 }
 0x696   :  { %v2676_v26 = vrot.slane %v2675_v16, 4 }
 0x697   :  { %v2670_v27 = vadd.f32 %v2669_v29, %v2668_v43  ;;  %v2891_v29 = vld [vmem:[%s6031_s13 + $0x30] sm:$0xff] }
 0x698   :  { %v2677_v28 = vadd.f32 %v2676_v26, %v2675_v16  ;;  %v2892_v16 = vld [vmem:[%s6031_s13 + $0x38] sm:$0xff] }
 0x699   :  { %v2671_v44 = vrot.slane %v2670_v27, 2  ;;  %v4425_v26 = vpack.c.bf16 %v2892_v16, %v2891_v29 }
 0x69a   :  { %v2678_v24 = vrot.slane %v2677_v28, 2 }
 0x69b   :  { %v2672_v31 = vadd.f32 %v2671_v44, %v2670_v27  ;;  %v2893_v27 = vld [vmem:[%s6031_s13 + $0x40] sm:$0xff] }
 0x69c   :  { %v2679_v32 = vadd.f32 %v2678_v24, %v2677_v28  ;;  %v2894_v28 = vld [vmem:[%s6031_s13 + $0x48] sm:$0xff]  ;;  %v2895_v24 = vld [vmem:[%s6031_s13 + $0x50] sm:$0xff] }
 0x69d   :  { %v2673_v33 = vrot.slane %v2672_v31, 1  ;;  %v4428_v44 = vpack.c.bf16 %v2894_v28, %v2893_v27 }
 0x69e   :  { %v2680_v34 = vrot.slane %v2679_v32, 1 }
 0x69f   :  { %v2674_v36 = vadd.f32 %v2673_v33, %v2672_v31  ;;  %v2896_v31 = vld [vmem:[%s6031_s13 + $0x58] sm:$0xff]  ;;  %v2897_v33 = vld [vmem:[%s6031_s13 + $0x60] sm:$0xff] }
 0x6a0   :  { %v2681_v1 = vadd.f32 %v2680_v34, %v2679_v32  ;;  %v4431_v32 = vpack.c.bf16 %v2896_v31, %v2895_v24  ;;  %v2898_v34 = vld [vmem:[%s6031_s13 + $0x68] sm:$0xff] }
 0x6a1   :  { %v2682_v56 = vmul.f32 0.25, %v2674_v36  ;;  %v4434_v36 = vpack.c.bf16 %v2898_v34, %v2897_v33 }
 0x6a2   :  { %v2683_v37 = vmul.f32 0.25, %v2681_v1  ;;  %v2899_v1 = vld [vmem:[%s6031_s13 + $0x70] sm:$0xff] }
 0x6a3   :  { %v2684_v42 = vsub.f32 %v4464_v21, %v2682_v56  ;;  %v4419_v21 = vpack.c.bf16 %v2888_v20, %v2887_v63  ;;  %v2900_v56 = vld [vmem:[%s6031_s13 + $0x78] sm:$0xff] }
 0x6a4   :  { %v2685_v2 = vsub.f32 %v4465_v23, %v2683_v37  ;;  %v2890_v23 = vld [vmem:[%s6031_s13 + $0x28] sm:$0xff]  ;;  %v4437_v37 = vpack.c.bf16 %v2900_v56, %v2899_v1  ;;  %v3024_v63 = vld [vmem:[%s6032_s21 + $0x38] sm:$0xff] }
 0x6a5   :  { %v2686_v48 = vmul.f32 %v2684_v42, %v2684_v42  ;;  %v4422_v43 = vpack.c.bf16 %v2890_v23, %v2889_v62 }
 0x6a6   :  { %v2687_v47 = vmul.f32 %v2685_v2, %v2685_v2 }
 0x6a7   :  { %v2688_v57 = vsel %vm866_vm1, %v2686_v48, 0.0 }
 0x6a8   :  { %v2689_v49 = vrot.slane %v2688_v57, 4  ;;  %v2695_v50 = vsel %vm866_vm1, %v2687_v47, 0.0 }
 0x6a9   :  { %v2696_v51 = vrot.slane %v2695_v50, 4 }
 0x6aa   :  { %v2690_v45 = vadd.f32 %v2689_v49, %v2688_v57 }
 0x6ab   :  { %v2697_v52 = vadd.f32 %v2696_v51, %v2695_v50 }
 0x6ac   :  { %v2691_v54 = vrot.slane %v2690_v45, 2 }
 0x6ad   :  { %v2698_v55 = vrot.slane %v2697_v52, 2 }
 0x6ae   :  { %v2692_v5 = vadd.f32 %v2691_v54, %v2690_v45 }
 0x6af   :  { %v2699_v35 = vadd.f32 %v2698_v55, %v2697_v52 }
 0x6b0   :  { %v2693_v58 = vrot.slane %v2692_v5, 1 }
 0x6b1   :  { %v2700_v59 = vrot.slane %v2699_v35, 1 }
 0x6b2   :  { %v2694_v22 = vadd.f32 %v2693_v58, %v2692_v5 }
 0x6b3   :  { %v2701_v3 = vadd.f32 %v2700_v59, %v2699_v35 }
 0x6b4   :  { %v2702_v4 = vmul.f32 0.25, %v2694_v22 }
 0x6b5   :  { %v2703_v60 = vmul.f32 0.25, %v2701_v3 }
 0x6b6   :  { %v2704_v38 = vadd.f32 1e-05, %v2702_v4 }
 0x6b7   :  { %v2705_v6 = vadd.f32 1e-05, %v2703_v60 }
 0x6b8   :  { %4581 = vrsqrt.f32 %v2704_v38 }
 0x6b9   :  { %4583 = vrsqrt.f32 %v2705_v6 }
 0x6c2   :  { %v4582_v7 = vpop.eup %4581 }
 0x6c3   :  { %v4584_v9 = vpop.eup %4583  ;;  %v2708_v11 = vmul.f32 %v4582_v7, %v2684_v42  ;;  %v3544_v7 = vld [vmem:[#allocation26] ss:$0 sm:$0xff] }
 0x6c4   :  { %v2709_v13 = vmul.f32 %v4584_v9, %v2685_v2  ;;  %v3543_v2 = vld [vmem:[#allocation25] ss:$0 sm:$0xff]  ;;  %v3545_v9 = vld [vmem:[#allocation28] ss:$0 sm:$0xff] }
 0x6c5   :  { %v2721_v15 = vmul.f32 %v2714_v46, %v2708_v11 }
 0x6c6   :  { %v2722_v40 = vmul.f32 %v2718_v30, %v2709_v13 }
 0x6c7   :  { %v2734_v10 = vadd.f32 %v2727_v12, %v2721_v15  ;;  %v3018_v15 = vld [vmem:[%s6032_s21 + $0x8] sm:$0xff] }
 0x6c8   :  { %v2735_v25 = vadd.f32 %v2731_v14, %v2722_v40  ;;  %v3017_v14 = vld [vmem:[%s6032_s21] sm:$0xff] }
 0x6c9   :  { %v2736_v18 = vmax.f32 %v2734_v10, 0.0  ;;  %v4440_v40 = vpack.c.bf16 %v3018_v15, %v3017_v14  ;;  %v3019_v10 = vld [vmem:[%s6032_s21 + $0x10] sm:$0xff] }
 0x6ca   :  { %v2737_v41 = vmax.f32 %v2735_v25, 0.0  ;;  %v3020_v25 = vld [vmem:[%s6032_s21 + $0x18] sm:$0xff] }
 0x6cc   :  { %2843 = vmatprep.mubr.f32.mxu1 %v2737_v41  ;;  %v4443_v41 = vpack.c.bf16 %v3020_v25, %v3019_v10 }
 0x6cd   :  { %2844 = vmatmul.mubr.f32.vlgmr.msra.gmra.mrb[10].mxu1 %v2736_v18  ;;  %v3021_v18 = vld [vmem:[%s6032_s21 + $0x20] sm:$0xff] }
 0x6ce   :  { %4417 = vmatpush3.bf16.msra.mxu1 %v4416_v53  ;;  %3666 = vmatprep.mubr.msk.f32.mxu1 %vm5389_vm2, %v5387_v0  ;;  %v4446_v17 = vpack.c.bf16 %v3022_v19, %v3021_v18  ;;  %v3023_v53 = vld [vmem:[%s6032_s21 + $0x30] sm:$0xff] }
 0x6cf   :  { %4418 = vmatprep.subr.bf16.mxu1 %v5388_v61  ;;  %v4449_v20 = vpack.c.bf16 %v3024_v63, %v3023_v53  ;;  %v3551_v53 = vld [vmem:[#allocation35] ss:$0 sm:$0xff] }
 0x6d2   :  { %4420 = vmatpush3.bf16.msra.mxu1 %v4419_v21  ;;  %v3546_v21 = vld [vmem:[#allocation29] ss:$0 sm:$0xff] }
 0x6d3   :  { %4421 = vmatprep.subr.bf16.mxu1 %v5388_v61 }
 0x6d6   :  { %4423 = vmatpush3.bf16.msra.mxu1 %v4422_v43 }
 0x6d7   :  { %4424 = vmatprep.subr.bf16.mxu1 %v5388_v61 }
 0x6da   :  { %4426 = vmatpush3.bf16.msra.mxu1 %v4425_v26 }
 0x6db   :  { %4427 = vmatprep.subr.bf16.mxu1 %v5388_v61 }
 0x6de   :  { %4429 = vmatpush3.bf16.msra.mxu1 %v4428_v44 }
 0x6df   :  { %4430 = vmatprep.subr.bf16.mxu1 %v5388_v61 }
 0x6e2   :  { %4432 = vmatpush3.bf16.msra.mxu1 %v4431_v32 }
 0x6e3   :  { %4433 = vmatprep.subr.bf16.mxu1 %v5388_v61 }
 0x6e6   :  { %4435 = vmatpush3.bf16.msra.mxu1 %v4434_v36 }
 0x6e7   :  { %4436 = vmatprep.subr.bf16.mxu1 %v5388_v61 }
 0x6ea   :  { %4438 = vmatpush3.bf16.msra.mxu1 %v4437_v37 }
 0x6eb   :  { %4439 = vmatprep.subr.bf16.mxu1 %v5388_v61 }
 0x7a0   :  { %v3595_v42 = vpop.f32.mrb[10].mxu1 }
 0x7a1   :  { %v3596_v48 = vpop.f32.mrb[11].mxu1 }
 0x7a2   :  { %v3597_v47 = vadd.f32 %v3596_v48, %v3595_v42 }
 0x7a4   :  { %v2846_v57 = vadd.f32 %v3597_v47, %v3543_v2 }
 0x7a6   :  { %v2849_v49 = vsel %vm866_vm1, %v2846_v57, 0.0 }
 0x7a7   :  { %v2850_v50 = vrot.slane %v2849_v49, 4 }
 0x7a9   :  { %v2851_v51 = vadd.f32 %v2850_v50, %v2849_v49  ;;  %v3547_v49 = vld [vmem:[#allocation31] ss:$0 sm:$0xff] }
 0x7ab   :  { %v2852_v45 = vrot.slane %v2851_v51, 2 }
 0x7ad   :  { %v2853_v52 = vadd.f32 %v2852_v45, %v2851_v51  ;;  %v3548_v51 = vld [vmem:[#allocation32] ss:$0 sm:$0xff] }
 0x7af   :  { %v2854_v54 = vrot.slane %v2853_v52, 1 }
 0x7b1   :  { %v2855_v55 = vadd.f32 %v2854_v54, %v2853_v52 }
 0x7b3   :  { %v2856_v5 = vmul.f32 0.25, %v2855_v55  ;;  %v3145_v55 = vld [vmem:[%s6033_s18] sm:$0xff] }
 0x7b5   :  { %v2857_v35 = vsub.f32 %v2846_v57, %v2856_v5  ;;  %v3146_v5 = vld [vmem:[%s6033_s18 + $0x8] sm:$0xff] }
 0x7b7   :  { %v2858_v58 = vmul.f32 %v2857_v35, %v2857_v35 }
 0x7b9   :  { %v2859_v59 = vsel %vm866_vm1, %v2858_v58, 0.0  ;;  %v3147_v58 = vld [vmem:[%s6033_s18 + $0x10] sm:$0xff] }
 0x7ba   :  { %v2860_v22 = vrot.slane %v2859_v59, 4 }
 0x7bc   :  { %v2861_v3 = vadd.f32 %v2860_v22, %v2859_v59  ;;  %v3148_v59 = vld [vmem:[%s6033_s18 + $0x18] sm:$0xff] }
 0x7bd   :  { %v4455_v22 = vpack.c.bf16 %v3148_v59, %v3147_v58 }
 0x7be   :  { %v2862_v4 = vrot.slane %v2861_v3, 2 }
 0x7c0   :  { %v2863_v60 = vadd.f32 %v2862_v4, %v2861_v3  ;;  %v3549_v3 = vld [vmem:[#allocation34] ss:$0 sm:$0xff] }
 0x7c2   :  { %v2864_v38 = vrot.slane %v2863_v60, 1 }
 0x7c4   :  { %v2865_v6 = vadd.f32 %v2864_v38, %v2863_v60 }
 0x7c6   :  { %v2866_v8 = vmul.f32 0.25, %v2865_v6 }
 0x7c8   :  { %v2867_v39 = vadd.f32 1e-05, %v2866_v8 }
 0x7ca   :  { %4585 = vrsqrt.f32 %v2867_v39 }
 0x7d4   :  { %v4586_v46 = vpop.eup %4585 }
 0x7d5   :  { %v2869_v30 = vmul.f32 %v4586_v46, %v2857_v35  ;;  %v4452_v35 = vpack.c.bf16 %v3146_v5, %v3145_v55  ;;  %v3555_v55 = vld [vmem:[#allocation40] ss:$0 sm:$0xff] }
 0x7d7   :  { %v2876_v11 = vmul.f32 %v3544_v7, %v2869_v30 }
 0x7d9   :  { %v2883_v12 = vadd.f32 %v3545_v9, %v2876_v11 }
 0x7db   :  { %v2884_v13 = vmax.f32 %v2883_v12, 0.0 }
 0x7dd   :  { %3667 = vmatmul.mubr.f32.vlgmr.msra.gmra.mrb[12].mxu1 %v2884_v13 }
 0x7de   :  { %3685 = vmatprep.mubr.msk.f32.mxu1 %vm5389_vm2, %v5387_v0  ;;  %4441 = vmatpush3.bf16.msra.mxu1 %v4440_v40 }
 0x7df   :  { %4442 = vmatprep.subr.bf16.mxu1 %v5388_v61 }
 0x7e2   :  { %4444 = vmatpush3.bf16.msra.mxu1 %v4443_v41 }
 0x7e3   :  { %4445 = vmatprep.subr.bf16.mxu1 %v5388_v61 }
 0x7e6   :  { %4447 = vmatpush3.bf16.msra.mxu1 %v4446_v17 }
 0x7e7   :  { %4448 = vmatprep.subr.bf16.mxu1 %v5388_v61 }
 0x7ea   :  { %4450 = vmatpush3.bf16.msra.mxu1 %v4449_v20  ;;  %v3552_v20 = vld [vmem:[#allocation37] ss:$0 sm:$0xff] }
 0x7eb   :  { %4451 = vmatprep.subr.bf16.mxu1 %v5388_v61 }
 0x8b0   :  { %v2976_v62 = vpop.f32.mrb[12].mxu1 }
 0x8b1   :  { %v2977_v23 = vadd.f32 %v3546_v21, %v2976_v62  ;;  %v3668_v43 = vpop.f32.mrb[13].mxu1 }
 0x8b2   :  { %v3268_v43 = vld [vmem:[%s6034_s29] sm:$0xff] }
 0x8b3   :  { %v2981_v29 = vsel %vm2980_vm3, %v2977_v23, 0.0 }
 0x8b4   :  { %v2982_v16 = vrot.slane %v2981_v29, 4 }
 0x8b6   :  { %v2983_v26 = vadd.f32 %v2982_v16, %v2981_v29  ;;  %v3269_v29 = vld [vmem:[%s6034_s29 + $0x8] sm:$0xff] }
 0x8b7   :  { %v4458_v16 = vpack.c.bf16 %v3269_v29, %v3268_v43  ;;  %v3561_v43 = vld [vmem:[#allocation47] ss:$0 sm:$0xff] }
 0x8b8   :  { %v2984_v27 = vrot.slane %v2983_v26, 2 }
 0x8ba   :  { %v2985_v28 = vadd.f32 %v2984_v27, %v2983_v26  ;;  %v3553_v26 = vld [vmem:[#allocation38] ss:$0 sm:$0xff] }
 0x8bc   :  { %v2986_v44 = vrot.slane %v2985_v28, 1 }
 0x8be   :  { %v2987_v24 = vadd.f32 %v2986_v44, %v2985_v28 }
 0x8c0   :  { %v2988_v31 = vmul.f32 0.25, %v2987_v24 }
 0x8c2   :  { %v2989_v32 = vsub.f32 %v2977_v23, %v2988_v31 }
 0x8c4   :  { %v2990_v33 = vmul.f32 %v2989_v32, %v2989_v32 }
 0x8c6   :  { %v2991_v34 = vsel %vm2980_vm3, %v2990_v33, 0.0 }
 0x8c7   :  { %v2992_v36 = vrot.slane %v2991_v34, 4 }
 0x8c9   :  { %v2993_v1 = vadd.f32 %v2992_v36, %v2991_v34 }
 0x8cb   :  { %v2994_v56 = vrot.slane %v2993_v1, 2 }
 0x8cd   :  { %v2995_v37 = vadd.f32 %v2994_v56, %v2993_v1 }
 0x8cf   :  { %v2996_v42 = vrot.slane %v2995_v37, 1 }
 0x8d1   :  { %v2997_v2 = vadd.f32 %v2996_v42, %v2995_v37 }
 0x8d3   :  { %v2998_v48 = vmul.f32 0.25, %v2997_v2 }
 0x8d5   :  { %v2999_v47 = vadd.f32 1e-05, %v2998_v48 }
 0x8d7   :  { %4587 = vrsqrt.f32 %v2999_v47 }
 0x8e1   :  { %v4588_v57 = vpop.eup %4587 }
 0x8e2   :  { %v3001_v50 = vmul.f32 %v4588_v57, %v2989_v32 }
 0x8e4   :  { %v3008_v45 = vmul.f32 %v3547_v49, %v3001_v50 }
 0x8e6   :  { %v3015_v52 = vadd.f32 %v3548_v51, %v3008_v45 }
 0x8e8   :  { %v3016_v54 = vmax.f32 %v3015_v52, 0.0 }
 0x8ea   :  { %3686 = vmatmul.mubr.msk.f32.vlgmr.msra.gmra.mrb[14].mxu1 %vm3034_vm4, %v3016_v54 }
 0x8eb   :  { %3696 = vmatprep.mubr.msk.f32.mxu1 %vm5389_vm2, %v5387_v0  ;;  %4453 = vmatpush3.bf16.msra.mxu1 %v4452_v35  ;;  %v3556_v35 = vld [vmem:[#allocation41] ss:$0 sm:$0xff] }
 0x8ec   :  { %4454 = vmatprep.subr.bf16.mxu1 %v5388_v61 }
 0x8ef   :  { %4456 = vmatpush3.bf16.msra.mxu1 %v4455_v22 }
 0x8f0   :  { %4457 = vmatprep.subr.bf16.mxu1 %v5388_v61 }
 0x9bd   :  { %v3104_v4 = vpop.f32.mrb[14].mxu1 }
 0x9be   :  { %v3105_v60 = vadd.f32 %v3549_v3, %v3104_v4  ;;  %v3687_v38 = vpop.f32.mrb[15].mxu1  ;;  %v3390_v3 = vld [vmem:[%s5564_s4] sm:$0xff]  ;;  %s5390_s4 = smov [#allocation49]  }
 0x9bf   :  { %v3557_v4 = vld [vmem:[#allocation43] ss:$0 sm:$0xff]  ;;  %s3480_s0 = sshll.u32 %s5390_s4, 4  ;;  %s3481_s0 = int_to_ptr.vmem [resolvable:$true] %s3480_s0 }
 0x9c0   :  { %v3109_v6 = vsel %vm3108_vm5, %v3105_v60, 0.0  ;;  %s5258_s12 = scalar_lea.vmem %s3481_s0, 64  ;;  %p5263_p3 = scmp.lt.s32.totalorder %s3481_s0, %s3481_s0 }
 0x9c1   :  { %v3110_v8 = vrot.slane %v3109_v6, 4  ;;  %p5259_p2 = scmp.ne.s32.totalorder %s3481_s0, %s5258_s12  ;;  %p5264_p4 = scmp.lt.s32.totalorder %s5258_s12, %s5258_s12 }
 0x9c3   :  { %v3111_v39 = vadd.f32 %v3110_v8, %v3109_v6  ;;  %p5265_p5 = por %p5264_p4, %p5263_p3 }
 0x9c5   :  { %v3112_v46 = vrot.slane %v3111_v39, 2  ;;  %p5266_p6 = pnand %p5265_p5, %p5259_p2 }
 0x9c7   :  { %v3113_v7 = vadd.f32 %v3112_v46, %v3111_v39 }
 0x9c9   :  { %v3114_v30 = vrot.slane %v3113_v7, 1 }
 0x9cb   :  { %v3115_v9 = vadd.f32 %v3114_v30, %v3113_v7 }
 0x9cd   :  { %v3116_v11 = vmul.f32 0.25, %v3115_v9 }
 0x9cf   :  { %v3117_v12 = vsub.f32 %v3105_v60, %v3116_v11 }
 0x9d1   :  { %v3118_v13 = vmul.f32 %v3117_v12, %v3117_v12 }
 0x9d3   :  { %v3119_v14 = vsel %vm3108_vm5, %v3118_v13, 0.0 }
 0x9d4   :  { %v3120_v15 = vrot.slane %v3119_v14, 4 }
 0x9d6   :  { %v3121_v40 = vadd.f32 %v3120_v15, %v3119_v14 }
 0x9d8   :  { %v3122_v10 = vrot.slane %v3121_v40, 2 }
 0x9da   :  { %v3123_v61 = vadd.f32 %v3122_v10, %v3121_v40 }
 0x9dc   :  { %v3124_v25 = vrot.slane %v3123_v61, 1 }
 0x9de   :  { %v3125_v41 = vadd.f32 %v3124_v25, %v3123_v61 }
 0x9e0   :  { %v3126_v18 = vmul.f32 0.25, %v3125_v41 }
 0x9e2   :  { %v3127_v19 = vadd.f32 1e-05, %v3126_v18 }
 0x9e4   :  { %4589 = vrsqrt.f32 %v3127_v19 }
 0x9ee   :  { %v4590_v17 = vpop.eup %4589 }
 0x9ef   :  { %v3129_v63 = vmul.f32 %v4590_v17, %v3117_v12 }
 0x9f1   :  { %v3136_v21 = vmul.f32 %v3551_v53, %v3129_v63  ;;  %v3559_v53 = vld [vmem:[#allocation44] ss:$0 sm:$0xff] }
 0x9f3   :  { %v3143_v62 = vadd.f32 %v3552_v20, %v3136_v21  ;;  %v3560_v20 = vld [vmem:[#allocation46] ss:$0 sm:$0xff] }
 0x9f5   :  { %v3144_v23 = vmax.f32 %v3143_v62, 0.0 }
 0x9f7   :  { %3697 = vmatmul.mubr.msk.f32.vlgmr.msra.gmra.mrb[16].mxu1 %vm578_vm0, %v3144_v23 }
 0x9f8   :  { %3703 = vmatprep.mubr.msk.f32.mxu1 %vm5389_vm2, %v5387_v0  ;;  %4459 = vmatpush3.bf16.msra.mxu1 %v4458_v16 }
 0x9f9   :  { %3706 = vmatprep.subr.mxu1 %v5387_v0 }
 0xaca   :  { %v3227_v27 = vpop.f32.mrb[16].mxu1 }
 0xacb   :  { %v3228_v28 = vadd.f32 %v3553_v26, %v3227_v27  ;;  %v3698_v44 = vpop.f32.mrb[17].mxu1 }
 0xacd   :  { %v3232_v24 = vsel %vm3231_vm6, %v3228_v28, 0.0 }
 0xace   :  { %v3233_v31 = vrot.slane %v3232_v24, 4 }
 0xad0   :  { %v3234_v32 = vadd.f32 %v3233_v31, %v3232_v24 }
 0xad2   :  { %v3235_v33 = vrot.slane %v3234_v32, 2 }
 0xad4   :  { %v3236_v34 = vadd.f32 %v3235_v33, %v3234_v32 }
 0xad6   :  { %v3237_v36 = vrot.slane %v3236_v34, 1 }
 0xad8   :  { %v3238_v1 = vadd.f32 %v3237_v36, %v3236_v34 }
 0xada   :  { %v3239_v56 = vmul.f32 0.25, %v3238_v1 }
 0xadc   :  { %v3240_v37 = vsub.f32 %v3228_v28, %v3239_v56 }
 0xade   :  { %v3241_v42 = vmul.f32 %v3240_v37, %v3240_v37 }
 0xae0   :  { %v3242_v2 = vsel %vm3231_vm6, %v3241_v42, 0.0 }
 0xae1   :  { %v3243_v48 = vrot.slane %v3242_v2, 4 }
 0xae3   :  { %v3244_v47 = vadd.f32 %v3243_v48, %v3242_v2 }
 0xae5   :  { %v3245_v57 = vrot.slane %v3244_v47, 2 }
 0xae7   :  { %v3246_v49 = vadd.f32 %v3245_v57, %v3244_v47 }
 0xae9   :  { %v3247_v50 = vrot.slane %v3246_v49, 1 }
 0xaeb   :  { %v3248_v51 = vadd.f32 %v3247_v50, %v3246_v49 }
 0xaed   :  { %v3249_v45 = vmul.f32 0.25, %v3248_v51 }
 0xaef   :  { %v3250_v52 = vadd.f32 1e-05, %v3249_v45 }
 0xaf1   :  { %4591 = vrsqrt.f32 %v3250_v52 }
 0xafb   :  { %v4592_v54 = vpop.eup %4591 }
 0xafc   :  { %v3252_v5 = vmul.f32 %v4592_v54, %v3240_v37 }
 0xafe   :  { %v3259_v58 = vmul.f32 %v3555_v55, %v3252_v5 }
 0xb00   :  { %v3266_v59 = vadd.f32 %v3556_v35, %v3259_v58 }
 0xb02   :  { %v3267_v22 = vmax.f32 %v3266_v59, 0.0 }
 0xb04   :  { %3704 = vmatmul.mubr.msk.f32.vlgmr.msra.gmra.mrb[18].mxu1 %vm3279_vm7, %v3267_v22 }
 0xb05   :  { %3708 = vmatprep.mubr.msk.f32.mxu1 %vm5389_vm2, %v5387_v0  ;;  %3707 = vmatpush3.msra.mxu1 %v3390_v3 }
 0xbd7   :  { %v3349_v60 = vpop.f32.mrb[18].mxu1 }
 0xbd8   :  { %v3350_v38 = vadd.f32 %v3557_v4, %v3349_v60  ;;  %v3705_v6 = vpop.f32.mrb[19].mxu1 }
 0xbda   :  { %v3354_v8 = vsel %vm3353_vm8, %v3350_v38, 0.0 }
 0xbdb   :  { %v3355_v39 = vrot.slane %v3354_v8, 4 }
 0xbdd   :  { %v3356_v46 = vadd.f32 %v3355_v39, %v3354_v8 }
 0xbdf   :  { %v3357_v7 = vrot.slane %v3356_v46, 2 }
 0xbe1   :  { %v3358_v30 = vadd.f32 %v3357_v7, %v3356_v46 }
 0xbe3   :  { %v3359_v9 = vrot.slane %v3358_v30, 1 }
 0xbe5   :  { %v3360_v11 = vadd.f32 %v3359_v9, %v3358_v30 }
 0xbe7   :  { %v3361_v12 = vmul.f32 0.25, %v3360_v11 }
 0xbe9   :  { %v3362_v13 = vsub.f32 %v3350_v38, %v3361_v12 }
 0xbeb   :  { %v3363_v14 = vmul.f32 %v3362_v13, %v3362_v13 }
 0xbed   :  { %v3364_v15 = vsel %vm3353_vm8, %v3363_v14, 0.0 }
 0xbee   :  { %v3365_v40 = vrot.slane %v3364_v15, 4 }
 0xbf0   :  { %v3366_v0 = vadd.f32 %v3365_v40, %v3364_v15 }
 0xbf2   :  { %v3367_v10 = vrot.slane %v3366_v0, 2 }
 0xbf4   :  { %v3368_v61 = vadd.f32 %v3367_v10, %v3366_v0 }
 0xbf6   :  { %v3369_v25 = vrot.slane %v3368_v61, 1 }
 0xbf8   :  { %v3370_v41 = vadd.f32 %v3369_v25, %v3368_v61 }
 0xbfa   :  { %v3371_v18 = vmul.f32 0.25, %v3370_v41 }
 0xbfc   :  { %v3372_v19 = vadd.f32 1e-05, %v3371_v18 }
 0xbfe   :  { %4593 = vrsqrt.f32 %v3372_v19 }
 0xc08   :  { %v4594_v17 = vpop.eup %4593 }
 0xc09   :  { %v3374_v63 = vmul.f32 %v4594_v17, %v3362_v13 }
 0xc0b   :  { %v3381_v21 = vmul.f32 %v3559_v53, %v3374_v63 }
 0xc0d   :  { %v3388_v62 = vadd.f32 %v3560_v20, %v3381_v21 }
 0xc0f   :  { %v3389_v23 = vmax.f32 %v3388_v62, 0.0 }
 0xc11   :  { %3709 = vmatmul.mubr.msk.f32.vlgmr.msra.gmra.mrb[20].mxu1 %vm3398_vm9, %v3389_v23 }
 0xce4   :  { %v3468_v29 = vpop.f32.mrb[20].mxu1 }
 0xce5   :  { %v3469_v16 = vadd.f32 %v3561_v43, %v3468_v29  ;;  %v3710_v26 = vpop.f32.mrb[21].mxu1 }
 0xce7   :  { %3473 = vst.msk [vmem:[#allocation49] sm:$0xf] %vm3472_vm10, %v3469_v16 }
 0xce8   :  { %5269 = shalt.err (!%p5266_p6)
}
 0xce9   :  { %s5270_s14 = scalar_lea.hbm %s5574_s5, 64 }
 0xcea   :  { %p5271_p7 = scmp.ne.s32.totalorder %s5574_s5, %s5270_s14  ;;  %p5274_p8 = scmp.lt.u32.totalorder %s5270_s14, %s5574_s5 }
 0xcec   :  { %p5276_p9 = pnand %p5274_p8, %p5271_p7 }
 0xcee   :  { %5279 = shalt.err (!%p5276_p9)
}
 0xcef   :  { %3483 = dma.vmem_to_hbm [thread:$0]  %s3481_s0, 64, %s5574_s5, [#allocation4]  }
 0xcf0   :  { %5312 = dma.done.wait [#allocation4], 64  }
 0xcf1   :  { %5313 = vsyncadd [#allocation4], 4294967232 }
 0xcf2   :  { %3487 = vsyncpa [#allocation3], 1 }
 0xcf3   :  { %3488 = vsyncpa [#allocation6], 1 }
 0xcf4   :  { %3489 = vsyncpa [#allocation9], 1 }
 0xcf5   :  { %3490 = vsyncpa [#allocation12], 1 }
 0xcf6   :  { %3491 = vsyncpa [#allocation15], 1 }
 0xcf7   :  { %3492 = vsyncpa [#allocation18], 1 }
 0xcf8   :  { %3493 = vsyncpa [#allocation21], 1 }
 0xcf9   :  { %3494 = vsyncpa [#allocation24], 1 }
 0xcfa   :  { %3495 = vsyncpa [#allocation27], 1 }
 0xcfb   :  { %3496 = vsyncpa [#allocation30], 1 }
 0xcfc   :  { %3497 = vsyncpa [#allocation33], 1 }
 0xcfd   :  { %3498 = vsyncpa [#allocation36], 1 }
 0xcfe   :  { %3499 = vsyncpa [#allocation39], 1 }
 0xcff   :  { %3500 = vsyncpa [#allocation42], 1 }
 0xd00   :  { %3501 = vsyncpa [#allocation45], 1 }
 0xd01   :  { %3502 = vsyncpa [#allocation48], 1 }
 0xd02   :  { %3503 = vsyncpa [#allocation4], 1 }

</bundles_post_ra>
